<compile_context>
chip_gen: v7x
topology: tpu7x:2x2x1
jax: 0.10.0
libtpu: 0.0.40
codegen_flags: <defaults>
</compile_context>

<pallas_src>
import jax
import jax.numpy as jnp
from jax.experimental import pallas as pl
from jax.experimental.pallas import tpu as pltpu

# ----------------------------- tiny config -----------------------------
B = 2          # batch
S = 8          # source (encoder) seq len
T = 8          # target (decoder) seq len
H = 32         # hidden size
NH = 4         # attention heads
DH = H // NH   # head dim
FF = 64        # FFN intermediate size
V = 64         # vocab size
MAXPOS = 16    # max position embeddings
N_ENC = 2      # encoder layers
N_DEC = 2      # decoder layers
EPS = 1e-12    # BERT layer-norm eps
NEG = -1e9     # additive mask value
LANE = 128     # padded lane width used for every last dim inside the kernel


# ----------------------------- slab layouts -----------------------------
def _layout(entries):
    off, lay = 0, {}
    for name, rows in entries:
        lay[name] = (off, rows)
        off += rows
    return lay, off


def _w_entries():
    # bf16 weight slab: each weight stored as (k_rows, 128), zero padded.
    e = []
    for l in range(N_ENC):
        e += [(f"e{l}_wqkv", LANE), (f"e{l}_wo", H),
              (f"e{l}_w1", LANE), (f"e{l}_w2", LANE)]
    for l in range(N_DEC):
        e += [(f"d{l}_wqkv", LANE), (f"d{l}_wo", H), (f"d{l}_xwq", LANE),
              (f"d{l}_xwkv", LANE), (f"d{l}_xwo", H),
              (f"d{l}_w1", LANE), (f"d{l}_w2", LANE)]
    e += [("lm_w", LANE)]
    return e


def _c_entries():
    # f32 constant slab: LN params (2 rows: gamma;beta) and biases (1 row).
    e = [("enc_eln", 2), ("dec_eln", 2)]
    for l in range(N_ENC):
        e += [(f"e{l}_bqkv", 1), (f"e{l}_bo", 1), (f"e{l}_ln1", 2),
              (f"e{l}_b1", 1), (f"e{l}_b2", 1), (f"e{l}_ln2", 2)]
    for l in range(N_DEC):
        e += [(f"d{l}_bqkv", 1), (f"d{l}_bo", 1), (f"d{l}_ln1", 2),
              (f"d{l}_xbq", 1), (f"d{l}_xbkv", 1), (f"d{l}_xbo", 1),
              (f"d{l}_lnx", 2),
              (f"d{l}_b1", 1), (f"d{l}_b2", 1), (f"d{l}_ln2", 2)]
    e += [("lm_b", 1)]
    return e


def _b_entries():
    # f32 per-batch slab: embeddings, 1-D key masks, shifted-label one-hots.
    return [("enc_emb", S), ("dec_emb", T), ("enc_kmask", 1), ("dec_kmask", 1),
            ("lab_onehot", T)]


W_ENTRIES = _w_entries()
C_ENTRIES = _c_entries()
B_ENTRIES = _b_entries()
W_LAY, _W = _layout(W_ENTRIES)
C_LAY, _C = _layout(C_ENTRIES)
B_LAY, _B = _layout(B_ENTRIES)
W_ROWS = ((_W + 15) // 16) * 16     # bf16 sublane tile = 16
C_ROWS = ((_C + 7) // 8) * 8        # f32 sublane tile = 8
B_ROWS = ((_B + 7) // 8) * 8


# ----------------------------- the fused kernel -----------------------------
def _fwd_kernel(cs_ref, ws_ref, bs_ref, loss_ref):
    # -- static-offset slab accessors ----------------------------------------
    def W(name):
        off, k = W_LAY[name]
        return ws_ref[off:off + k, :]            # bf16 (k, 128)

    def C(name):
        off, r = C_LAY[name]
        return cs_ref[off:off + r, :]            # f32 (r, 128)

    def Bk(name):
        off, r = B_LAY[name]
        return bs_ref[off:off + r, :]            # f32 (r, 128)

    def mm(a, w_bf16):
        # (M, K) f32 x (K, 128) bf16 -> (M, 128) f32 (bf16 operands, f32 acc)
        return jnp.dot(a.astype(jnp.bfloat16), w_bf16,
                       preferred_element_type=jnp.float32)

    def ln(x, gb):
        # x: (M, 128) with columns >= H exactly zero; stats over the H real
        # columns only (E[x^2]-mu^2 form so the zero padding cancels).
        g, b = gb[0:1, :], gb[1:2, :]            # padded gamma/beta are zero
        mu = jnp.sum(x, axis=-1, keepdims=True) * (1.0 / H)
        var = jnp.sum(x * x, axis=-1, keepdims=True) * (1.0 / H) - mu * mu
        inv = jax.lax.rsqrt(jnp.maximum(var, 0.0) + EPS)
        return (x - mu) * inv * g + b

    scale = 1.0 / float(DH) ** 0.5

    def attention(q, k, v, addmask, wo, bo):
        # q: (tq, H), k/v: (tk, H), addmask broadcastable to (tq, tk).
        # Heads stacked into a leading batch axis -> two batched einsums and
        # one batched softmax; contexts never touch VMEM scratch.
        q3 = jnp.stack([q[:, h * DH:(h + 1) * DH] for h in range(NH)], axis=0)
        k3 = jnp.stack([k[:, h * DH:(h + 1) * DH] for h in range(NH)], axis=0)
        v3 = jnp.stack([v[:, h * DH:(h + 1) * DH] for h in range(NH)], axis=0)
        s = jnp.einsum('hqd,hkd->hqk',
                       q3.astype(jnp.bfloat16), k3.astype(jnp.bfloat16),
                       preferred_element_type=jnp.float32) * scale
        s = s + addmask[None, :, :]
        s = s - jnp.max(s, axis=-1, keepdims=True)
        p = jnp.exp(s)
        p = p / jnp.sum(p, axis=-1, keepdims=True)          # exact divide
        ctx3 = jnp.einsum('hqk,hkd->hqd',
                          p.astype(jnp.bfloat16), v3.astype(jnp.bfloat16),
                          preferred_element_type=jnp.float32)  # (NH, tq, DH)
        ctx = jnp.concatenate([ctx3[h] for h in range(NH)], axis=-1)  # (tq, H)
        return mm(ctx, wo) + bo                             # (tq, 128)

    # -- additive masks rebuilt in-kernel from the 1-D key masks --------------
    enc_km = Bk("enc_kmask")[0:1, 0:S]                      # (1, S)
    enc_mask = (1.0 - enc_km) * NEG                         # encoder / cross keys
    dec_km = Bk("dec_kmask")[0:1, 0:T]                      # (1, T)
    ri = jax.lax.broadcasted_iota(jnp.int32, (T, T), 0)
    ci = jax.lax.broadcasted_iota(jnp.int32, (T, T), 1)
    causal = jnp.where(ci <= ri, 0.0, NEG)
    dec_mask = causal + (1.0 - dec_km) * NEG                # (T, T)

    # ------------------------------- encoder --------------------------------
    h = ln(Bk("enc_emb"), C("enc_eln"))                     # (S, 128)
    for l in range(N_ENC):
        qkv = mm(h, W(f"e{l}_wqkv")) + C(f"e{l}_bqkv")      # (S, 128)
        a = attention(qkv[:, 0:H], qkv[:, H:2 * H], qkv[:, 2 * H:3 * H],
                      enc_mask, W(f"e{l}_wo"), C(f"e{l}_bo"))
        h = ln(h + a, C(f"e{l}_ln1"))
        inter = jax.nn.gelu(mm(h, W(f"e{l}_w1")) + C(f"e{l}_b1"),
                            approximate=True)
        h = ln(h + mm(inter, W(f"e{l}_w2")) + C(f"e{l}_b2"), C(f"e{l}_ln2"))
    enc_h = h

    # ------------------------------- decoder --------------------------------
    d = ln(Bk("dec_emb"), C("dec_eln"))                     # (T, 128)
    for l in range(N_DEC):
        qkv = mm(d, W(f"d{l}_wqkv")) + C(f"d{l}_bqkv")
        a = attention(qkv[:, 0:H], qkv[:, H:2 * H], qkv[:, 2 * H:3 * H],
                      dec_mask, W(f"d{l}_wo"), C(f"d{l}_bo"))
        d = ln(d + a, C(f"d{l}_ln1"))
        q = mm(d, W(f"d{l}_xwq")) + C(f"d{l}_xbq")          # (T, 128)
        kv = mm(enc_h, W(f"d{l}_xwkv")) + C(f"d{l}_xbkv")   # (S, 128)
        c = attention(q[:, 0:H], kv[:, 0:H], kv[:, H:2 * H],
                      enc_mask, W(f"d{l}_xwo"), C(f"d{l}_xbo"))
        d = ln(d + c, C(f"d{l}_lnx"))
        inter = jax.nn.gelu(mm(d, W(f"d{l}_w1")) + C(f"d{l}_b1"),
                            approximate=True)
        d = ln(d + mm(inter, W(f"d{l}_w2")) + C(f"d{l}_b2"), C(f"d{l}_ln2"))

    # -------- LM head (tied / pre-transposed embeddings) + shifted CE --------
    logits = mm(d, W("lm_w")) + C("lm_b")                   # (T, 128); pad=NEG
    m = jnp.max(logits, axis=-1, keepdims=True)
    lse = jnp.log(jnp.sum(jnp.exp(logits - m), axis=-1, keepdims=True)) + m
    tgt = jnp.sum(logits * Bk("lab_onehot"), axis=-1, keepdims=True)
    ridx = jax.lax.broadcasted_iota(jnp.int32, (T, 1), 0)
    wgt = jnp.where(ridx < (T - 1), 1.0, 0.0)               # last position unused
    total = jnp.sum((lse - tgt) * wgt)                      # per-batch CE sum
    loss_ref[...] = jnp.broadcast_to(total, (1, LANE))


# ----------------------------- wrapper (XLA glue) -----------------------------
def _pad_block(x, rows, cols=LANE):
    x = jnp.asarray(x, jnp.float32)
    if x.ndim == 1:
        x = x[None, :]
    out = jnp.zeros((rows, cols), jnp.float32)
    return out.at[:x.shape[0], :x.shape[1]].set(x)


def pack_weight_slab(params):
    blocks = []
    for name, rows in W_ENTRIES:
        w = params["dec_word"].T if name == "lm_w" else params[name]
        blocks.append(_pad_block(w, rows))
    slab = jnp.concatenate(blocks, axis=0)
    if slab.shape[0] < W_ROWS:
        slab = jnp.concatenate(
            [slab, jnp.zeros((W_ROWS - slab.shape[0], LANE), jnp.float32)], 0)
    return slab.astype(jnp.bfloat16)


def pack_const_slab(params):
    blocks = []
    for name, rows in C_ENTRIES:
        if name == "lm_b":
            row = jnp.full((1, LANE), NEG, jnp.float32)
            row = row.at[0, :V].set(params["lm_bias"])
            blocks.append(row)
        else:
            blocks.append(_pad_block(params[name], rows))
    slab = jnp.concatenate(blocks, axis=0)
    if slab.shape[0] < C_ROWS:
        slab = jnp.concatenate(
            [slab, jnp.zeros((C_ROWS - slab.shape[0], LANE), jnp.float32)], 0)
    return slab


def pack_batch_slab(params, input_ids, input_mask, target_ids, target_mask):
    enc_emb = params["enc_word"][input_ids] + params["enc_pos"][:S][None, :, :]
    dec_emb = params["dec_word"][target_ids] + params["dec_pos"][:T][None, :, :]
    enc_emb = jnp.pad(enc_emb, ((0, 0), (0, 0), (0, LANE - H)))
    dec_emb = jnp.pad(dec_emb, ((0, 0), (0, 0), (0, LANE - H)))
    enc_km = jnp.pad(input_mask.astype(jnp.float32),
                     ((0, 0), (0, LANE - S)))[:, None, :]
    dec_km = jnp.pad(target_mask.astype(jnp.float32),
                     ((0, 0), (0, LANE - T)))[:, None, :]
    labels = jnp.concatenate(
        [target_ids[:, 1:], jnp.zeros((B, 1), jnp.int32)], axis=1)
    onehot = jax.nn.one_hot(labels, LANE, dtype=jnp.float32)     # (B, T, 128)
    parts = [enc_emb, dec_emb, enc_km, dec_km, onehot]
    used = S + T + 1 + 1 + T
    if used < B_ROWS:
        parts.append(jnp.zeros((B, B_ROWS - used, LANE), jnp.float32))
    return jnp.concatenate(parts, axis=1)


def forward(params, input_ids, input_mask, target_ids, target_mask):
    """Scalar teacher-forcing LM loss (bert2bert training path)."""
    cs = pack_const_slab(params)
    ws = pack_weight_slab(params)
    bs = pack_batch_slab(params, input_ids, input_mask, target_ids, target_mask)

    per_batch = pl.pallas_call(
        _fwd_kernel,
        grid=(B,),
        in_specs=[
            pl.BlockSpec((C_ROWS, LANE), lambda b: (0, 0)),
            pl.BlockSpec((W_ROWS, LANE), lambda b: (0, 0)),
            pl.BlockSpec((None, B_ROWS, LANE), lambda b: (b, 0, 0)),
        ],
        out_specs=pl.BlockSpec((None, 1, LANE), lambda b: (b, 0, 0)),
        out_shape=jax.ShapeDtypeStruct((B, 1, LANE), jnp.float32),
        compiler_params=pltpu.CompilerParams(
            dimension_semantics=("parallel",)),   # v7x: one batch per TC
    )(cs, ws, bs)

    return jnp.sum(per_batch[:, 0, 0]) / float(B * (T - 1))


# ----------------------------- deterministic init -----------------------------
def init_params(key):
    keys = iter(jax.random.split(key, 64))

    def nrm(shape):
        return 0.02 * jax.random.normal(next(keys), shape, jnp.float32)

    def ln2():
        return jnp.concatenate(
            [jnp.ones((1, H), jnp.float32), jnp.zeros((1, H), jnp.float32)], 0)

    p = dict(
        enc_word=nrm((V, H)), enc_pos=nrm((MAXPOS, H)),
        dec_word=nrm((V, H)), dec_pos=nrm((MAXPOS, H)),
        enc_eln=ln2(), dec_eln=ln2(),
        lm_bias=jnp.zeros((V,), jnp.float32),
    )
    for l in range(N_ENC):
        p[f"e{l}_wqkv"] = nrm((H, 3 * H)); p[f"e{l}_bqkv"] = jnp.zeros((1, 3 * H))
        p[f"e{l}_wo"] = nrm((H, H));       p[f"e{l}_bo"] = jnp.zeros((1, H))
        p[f"e{l}_ln1"] = ln2()
        p[f"e{l}_w1"] = nrm((H, FF));      p[f"e{l}_b1"] = jnp.zeros((1, FF))
        p[f"e{l}_w2"] = nrm((FF, H));      p[f"e{l}_b2"] = jnp.zeros((1, H))
        p[f"e{l}_ln2"] = ln2()
    for l in range(N_DEC):
        p[f"d{l}_wqkv"] = nrm((H, 3 * H)); p[f"d{l}_bqkv"] = jnp.zeros((1, 3 * H))
        p[f"d{l}_wo"] = nrm((H, H));       p[f"d{l}_bo"] = jnp.zeros((1, H))
        p[f"d{l}_ln1"] = ln2()
        p[f"d{l}_xwq"] = nrm((H, H));      p[f"d{l}_xbq"] = jnp.zeros((1, H))
        p[f"d{l}_xwkv"] = nrm((H, 2 * H)); p[f"d{l}_xbkv"] = jnp.zeros((1, 2 * H))
        p[f"d{l}_xwo"] = nrm((H, H));      p[f"d{l}_xbo"] = jnp.zeros((1, H))
        p[f"d{l}_lnx"] = ln2()
        p[f"d{l}_w1"] = nrm((H, FF));      p[f"d{l}_b1"] = jnp.zeros((1, FF))
        p[f"d{l}_w2"] = nrm((FF, H));      p[f"d{l}_b2"] = jnp.zeros((1, H))
        p[f"d{l}_ln2"] = ln2()
    return p


# ----------------------------- main -----------------------------
if __name__ == "__main__":
    params = init_params(jax.random.PRNGKey(0))

    k_in, k_tgt = jax.random.split(jax.random.PRNGKey(0), 2)
    input_ids = jax.random.randint(k_in, (B, S), 0, V, dtype=jnp.int32)
    target_ids = jax.random.randint(k_tgt, (B, T), 0, V, dtype=jnp.int32)
    input_mask = jnp.ones((B, S), jnp.float32).at[1, 6:].set(0.0)
    target_mask = jnp.ones((B, T), jnp.float32).at[1, 5:].set(0.0)

    loss = jax.jit(forward)(params, input_ids, input_mask, target_ids,
                            target_mask)
    loss = jax.block_until_ready(loss)
    assert loss.shape == () and bool(jnp.isfinite(loss))
    print("KERNEL_OK")
</pallas_src>

<mosaic_0001>
module attributes {stable_mosaic.version = 11 : i64} {
  func.func @_fwd_kernel(%arg0: i32, %arg1: memref<48x128xf32, #tpu.memory_space<vmem>>, %arg2: memref<2368x128xbf16, #tpu.memory_space<vmem>>, %arg3: memref<1x32x128xf32, #tpu.memory_space<vmem>>, %arg4: memref<1x1x128xf32, #tpu.memory_space<vmem>>) attributes {dimension_semantics = [#tpu.dimension_semantics<parallel>], iteration_bounds = array<i64: 2>, scalar_prefetch = 0 : i64, scratch_operands = 0 : i64, tpu.core_type = #tpu.core_type<tc>, window_params = [{pipeline_mode = #tpu.pipeline_mode<synchronous>, transform_indices = @transform_0, window_bounds = array<i64: 48, 128>}, {pipeline_mode = #tpu.pipeline_mode<synchronous>, transform_indices = @transform_1, window_bounds = array<i64: 2368, 128>}, {transform_indices = @transform_2, window_bounds = array<i64: 1, 32, 128>}, {transform_indices = @transform_3, window_bounds = array<i64: 1, 1, 128>}]} {
    %c0 = arith.constant 0 : index
    %c16 = arith.constant 16 : index
    %c0_0 = arith.constant 0 : index
    %0 = vector.load %arg3[%c0, %c16, %c0_0] : memref<1x32x128xf32, #tpu.memory_space<vmem>>, vector<1x1x128xf32>
    %1 = vector.shape_cast %0 : vector<1x1x128xf32> to vector<1x128xf32>
    %2 = vector.extract_strided_slice %1 {offsets = [0, 0], sizes = [1, 8], strides = [1, 1]} : vector<1x128xf32> to vector<1x8xf32>
    %cst = arith.constant 1.000000e+00 : f32
    %3 = vector.broadcast %cst : f32 to vector<1x8xf32>
    %4 = arith.subf %3, %2 : vector<1x8xf32>
    %cst_1 = arith.constant -1.000000e+09 : f32
    %5 = vector.broadcast %cst_1 : f32 to vector<1x8xf32>
    %6 = arith.mulf %4, %5 : vector<1x8xf32>
    %c0_2 = arith.constant 0 : index
    %c17 = arith.constant 17 : index
    %c0_3 = arith.constant 0 : index
    %7 = vector.load %arg3[%c0_2, %c17, %c0_3] : memref<1x32x128xf32, #tpu.memory_space<vmem>>, vector<1x1x128xf32>
    %8 = vector.shape_cast %7 : vector<1x1x128xf32> to vector<1x128xf32>
    %9 = vector.extract_strided_slice %8 {offsets = [0, 0], sizes = [1, 8], strides = [1, 1]} : vector<1x128xf32> to vector<1x8xf32>
    %10 = tpu.iota {dimensions = array<i32: 0>} : vector<8x8xi32>
    %11 = tpu.iota {dimensions = array<i32: 1>} : vector<8x8xi32>
    %12 = arith.cmpi sle, %11, %10 : vector<8x8xi32>
    %cst_4 = arith.constant 0.000000e+00 : f32
    %cst_5 = arith.constant -1.000000e+09 : f32
    %13 = vector.broadcast %cst_4 : f32 to vector<8x8xf32>
    %14 = vector.broadcast %cst_5 : f32 to vector<8x8xf32>
    %15 = arith.select %12, %13, %14 : vector<8x8xi1>, vector<8x8xf32>
    %cst_6 = arith.constant 1.000000e+00 : f32
    %16 = vector.broadcast %cst_6 : f32 to vector<1x8xf32>
    %17 = arith.subf %16, %9 : vector<1x8xf32>
    %cst_7 = arith.constant -1.000000e+09 : f32
    %18 = vector.broadcast %cst_7 : f32 to vector<1x8xf32>
    %19 = arith.mulf %17, %18 : vector<1x8xf32>
    %20 = vector.broadcast %19 : vector<1x8xf32> to vector<8x8xf32>
    %21 = arith.addf %15, %20 : vector<8x8xf32>
    %c0_8 = arith.constant 0 : index
    %c0_9 = arith.constant 0 : index
    %c0_10 = arith.constant 0 : index
    %22 = vector.load %arg3[%c0_8, %c0_9, %c0_10] : memref<1x32x128xf32, #tpu.memory_space<vmem>>, vector<1x8x128xf32>
    %23 = vector.shape_cast %22 : vector<1x8x128xf32> to vector<8x128xf32>
    %c0_11 = arith.constant 0 : index
    %c0_12 = arith.constant 0 : index
    %24 = vector.load %arg1[%c0_11, %c0_12] : memref<48x128xf32, #tpu.memory_space<vmem>>, vector<2x128xf32>
    %25 = vector.extract_strided_slice %24 {offsets = [0, 0], sizes = [1, 128], strides = [1, 1]} : vector<2x128xf32> to vector<1x128xf32>
    %26 = vector.extract_strided_slice %24 {offsets = [1, 0], sizes = [1, 128], strides = [1, 1]} : vector<2x128xf32> to vector<1x128xf32>
    %cst_13 = arith.constant dense<0.000000e+00> : vector<8xf32>
    %27 = vector.multi_reduction <add>, %23, %cst_13 [1] : vector<8x128xf32> to vector<8xf32>
    %28 = vector.shape_cast %27 : vector<8xf32> to vector<8x1xf32>
    %cst_14 = arith.constant 3.125000e-02 : f32
    %29 = vector.broadcast %cst_14 : f32 to vector<8x1xf32>
    %30 = arith.mulf %28, %29 : vector<8x1xf32>
    %31 = arith.mulf %23, %23 : vector<8x128xf32>
    %cst_15 = arith.constant dense<0.000000e+00> : vector<8xf32>
    %32 = vector.multi_reduction <add>, %31, %cst_15 [1] : vector<8x128xf32> to vector<8xf32>
    %33 = vector.shape_cast %32 : vector<8xf32> to vector<8x1xf32>
    %cst_16 = arith.constant 3.125000e-02 : f32
    %34 = vector.broadcast %cst_16 : f32 to vector<8x1xf32>
    %35 = arith.mulf %33, %34 : vector<8x1xf32>
    %36 = arith.mulf %30, %30 : vector<8x1xf32>
    %37 = arith.subf %35, %36 : vector<8x1xf32>
    %cst_17 = arith.constant 0.000000e+00 : f32
    %38 = vector.broadcast %cst_17 : f32 to vector<8x1xf32>
    %39 = arith.maximumf %37, %38 : vector<8x1xf32>
    %cst_18 = arith.constant 9.99999996E-13 : f32
    %40 = vector.broadcast %cst_18 : f32 to vector<8x1xf32>
    %41 = arith.addf %39, %40 : vector<8x1xf32>
    %42 = math.rsqrt %41 : vector<8x1xf32>
    %43 = vector.broadcast %30 : vector<8x1xf32> to vector<8x128xf32>
    %44 = arith.subf %23, %43 : vector<8x128xf32>
    %45 = vector.broadcast %42 : vector<8x1xf32> to vector<8x128xf32>
    %46 = arith.mulf %44, %45 : vector<8x128xf32>
    %47 = vector.broadcast %25 : vector<1x128xf32> to vector<8x128xf32>
    %48 = arith.mulf %46, %47 : vector<8x128xf32>
    %49 = vector.broadcast %26 : vector<1x128xf32> to vector<8x128xf32>
    %50 = arith.addf %48, %49 : vector<8x128xf32>
    %c0_19 = arith.constant 0 : index
    %c0_20 = arith.constant 0 : index
    %51 = vector.load %arg2[%c0_19, %c0_20] : memref<2368x128xbf16, #tpu.memory_space<vmem>>, vector<128x128xbf16>
    %52 = arith.truncf %50 : vector<8x128xf32> to vector<8x128xbf16>
    %cst_21 = arith.constant dense<0.000000e+00> : vector<8x128xf32>
    %53 = tpu.matmul %52, %51, %cst_21 {dimension_numbers = #tpu.dot_dimension_numbers<[1], [0], [0], [1], [0, 0, 1, 1], [], []>} : vector<8x128xbf16>, vector<128x128xbf16>, vector<8x128xf32> -> vector<8x128xf32>
    %c4 = arith.constant 4 : index
    %c0_22 = arith.constant 0 : index
    %54 = vector.load %arg1[%c4, %c0_22] : memref<48x128xf32, #tpu.memory_space<vmem>>, vector<1x128xf32>
    %55 = vector.broadcast %54 : vector<1x128xf32> to vector<8x128xf32>
    %56 = arith.addf %53, %55 : vector<8x128xf32>
    %57 = vector.extract_strided_slice %56 {offsets = [0, 0], sizes = [8, 32], strides = [1, 1]} : vector<8x128xf32> to vector<8x32xf32>
    %58 = vector.extract_strided_slice %56 {offsets = [0, 32], sizes = [8, 32], strides = [1, 1]} : vector<8x128xf32> to vector<8x32xf32>
    %59 = vector.extract_strided_slice %56 {offsets = [0, 64], sizes = [8, 32], strides = [1, 1]} : vector<8x128xf32> to vector<8x32xf32>
    %c128 = arith.constant 128 : index
    %c0_23 = arith.constant 0 : index
    %60 = vector.load %arg2[%c128, %c0_23] : memref<2368x128xbf16, #tpu.memory_space<vmem>>, vector<32x128xbf16>
    %c5 = arith.constant 5 : index
    %c0_24 = arith.constant 0 : index
    %61 = vector.load %arg1[%c5, %c0_24] : memref<48x128xf32, #tpu.memory_space<vmem>>, vector<1x128xf32>
    %62 = vector.extract_strided_slice %57 {offsets = [0, 0], sizes = [8, 8], strides = [1, 1]} : vector<8x32xf32> to vector<8x8xf32>
    %63 = vector.extract_strided_slice %57 {offsets = [0, 8], sizes = [8, 8], strides = [1, 1]} : vector<8x32xf32> to vector<8x8xf32>
    %64 = vector.extract_strided_slice %57 {offsets = [0, 16], sizes = [8, 8], strides = [1, 1]} : vector<8x32xf32> to vector<8x8xf32>
    %65 = vector.extract_strided_slice %57 {offsets = [0, 24], sizes = [8, 8], strides = [1, 1]} : vector<8x32xf32> to vector<8x8xf32>
    %66 = vector.shape_cast %62 : vector<8x8xf32> to vector<1x8x8xf32>
    %67 = vector.shape_cast %63 : vector<8x8xf32> to vector<1x8x8xf32>
    %68 = vector.shape_cast %64 : vector<8x8xf32> to vector<1x8x8xf32>
    %69 = vector.shape_cast %65 : vector<8x8xf32> to vector<1x8x8xf32>
    %70 = tpu.concatenate %66, %67, %68, %69 in 0 : vector<1x8x8xf32>, vector<1x8x8xf32>, vector<1x8x8xf32>, vector<1x8x8xf32> -> vector<4x8x8xf32>
    %71 = vector.extract_strided_slice %58 {offsets = [0, 0], sizes = [8, 8], strides = [1, 1]} : vector<8x32xf32> to vector<8x8xf32>
    %72 = vector.extract_strided_slice %58 {offsets = [0, 8], sizes = [8, 8], strides = [1, 1]} : vector<8x32xf32> to vector<8x8xf32>
    %73 = vector.extract_strided_slice %58 {offsets = [0, 16], sizes = [8, 8], strides = [1, 1]} : vector<8x32xf32> to vector<8x8xf32>
    %74 = vector.extract_strided_slice %58 {offsets = [0, 24], sizes = [8, 8], strides = [1, 1]} : vector<8x32xf32> to vector<8x8xf32>
    %75 = vector.shape_cast %71 : vector<8x8xf32> to vector<1x8x8xf32>
    %76 = vector.shape_cast %72 : vector<8x8xf32> to vector<1x8x8xf32>
    %77 = vector.shape_cast %73 : vector<8x8xf32> to vector<1x8x8xf32>
    %78 = vector.shape_cast %74 : vector<8x8xf32> to vector<1x8x8xf32>
    %79 = tpu.concatenate %75, %76, %77, %78 in 0 : vector<1x8x8xf32>, vector<1x8x8xf32>, vector<1x8x8xf32>, vector<1x8x8xf32> -> vector<4x8x8xf32>
    %80 = vector.extract_strided_slice %59 {offsets = [0, 0], sizes = [8, 8], strides = [1, 1]} : vector<8x32xf32> to vector<8x8xf32>
    %81 = vector.extract_strided_slice %59 {offsets = [0, 8], sizes = [8, 8], strides = [1, 1]} : vector<8x32xf32> to vector<8x8xf32>
    %82 = vector.extract_strided_slice %59 {offsets = [0, 16], sizes = [8, 8], strides = [1, 1]} : vector<8x32xf32> to vector<8x8xf32>
    %83 = vector.extract_strided_slice %59 {offsets = [0, 24], sizes = [8, 8], strides = [1, 1]} : vector<8x32xf32> to vector<8x8xf32>
    %84 = vector.shape_cast %80 : vector<8x8xf32> to vector<1x8x8xf32>
    %85 = vector.shape_cast %81 : vector<8x8xf32> to vector<1x8x8xf32>
    %86 = vector.shape_cast %82 : vector<8x8xf32> to vector<1x8x8xf32>
    %87 = vector.shape_cast %83 : vector<8x8xf32> to vector<1x8x8xf32>
    %88 = tpu.concatenate %84, %85, %86, %87 in 0 : vector<1x8x8xf32>, vector<1x8x8xf32>, vector<1x8x8xf32>, vector<1x8x8xf32> -> vector<4x8x8xf32>
    %89 = arith.truncf %70 : vector<4x8x8xf32> to vector<4x8x8xbf16>
    %90 = arith.truncf %79 : vector<4x8x8xf32> to vector<4x8x8xbf16>
    "tpu.trace_start"() <{level = 10 : i32, message = "hqd,hkd->hqk"}> : () -> ()
    %cst_25 = arith.constant dense<0.000000e+00> : vector<4x8x8xf32>
    %91 = tpu.matmul %89, %90, %cst_25 {dimension_numbers = #tpu.dot_dimension_numbers<[2], [2], [1], [1], [0, 0, 0, 1, 1, 1], [0], [0]>} : vector<4x8x8xbf16>, vector<4x8x8xbf16>, vector<4x8x8xf32> -> vector<4x8x8xf32>
    "tpu.trace_stop"() : () -> ()
    %cst_26 = arith.constant 0.353553385 : f32
    %92 = vector.broadcast %cst_26 : f32 to vector<4x8x8xf32>
    %93 = arith.mulf %91, %92 : vector<4x8x8xf32>
    %94 = vector.shape_cast %6 : vector<1x8xf32> to vector<1x1x8xf32>
    %95 = vector.broadcast %94 : vector<1x1x8xf32> to vector<4x8x8xf32>
    %96 = arith.addf %93, %95 : vector<4x8x8xf32>
    %cst_27 = arith.constant dense<0xFF800000> : vector<4x8xf32>
    %97 = vector.multi_reduction <maximumf>, %96, %cst_27 [2] : vector<4x8x8xf32> to vector<4x8xf32>
    %98 = vector.shape_cast %97 : vector<4x8xf32> to vector<4x8x1xf32>
    %99 = vector.broadcast %98 : vector<4x8x1xf32> to vector<4x8x8xf32>
    %100 = arith.subf %96, %99 : vector<4x8x8xf32>
    %101 = math.exp %100 : vector<4x8x8xf32>
    %cst_28 = arith.constant dense<0.000000e+00> : vector<4x8xf32>
    %102 = vector.multi_reduction <add>, %101, %cst_28 [2] : vector<4x8x8xf32> to vector<4x8xf32>
    %103 = vector.shape_cast %102 : vector<4x8xf32> to vector<4x8x1xf32>
    %104 = vector.broadcast %103 : vector<4x8x1xf32> to vector<4x8x8xf32>
    %105 = arith.divf %101, %104 : vector<4x8x8xf32>
    %106 = arith.truncf %105 : vector<4x8x8xf32> to vector<4x8x8xbf16>
    %107 = arith.truncf %88 : vector<4x8x8xf32> to vector<4x8x8xbf16>
    "tpu.trace_start"() <{level = 10 : i32, message = "hqk,hkd->hqd"}> : () -> ()
    %cst_29 = arith.constant dense<0.000000e+00> : vector<4x8x8xf32>
    %108 = tpu.matmul %106, %107, %cst_29 {dimension_numbers = #tpu.dot_dimension_numbers<[2], [1], [1], [2], [0, 0, 0, 1, 1, 2], [0], [0]>} : vector<4x8x8xbf16>, vector<4x8x8xbf16>, vector<4x8x8xf32> -> vector<4x8x8xf32>
    "tpu.trace_stop"() : () -> ()
    %109 = vector.extract_strided_slice %108 {offsets = [0, 0, 0], sizes = [1, 8, 8], strides = [1, 1, 1]} : vector<4x8x8xf32> to vector<1x8x8xf32>
    %110 = vector.shape_cast %109 : vector<1x8x8xf32> to vector<8x8xf32>
    %111 = vector.extract_strided_slice %108 {offsets = [1, 0, 0], sizes = [1, 8, 8], strides = [1, 1, 1]} : vector<4x8x8xf32> to vector<1x8x8xf32>
    %112 = vector.shape_cast %111 : vector<1x8x8xf32> to vector<8x8xf32>
    %113 = vector.extract_strided_slice %108 {offsets = [2, 0, 0], sizes = [1, 8, 8], strides = [1, 1, 1]} : vector<4x8x8xf32> to vector<1x8x8xf32>
    %114 = vector.shape_cast %113 : vector<1x8x8xf32> to vector<8x8xf32>
    %115 = vector.extract_strided_slice %108 {offsets = [3, 0, 0], sizes = [1, 8, 8], strides = [1, 1, 1]} : vector<4x8x8xf32> to vector<1x8x8xf32>
    %116 = vector.shape_cast %115 : vector<1x8x8xf32> to vector<8x8xf32>
    %117 = tpu.concatenate %110, %112, %114, %116 in 1 : vector<8x8xf32>, vector<8x8xf32>, vector<8x8xf32>, vector<8x8xf32> -> vector<8x32xf32>
    %118 = arith.truncf %117 : vector<8x32xf32> to vector<8x32xbf16>
    %cst_30 = arith.constant dense<0.000000e+00> : vector<8x128xf32>
    %119 = tpu.matmul %118, %60, %cst_30 {dimension_numbers = #tpu.dot_dimension_numbers<[1], [0], [0], [1], [0, 0, 1, 1], [], []>} : vector<8x32xbf16>, vector<32x128xbf16>, vector<8x128xf32> -> vector<8x128xf32>
    %120 = vector.broadcast %61 : vector<1x128xf32> to vector<8x128xf32>
    %121 = arith.addf %119, %120 : vector<8x128xf32>
    %122 = arith.addf %50, %121 : vector<8x128xf32>
    %c6 = arith.constant 6 : index
    %c0_31 = arith.constant 0 : index
    %123 = vector.load %arg1[%c6, %c0_31] : memref<48x128xf32, #tpu.memory_space<vmem>>, vector<2x128xf32>
    %124 = vector.extract_strided_slice %123 {offsets = [0, 0], sizes = [1, 128], strides = [1, 1]} : vector<2x128xf32> to vector<1x128xf32>
    %125 = vector.extract_strided_slice %123 {offsets = [1, 0], sizes = [1, 128], strides = [1, 1]} : vector<2x128xf32> to vector<1x128xf32>
    %cst_32 = arith.constant dense<0.000000e+00> : vector<8xf32>
    %126 = vector.multi_reduction <add>, %122, %cst_32 [1] : vector<8x128xf32> to vector<8xf32>
    %127 = vector.shape_cast %126 : vector<8xf32> to vector<8x1xf32>
    %cst_33 = arith.constant 3.125000e-02 : f32
    %128 = vector.broadcast %cst_33 : f32 to vector<8x1xf32>
    %129 = arith.mulf %127, %128 : vector<8x1xf32>
    %130 = arith.mulf %122, %122 : vector<8x128xf32>
    %cst_34 = arith.constant dense<0.000000e+00> : vector<8xf32>
    %131 = vector.multi_reduction <add>, %130, %cst_34 [1] : vector<8x128xf32> to vector<8xf32>
    %132 = vector.shape_cast %131 : vector<8xf32> to vector<8x1xf32>
    %cst_35 = arith.constant 3.125000e-02 : f32
    %133 = vector.broadcast %cst_35 : f32 to vector<8x1xf32>
    %134 = arith.mulf %132, %133 : vector<8x1xf32>
    %135 = arith.mulf %129, %129 : vector<8x1xf32>
    %136 = arith.subf %134, %135 : vector<8x1xf32>
    %cst_36 = arith.constant 0.000000e+00 : f32
    %137 = vector.broadcast %cst_36 : f32 to vector<8x1xf32>
    %138 = arith.maximumf %136, %137 : vector<8x1xf32>
    %cst_37 = arith.constant 9.99999996E-13 : f32
    %139 = vector.broadcast %cst_37 : f32 to vector<8x1xf32>
    %140 = arith.addf %138, %139 : vector<8x1xf32>
    %141 = math.rsqrt %140 : vector<8x1xf32>
    %142 = vector.broadcast %129 : vector<8x1xf32> to vector<8x128xf32>
    %143 = arith.subf %122, %142 : vector<8x128xf32>
    %144 = vector.broadcast %141 : vector<8x1xf32> to vector<8x128xf32>
    %145 = arith.mulf %143, %144 : vector<8x128xf32>
    %146 = vector.broadcast %124 : vector<1x128xf32> to vector<8x128xf32>
    %147 = arith.mulf %145, %146 : vector<8x128xf32>
    %148 = vector.broadcast %125 : vector<1x128xf32> to vector<8x128xf32>
    %149 = arith.addf %147, %148 : vector<8x128xf32>
    %c160 = arith.constant 160 : index
    %c0_38 = arith.constant 0 : index
    %150 = vector.load %arg2[%c160, %c0_38] : memref<2368x128xbf16, #tpu.memory_space<vmem>>, vector<128x128xbf16>
    %151 = arith.truncf %149 : vector<8x128xf32> to vector<8x128xbf16>
    %cst_39 = arith.constant dense<0.000000e+00> : vector<8x128xf32>
    %152 = tpu.matmul %151, %150, %cst_39 {dimension_numbers = #tpu.dot_dimension_numbers<[1], [0], [0], [1], [0, 0, 1, 1], [], []>} : vector<8x128xbf16>, vector<128x128xbf16>, vector<8x128xf32> -> vector<8x128xf32>
    %c8 = arith.constant 8 : index
    %c0_40 = arith.constant 0 : index
    %153 = vector.load %arg1[%c8, %c0_40] : memref<48x128xf32, #tpu.memory_space<vmem>>, vector<1x128xf32>
    %154 = vector.broadcast %153 : vector<1x128xf32> to vector<8x128xf32>
    %155 = arith.addf %152, %154 : vector<8x128xf32>
    %156 = arith.mulf %155, %155 : vector<8x128xf32>
    %157 = arith.mulf %155, %156 : vector<8x128xf32>
    %cst_41 = arith.constant 4.471500e-02 : f32
    %158 = vector.broadcast %cst_41 : f32 to vector<8x128xf32>
    %159 = arith.mulf %158, %157 : vector<8x128xf32>
    %160 = arith.addf %155, %159 : vector<8x128xf32>
    %cst_42 = arith.constant 0.797884583 : f32
    %161 = vector.broadcast %cst_42 : f32 to vector<8x128xf32>
    %162 = arith.mulf %161, %160 : vector<8x128xf32>
    %163 = math.tanh %162 : vector<8x128xf32>
    %cst_43 = arith.constant 1.000000e+00 : f32
    %164 = vector.broadcast %cst_43 : f32 to vector<8x128xf32>
    %165 = arith.addf %164, %163 : vector<8x128xf32>
    %cst_44 = arith.constant 5.000000e-01 : f32
    %166 = vector.broadcast %cst_44 : f32 to vector<8x128xf32>
    %167 = arith.mulf %166, %165 : vector<8x128xf32>
    %168 = arith.mulf %155, %167 : vector<8x128xf32>
    %c288 = arith.constant 288 : index
    %c0_45 = arith.constant 0 : index
    %169 = vector.load %arg2[%c288, %c0_45] : memref<2368x128xbf16, #tpu.memory_space<vmem>>, vector<128x128xbf16>
    %170 = arith.truncf %168 : vector<8x128xf32> to vector<8x128xbf16>
    %cst_46 = arith.constant dense<0.000000e+00> : vector<8x128xf32>
    %171 = tpu.matmul %170, %169, %cst_46 {dimension_numbers = #tpu.dot_dimension_numbers<[1], [0], [0], [1], [0, 0, 1, 1], [], []>} : vector<8x128xbf16>, vector<128x128xbf16>, vector<8x128xf32> -> vector<8x128xf32>
    %172 = arith.addf %149, %171 : vector<8x128xf32>
    %c9 = arith.constant 9 : index
    %c0_47 = arith.constant 0 : index
    %173 = vector.load %arg1[%c9, %c0_47] : memref<48x128xf32, #tpu.memory_space<vmem>>, vector<1x128xf32>
    %174 = vector.broadcast %173 : vector<1x128xf32> to vector<8x128xf32>
    %175 = arith.addf %172, %174 : vector<8x128xf32>
    %c10 = arith.constant 10 : index
    %c0_48 = arith.constant 0 : index
    %176 = vector.load %arg1[%c10, %c0_48] : memref<48x128xf32, #tpu.memory_space<vmem>>, vector<2x128xf32>
    %177 = vector.extract_strided_slice %176 {offsets = [0, 0], sizes = [1, 128], strides = [1, 1]} : vector<2x128xf32> to vector<1x128xf32>
    %178 = vector.extract_strided_slice %176 {offsets = [1, 0], sizes = [1, 128], strides = [1, 1]} : vector<2x128xf32> to vector<1x128xf32>
    %cst_49 = arith.constant dense<0.000000e+00> : vector<8xf32>
    %179 = vector.multi_reduction <add>, %175, %cst_49 [1] : vector<8x128xf32> to vector<8xf32>
    %180 = vector.shape_cast %179 : vector<8xf32> to vector<8x1xf32>
    %cst_50 = arith.constant 3.125000e-02 : f32
    %181 = vector.broadcast %cst_50 : f32 to vector<8x1xf32>
    %182 = arith.mulf %180, %181 : vector<8x1xf32>
    %183 = arith.mulf %175, %175 : vector<8x128xf32>
    %cst_51 = arith.constant dense<0.000000e+00> : vector<8xf32>
    %184 = vector.multi_reduction <add>, %183, %cst_51 [1] : vector<8x128xf32> to vector<8xf32>
    %185 = vector.shape_cast %184 : vector<8xf32> to vector<8x1xf32>
    %cst_52 = arith.constant 3.125000e-02 : f32
    %186 = vector.broadcast %cst_52 : f32 to vector<8x1xf32>
    %187 = arith.mulf %185, %186 : vector<8x1xf32>
    %188 = arith.mulf %182, %182 : vector<8x1xf32>
    %189 = arith.subf %187, %188 : vector<8x1xf32>
    %cst_53 = arith.constant 0.000000e+00 : f32
    %190 = vector.broadcast %cst_53 : f32 to vector<8x1xf32>
    %191 = arith.maximumf %189, %190 : vector<8x1xf32>
    %cst_54 = arith.constant 9.99999996E-13 : f32
    %192 = vector.broadcast %cst_54 : f32 to vector<8x1xf32>
    %193 = arith.addf %191, %192 : vector<8x1xf32>
    %194 = math.rsqrt %193 : vector<8x1xf32>
    %195 = vector.broadcast %182 : vector<8x1xf32> to vector<8x128xf32>
    %196 = arith.subf %175, %195 : vector<8x128xf32>
    %197 = vector.broadcast %194 : vector<8x1xf32> to vector<8x128xf32>
    %198 = arith.mulf %196, %197 : vector<8x128xf32>
    %199 = vector.broadcast %177 : vector<1x128xf32> to vector<8x128xf32>
    %200 = arith.mulf %198, %199 : vector<8x128xf32>
    %201 = vector.broadcast %178 : vector<1x128xf32> to vector<8x128xf32>
    %202 = arith.addf %200, %201 : vector<8x128xf32>
    %c416 = arith.constant 416 : index
    %c0_55 = arith.constant 0 : index
    %203 = vector.load %arg2[%c416, %c0_55] : memref<2368x128xbf16, #tpu.memory_space<vmem>>, vector<128x128xbf16>
    %204 = arith.truncf %202 : vector<8x128xf32> to vector<8x128xbf16>
    %cst_56 = arith.constant dense<0.000000e+00> : vector<8x128xf32>
    %205 = tpu.matmul %204, %203, %cst_56 {dimension_numbers = #tpu.dot_dimension_numbers<[1], [0], [0], [1], [0, 0, 1, 1], [], []>} : vector<8x128xbf16>, vector<128x128xbf16>, vector<8x128xf32> -> vector<8x128xf32>
    %c12 = arith.constant 12 : index
    %c0_57 = arith.constant 0 : index
    %206 = vector.load %arg1[%c12, %c0_57] : memref<48x128xf32, #tpu.memory_space<vmem>>, vector<1x128xf32>
    %207 = vector.broadcast %206 : vector<1x128xf32> to vector<8x128xf32>
    %208 = arith.addf %205, %207 : vector<8x128xf32>
    %209 = vector.extract_strided_slice %208 {offsets = [0, 0], sizes = [8, 32], strides = [1, 1]} : vector<8x128xf32> to vector<8x32xf32>
    %210 = vector.extract_strided_slice %208 {offsets = [0, 32], sizes = [8, 32], strides = [1, 1]} : vector<8x128xf32> to vector<8x32xf32>
    %211 = vector.extract_strided_slice %208 {offsets = [0, 64], sizes = [8, 32], strides = [1, 1]} : vector<8x128xf32> to vector<8x32xf32>
    %c544 = arith.constant 544 : index
    %c0_58 = arith.constant 0 : index
    %212 = vector.load %arg2[%c544, %c0_58] : memref<2368x128xbf16, #tpu.memory_space<vmem>>, vector<32x128xbf16>
    %c13 = arith.constant 13 : index
    %c0_59 = arith.constant 0 : index
    %213 = vector.load %arg1[%c13, %c0_59] : memref<48x128xf32, #tpu.memory_space<vmem>>, vector<1x128xf32>
    %214 = vector.extract_strided_slice %209 {offsets = [0, 0], sizes = [8, 8], strides = [1, 1]} : vector<8x32xf32> to vector<8x8xf32>
    %215 = vector.extract_strided_slice %209 {offsets = [0, 8], sizes = [8, 8], strides = [1, 1]} : vector<8x32xf32> to vector<8x8xf32>
    %216 = vector.extract_strided_slice %209 {offsets = [0, 16], sizes = [8, 8], strides = [1, 1]} : vector<8x32xf32> to vector<8x8xf32>
    %217 = vector.extract_strided_slice %209 {offsets = [0, 24], sizes = [8, 8], strides = [1, 1]} : vector<8x32xf32> to vector<8x8xf32>
    %218 = vector.shape_cast %214 : vector<8x8xf32> to vector<1x8x8xf32>
    %219 = vector.shape_cast %215 : vector<8x8xf32> to vector<1x8x8xf32>
    %220 = vector.shape_cast %216 : vector<8x8xf32> to vector<1x8x8xf32>
    %221 = vector.shape_cast %217 : vector<8x8xf32> to vector<1x8x8xf32>
    %222 = tpu.concatenate %218, %219, %220, %221 in 0 : vector<1x8x8xf32>, vector<1x8x8xf32>, vector<1x8x8xf32>, vector<1x8x8xf32> -> vector<4x8x8xf32>
    %223 = vector.extract_strided_slice %210 {offsets = [0, 0], sizes = [8, 8], strides = [1, 1]} : vector<8x32xf32> to vector<8x8xf32>
    %224 = vector.extract_strided_slice %210 {offsets = [0, 8], sizes = [8, 8], strides = [1, 1]} : vector<8x32xf32> to vector<8x8xf32>
    %225 = vector.extract_strided_slice %210 {offsets = [0, 16], sizes = [8, 8], strides = [1, 1]} : vector<8x32xf32> to vector<8x8xf32>
    %226 = vector.extract_strided_slice %210 {offsets = [0, 24], sizes = [8, 8], strides = [1, 1]} : vector<8x32xf32> to vector<8x8xf32>
    %227 = vector.shape_cast %223 : vector<8x8xf32> to vector<1x8x8xf32>
    %228 = vector.shape_cast %224 : vector<8x8xf32> to vector<1x8x8xf32>
    %229 = vector.shape_cast %225 : vector<8x8xf32> to vector<1x8x8xf32>
    %230 = vector.shape_cast %226 : vector<8x8xf32> to vector<1x8x8xf32>
    %231 = tpu.concatenate %227, %228, %229, %230 in 0 : vector<1x8x8xf32>, vector<1x8x8xf32>, vector<1x8x8xf32>, vector<1x8x8xf32> -> vector<4x8x8xf32>
    %232 = vector.extract_strided_slice %211 {offsets = [0, 0], sizes = [8, 8], strides = [1, 1]} : vector<8x32xf32> to vector<8x8xf32>
    %233 = vector.extract_strided_slice %211 {offsets = [0, 8], sizes = [8, 8], strides = [1, 1]} : vector<8x32xf32> to vector<8x8xf32>
    %234 = vector.extract_strided_slice %211 {offsets = [0, 16], sizes = [8, 8], strides = [1, 1]} : vector<8x32xf32> to vector<8x8xf32>
    %235 = vector.extract_strided_slice %211 {offsets = [0, 24], sizes = [8, 8], strides = [1, 1]} : vector<8x32xf32> to vector<8x8xf32>
    %236 = vector.shape_cast %232 : vector<8x8xf32> to vector<1x8x8xf32>
    %237 = vector.shape_cast %233 : vector<8x8xf32> to vector<1x8x8xf32>
    %238 = vector.shape_cast %234 : vector<8x8xf32> to vector<1x8x8xf32>
    %239 = vector.shape_cast %235 : vector<8x8xf32> to vector<1x8x8xf32>
    %240 = tpu.concatenate %236, %237, %238, %239 in 0 : vector<1x8x8xf32>, vector<1x8x8xf32>, vector<1x8x8xf32>, vector<1x8x8xf32> -> vector<4x8x8xf32>
    %241 = arith.truncf %222 : vector<4x8x8xf32> to vector<4x8x8xbf16>
    %242 = arith.truncf %231 : vector<4x8x8xf32> to vector<4x8x8xbf16>
    "tpu.trace_start"() <{level = 10 : i32, message = "hqd,hkd->hqk"}> : () -> ()
    %cst_60 = arith.constant dense<0.000000e+00> : vector<4x8x8xf32>
    %243 = tpu.matmul %241, %242, %cst_60 {dimension_numbers = #tpu.dot_dimension_numbers<[2], [2], [1], [1], [0, 0, 0, 1, 1, 1], [0], [0]>} : vector<4x8x8xbf16>, vector<4x8x8xbf16>, vector<4x8x8xf32> -> vector<4x8x8xf32>
    "tpu.trace_stop"() : () -> ()
    %cst_61 = arith.constant 0.353553385 : f32
    %244 = vector.broadcast %cst_61 : f32 to vector<4x8x8xf32>
    %245 = arith.mulf %243, %244 : vector<4x8x8xf32>
    %246 = vector.shape_cast %6 : vector<1x8xf32> to vector<1x1x8xf32>
    %247 = vector.broadcast %246 : vector<1x1x8xf32> to vector<4x8x8xf32>
    %248 = arith.addf %245, %247 : vector<4x8x8xf32>
    %cst_62 = arith.constant dense<0xFF800000> : vector<4x8xf32>
    %249 = vector.multi_reduction <maximumf>, %248, %cst_62 [2] : vector<4x8x8xf32> to vector<4x8xf32>
    %250 = vector.shape_cast %249 : vector<4x8xf32> to vector<4x8x1xf32>
    %251 = vector.broadcast %250 : vector<4x8x1xf32> to vector<4x8x8xf32>
    %252 = arith.subf %248, %251 : vector<4x8x8xf32>
    %253 = math.exp %252 : vector<4x8x8xf32>
    %cst_63 = arith.constant dense<0.000000e+00> : vector<4x8xf32>
    %254 = vector.multi_reduction <add>, %253, %cst_63 [2] : vector<4x8x8xf32> to vector<4x8xf32>
    %255 = vector.shape_cast %254 : vector<4x8xf32> to vector<4x8x1xf32>
    %256 = vector.broadcast %255 : vector<4x8x1xf32> to vector<4x8x8xf32>
    %257 = arith.divf %253, %256 : vector<4x8x8xf32>
    %258 = arith.truncf %257 : vector<4x8x8xf32> to vector<4x8x8xbf16>
    %259 = arith.truncf %240 : vector<4x8x8xf32> to vector<4x8x8xbf16>
    "tpu.trace_start"() <{level = 10 : i32, message = "hqk,hkd->hqd"}> : () -> ()
    %cst_64 = arith.constant dense<0.000000e+00> : vector<4x8x8xf32>
    %260 = tpu.matmul %258, %259, %cst_64 {dimension_numbers = #tpu.dot_dimension_numbers<[2], [1], [1], [2], [0, 0, 0, 1, 1, 2], [0], [0]>} : vector<4x8x8xbf16>, vector<4x8x8xbf16>, vector<4x8x8xf32> -> vector<4x8x8xf32>
    "tpu.trace_stop"() : () -> ()
    %261 = vector.extract_strided_slice %260 {offsets = [0, 0, 0], sizes = [1, 8, 8], strides = [1, 1, 1]} : vector<4x8x8xf32> to vector<1x8x8xf32>
    %262 = vector.shape_cast %261 : vector<1x8x8xf32> to vector<8x8xf32>
    %263 = vector.extract_strided_slice %260 {offsets = [1, 0, 0], sizes = [1, 8, 8], strides = [1, 1, 1]} : vector<4x8x8xf32> to vector<1x8x8xf32>
    %264 = vector.shape_cast %263 : vector<1x8x8xf32> to vector<8x8xf32>
    %265 = vector.extract_strided_slice %260 {offsets = [2, 0, 0], sizes = [1, 8, 8], strides = [1, 1, 1]} : vector<4x8x8xf32> to vector<1x8x8xf32>
    %266 = vector.shape_cast %265 : vector<1x8x8xf32> to vector<8x8xf32>
    %267 = vector.extract_strided_slice %260 {offsets = [3, 0, 0], sizes = [1, 8, 8], strides = [1, 1, 1]} : vector<4x8x8xf32> to vector<1x8x8xf32>
    %268 = vector.shape_cast %267 : vector<1x8x8xf32> to vector<8x8xf32>
    %269 = tpu.concatenate %262, %264, %266, %268 in 1 : vector<8x8xf32>, vector<8x8xf32>, vector<8x8xf32>, vector<8x8xf32> -> vector<8x32xf32>
    %270 = arith.truncf %269 : vector<8x32xf32> to vector<8x32xbf16>
    %cst_65 = arith.constant dense<0.000000e+00> : vector<8x128xf32>
    %271 = tpu.matmul %270, %212, %cst_65 {dimension_numbers = #tpu.dot_dimension_numbers<[1], [0], [0], [1], [0, 0, 1, 1], [], []>} : vector<8x32xbf16>, vector<32x128xbf16>, vector<8x128xf32> -> vector<8x128xf32>
    %272 = vector.broadcast %213 : vector<1x128xf32> to vector<8x128xf32>
    %273 = arith.addf %271, %272 : vector<8x128xf32>
    %274 = arith.addf %202, %273 : vector<8x128xf32>
    %c14 = arith.constant 14 : index
    %c0_66 = arith.constant 0 : index
    %275 = vector.load %arg1[%c14, %c0_66] : memref<48x128xf32, #tpu.memory_space<vmem>>, vector<2x128xf32>
    %276 = vector.extract_strided_slice %275 {offsets = [0, 0], sizes = [1, 128], strides = [1, 1]} : vector<2x128xf32> to vector<1x128xf32>
    %277 = vector.extract_strided_slice %275 {offsets = [1, 0], sizes = [1, 128], strides = [1, 1]} : vector<2x128xf32> to vector<1x128xf32>
    %cst_67 = arith.constant dense<0.000000e+00> : vector<8xf32>
    %278 = vector.multi_reduction <add>, %274, %cst_67 [1] : vector<8x128xf32> to vector<8xf32>
    %279 = vector.shape_cast %278 : vector<8xf32> to vector<8x1xf32>
    %cst_68 = arith.constant 3.125000e-02 : f32
    %280 = vector.broadcast %cst_68 : f32 to vector<8x1xf32>
    %281 = arith.mulf %279, %280 : vector<8x1xf32>
    %282 = arith.mulf %274, %274 : vector<8x128xf32>
    %cst_69 = arith.constant dense<0.000000e+00> : vector<8xf32>
    %283 = vector.multi_reduction <add>, %282, %cst_69 [1] : vector<8x128xf32> to vector<8xf32>
    %284 = vector.shape_cast %283 : vector<8xf32> to vector<8x1xf32>
    %cst_70 = arith.constant 3.125000e-02 : f32
    %285 = vector.broadcast %cst_70 : f32 to vector<8x1xf32>
    %286 = arith.mulf %284, %285 : vector<8x1xf32>
    %287 = arith.mulf %281, %281 : vector<8x1xf32>
    %288 = arith.subf %286, %287 : vector<8x1xf32>
    %cst_71 = arith.constant 0.000000e+00 : f32
    %289 = vector.broadcast %cst_71 : f32 to vector<8x1xf32>
    %290 = arith.maximumf %288, %289 : vector<8x1xf32>
    %cst_72 = arith.constant 9.99999996E-13 : f32
    %291 = vector.broadcast %cst_72 : f32 to vector<8x1xf32>
    %292 = arith.addf %290, %291 : vector<8x1xf32>
    %293 = math.rsqrt %292 : vector<8x1xf32>
    %294 = vector.broadcast %281 : vector<8x1xf32> to vector<8x128xf32>
    %295 = arith.subf %274, %294 : vector<8x128xf32>
    %296 = vector.broadcast %293 : vector<8x1xf32> to vector<8x128xf32>
    %297 = arith.mulf %295, %296 : vector<8x128xf32>
    %298 = vector.broadcast %276 : vector<1x128xf32> to vector<8x128xf32>
    %299 = arith.mulf %297, %298 : vector<8x128xf32>
    %300 = vector.broadcast %277 : vector<1x128xf32> to vector<8x128xf32>
    %301 = arith.addf %299, %300 : vector<8x128xf32>
    %c576 = arith.constant 576 : index
    %c0_73 = arith.constant 0 : index
    %302 = vector.load %arg2[%c576, %c0_73] : memref<2368x128xbf16, #tpu.memory_space<vmem>>, vector<128x128xbf16>
    %303 = arith.truncf %301 : vector<8x128xf32> to vector<8x128xbf16>
    %cst_74 = arith.constant dense<0.000000e+00> : vector<8x128xf32>
    %304 = tpu.matmul %303, %302, %cst_74 {dimension_numbers = #tpu.dot_dimension_numbers<[1], [0], [0], [1], [0, 0, 1, 1], [], []>} : vector<8x128xbf16>, vector<128x128xbf16>, vector<8x128xf32> -> vector<8x128xf32>
    %c16_75 = arith.constant 16 : index
    %c0_76 = arith.constant 0 : index
    %305 = vector.load %arg1[%c16_75, %c0_76] : memref<48x128xf32, #tpu.memory_space<vmem>>, vector<1x128xf32>
    %306 = vector.broadcast %305 : vector<1x128xf32> to vector<8x128xf32>
    %307 = arith.addf %304, %306 : vector<8x128xf32>
    %308 = arith.mulf %307, %307 : vector<8x128xf32>
    %309 = arith.mulf %307, %308 : vector<8x128xf32>
    %cst_77 = arith.constant 4.471500e-02 : f32
    %310 = vector.broadcast %cst_77 : f32 to vector<8x128xf32>
    %311 = arith.mulf %310, %309 : vector<8x128xf32>
    %312 = arith.addf %307, %311 : vector<8x128xf32>
    %cst_78 = arith.constant 0.797884583 : f32
    %313 = vector.broadcast %cst_78 : f32 to vector<8x128xf32>
    %314 = arith.mulf %313, %312 : vector<8x128xf32>
    %315 = math.tanh %314 : vector<8x128xf32>
    %cst_79 = arith.constant 1.000000e+00 : f32
    %316 = vector.broadcast %cst_79 : f32 to vector<8x128xf32>
    %317 = arith.addf %316, %315 : vector<8x128xf32>
    %cst_80 = arith.constant 5.000000e-01 : f32
    %318 = vector.broadcast %cst_80 : f32 to vector<8x128xf32>
    %319 = arith.mulf %318, %317 : vector<8x128xf32>
    %320 = arith.mulf %307, %319 : vector<8x128xf32>
    %c704 = arith.constant 704 : index
    %c0_81 = arith.constant 0 : index
    %321 = vector.load %arg2[%c704, %c0_81] : memref<2368x128xbf16, #tpu.memory_space<vmem>>, vector<128x128xbf16>
    %322 = arith.truncf %320 : vector<8x128xf32> to vector<8x128xbf16>
    %cst_82 = arith.constant dense<0.000000e+00> : vector<8x128xf32>
    %323 = tpu.matmul %322, %321, %cst_82 {dimension_numbers = #tpu.dot_dimension_numbers<[1], [0], [0], [1], [0, 0, 1, 1], [], []>} : vector<8x128xbf16>, vector<128x128xbf16>, vector<8x128xf32> -> vector<8x128xf32>
    %324 = arith.addf %301, %323 : vector<8x128xf32>
    %c17_83 = arith.constant 17 : index
    %c0_84 = arith.constant 0 : index
    %325 = vector.load %arg1[%c17_83, %c0_84] : memref<48x128xf32, #tpu.memory_space<vmem>>, vector<1x128xf32>
    %326 = vector.broadcast %325 : vector<1x128xf32> to vector<8x128xf32>
    %327 = arith.addf %324, %326 : vector<8x128xf32>
    %c18 = arith.constant 18 : index
    %c0_85 = arith.constant 0 : index
    %328 = vector.load %arg1[%c18, %c0_85] : memref<48x128xf32, #tpu.memory_space<vmem>>, vector<2x128xf32>
    %329 = vector.extract_strided_slice %328 {offsets = [0, 0], sizes = [1, 128], strides = [1, 1]} : vector<2x128xf32> to vector<1x128xf32>
    %330 = vector.extract_strided_slice %328 {offsets = [1, 0], sizes = [1, 128], strides = [1, 1]} : vector<2x128xf32> to vector<1x128xf32>
    %cst_86 = arith.constant dense<0.000000e+00> : vector<8xf32>
    %331 = vector.multi_reduction <add>, %327, %cst_86 [1] : vector<8x128xf32> to vector<8xf32>
    %332 = vector.shape_cast %331 : vector<8xf32> to vector<8x1xf32>
    %cst_87 = arith.constant 3.125000e-02 : f32
    %333 = vector.broadcast %cst_87 : f32 to vector<8x1xf32>
    %334 = arith.mulf %332, %333 : vector<8x1xf32>
    %335 = arith.mulf %327, %327 : vector<8x128xf32>
    %cst_88 = arith.constant dense<0.000000e+00> : vector<8xf32>
    %336 = vector.multi_reduction <add>, %335, %cst_88 [1] : vector<8x128xf32> to vector<8xf32>
    %337 = vector.shape_cast %336 : vector<8xf32> to vector<8x1xf32>
    %cst_89 = arith.constant 3.125000e-02 : f32
    %338 = vector.broadcast %cst_89 : f32 to vector<8x1xf32>
    %339 = arith.mulf %337, %338 : vector<8x1xf32>
    %340 = arith.mulf %334, %334 : vector<8x1xf32>
    %341 = arith.subf %339, %340 : vector<8x1xf32>
    %cst_90 = arith.constant 0.000000e+00 : f32
    %342 = vector.broadcast %cst_90 : f32 to vector<8x1xf32>
    %343 = arith.maximumf %341, %342 : vector<8x1xf32>
    %cst_91 = arith.constant 9.99999996E-13 : f32
    %344 = vector.broadcast %cst_91 : f32 to vector<8x1xf32>
    %345 = arith.addf %343, %344 : vector<8x1xf32>
    %346 = math.rsqrt %345 : vector<8x1xf32>
    %347 = vector.broadcast %334 : vector<8x1xf32> to vector<8x128xf32>
    %348 = arith.subf %327, %347 : vector<8x128xf32>
    %349 = vector.broadcast %346 : vector<8x1xf32> to vector<8x128xf32>
    %350 = arith.mulf %348, %349 : vector<8x128xf32>
    %351 = vector.broadcast %329 : vector<1x128xf32> to vector<8x128xf32>
    %352 = arith.mulf %350, %351 : vector<8x128xf32>
    %353 = vector.broadcast %330 : vector<1x128xf32> to vector<8x128xf32>
    %354 = arith.addf %352, %353 : vector<8x128xf32>
    %c0_92 = arith.constant 0 : index
    %c8_93 = arith.constant 8 : index
    %c0_94 = arith.constant 0 : index
    %355 = vector.load %arg3[%c0_92, %c8_93, %c0_94] : memref<1x32x128xf32, #tpu.memory_space<vmem>>, vector<1x8x128xf32>
    %356 = vector.shape_cast %355 : vector<1x8x128xf32> to vector<8x128xf32>
    %c2 = arith.constant 2 : index
    %c0_95 = arith.constant 0 : index
    %357 = vector.load %arg1[%c2, %c0_95] : memref<48x128xf32, #tpu.memory_space<vmem>>, vector<2x128xf32>
    %358 = vector.extract_strided_slice %357 {offsets = [0, 0], sizes = [1, 128], strides = [1, 1]} : vector<2x128xf32> to vector<1x128xf32>
    %359 = vector.extract_strided_slice %357 {offsets = [1, 0], sizes = [1, 128], strides = [1, 1]} : vector<2x128xf32> to vector<1x128xf32>
    %cst_96 = arith.constant dense<0.000000e+00> : vector<8xf32>
    %360 = vector.multi_reduction <add>, %356, %cst_96 [1] : vector<8x128xf32> to vector<8xf32>
    %361 = vector.shape_cast %360 : vector<8xf32> to vector<8x1xf32>
    %cst_97 = arith.constant 3.125000e-02 : f32
    %362 = vector.broadcast %cst_97 : f32 to vector<8x1xf32>
    %363 = arith.mulf %361, %362 : vector<8x1xf32>
    %364 = arith.mulf %356, %356 : vector<8x128xf32>
    %cst_98 = arith.constant dense<0.000000e+00> : vector<8xf32>
    %365 = vector.multi_reduction <add>, %364, %cst_98 [1] : vector<8x128xf32> to vector<8xf32>
    %366 = vector.shape_cast %365 : vector<8xf32> to vector<8x1xf32>
    %cst_99 = arith.constant 3.125000e-02 : f32
    %367 = vector.broadcast %cst_99 : f32 to vector<8x1xf32>
    %368 = arith.mulf %366, %367 : vector<8x1xf32>
    %369 = arith.mulf %363, %363 : vector<8x1xf32>
    %370 = arith.subf %368, %369 : vector<8x1xf32>
    %cst_100 = arith.constant 0.000000e+00 : f32
    %371 = vector.broadcast %cst_100 : f32 to vector<8x1xf32>
    %372 = arith.maximumf %370, %371 : vector<8x1xf32>
    %cst_101 = arith.constant 9.99999996E-13 : f32
    %373 = vector.broadcast %cst_101 : f32 to vector<8x1xf32>
    %374 = arith.addf %372, %373 : vector<8x1xf32>
    %375 = math.rsqrt %374 : vector<8x1xf32>
    %376 = vector.broadcast %363 : vector<8x1xf32> to vector<8x128xf32>
    %377 = arith.subf %356, %376 : vector<8x128xf32>
    %378 = vector.broadcast %375 : vector<8x1xf32> to vector<8x128xf32>
    %379 = arith.mulf %377, %378 : vector<8x128xf32>
    %380 = vector.broadcast %358 : vector<1x128xf32> to vector<8x128xf32>
    %381 = arith.mulf %379, %380 : vector<8x128xf32>
    %382 = vector.broadcast %359 : vector<1x128xf32> to vector<8x128xf32>
    %383 = arith.addf %381, %382 : vector<8x128xf32>
    %c832 = arith.constant 832 : index
    %c0_102 = arith.constant 0 : index
    %384 = vector.load %arg2[%c832, %c0_102] : memref<2368x128xbf16, #tpu.memory_space<vmem>>, vector<128x128xbf16>
    %385 = arith.truncf %383 : vector<8x128xf32> to vector<8x128xbf16>
    %cst_103 = arith.constant dense<0.000000e+00> : vector<8x128xf32>
    %386 = tpu.matmul %385, %384, %cst_103 {dimension_numbers = #tpu.dot_dimension_numbers<[1], [0], [0], [1], [0, 0, 1, 1], [], []>} : vector<8x128xbf16>, vector<128x128xbf16>, vector<8x128xf32> -> vector<8x128xf32>
    %c20 = arith.constant 20 : index
    %c0_104 = arith.constant 0 : index
    %387 = vector.load %arg1[%c20, %c0_104] : memref<48x128xf32, #tpu.memory_space<vmem>>, vector<1x128xf32>
    %388 = vector.broadcast %387 : vector<1x128xf32> to vector<8x128xf32>
    %389 = arith.addf %386, %388 : vector<8x128xf32>
    %390 = vector.extract_strided_slice %389 {offsets = [0, 0], sizes = [8, 32], strides = [1, 1]} : vector<8x128xf32> to vector<8x32xf32>
    %391 = vector.extract_strided_slice %389 {offsets = [0, 32], sizes = [8, 32], strides = [1, 1]} : vector<8x128xf32> to vector<8x32xf32>
    %392 = vector.extract_strided_slice %389 {offsets = [0, 64], sizes = [8, 32], strides = [1, 1]} : vector<8x128xf32> to vector<8x32xf32>
    %c960 = arith.constant 960 : index
    %c0_105 = arith.constant 0 : index
    %393 = vector.load %arg2[%c960, %c0_105] : memref<2368x128xbf16, #tpu.memory_space<vmem>>, vector<32x128xbf16>
    %c21 = arith.constant 21 : index
    %c0_106 = arith.constant 0 : index
    %394 = vector.load %arg1[%c21, %c0_106] : memref<48x128xf32, #tpu.memory_space<vmem>>, vector<1x128xf32>
    %395 = vector.extract_strided_slice %390 {offsets = [0, 0], sizes = [8, 8], strides = [1, 1]} : vector<8x32xf32> to vector<8x8xf32>
    %396 = vector.extract_strided_slice %390 {offsets = [0, 8], sizes = [8, 8], strides = [1, 1]} : vector<8x32xf32> to vector<8x8xf32>
    %397 = vector.extract_strided_slice %390 {offsets = [0, 16], sizes = [8, 8], strides = [1, 1]} : vector<8x32xf32> to vector<8x8xf32>
    %398 = vector.extract_strided_slice %390 {offsets = [0, 24], sizes = [8, 8], strides = [1, 1]} : vector<8x32xf32> to vector<8x8xf32>
    %399 = vector.shape_cast %395 : vector<8x8xf32> to vector<1x8x8xf32>
    %400 = vector.shape_cast %396 : vector<8x8xf32> to vector<1x8x8xf32>
    %401 = vector.shape_cast %397 : vector<8x8xf32> to vector<1x8x8xf32>
    %402 = vector.shape_cast %398 : vector<8x8xf32> to vector<1x8x8xf32>
    %403 = tpu.concatenate %399, %400, %401, %402 in 0 : vector<1x8x8xf32>, vector<1x8x8xf32>, vector<1x8x8xf32>, vector<1x8x8xf32> -> vector<4x8x8xf32>
    %404 = vector.extract_strided_slice %391 {offsets = [0, 0], sizes = [8, 8], strides = [1, 1]} : vector<8x32xf32> to vector<8x8xf32>
    %405 = vector.extract_strided_slice %391 {offsets = [0, 8], sizes = [8, 8], strides = [1, 1]} : vector<8x32xf32> to vector<8x8xf32>
    %406 = vector.extract_strided_slice %391 {offsets = [0, 16], sizes = [8, 8], strides = [1, 1]} : vector<8x32xf32> to vector<8x8xf32>
    %407 = vector.extract_strided_slice %391 {offsets = [0, 24], sizes = [8, 8], strides = [1, 1]} : vector<8x32xf32> to vector<8x8xf32>
    %408 = vector.shape_cast %404 : vector<8x8xf32> to vector<1x8x8xf32>
    %409 = vector.shape_cast %405 : vector<8x8xf32> to vector<1x8x8xf32>
    %410 = vector.shape_cast %406 : vector<8x8xf32> to vector<1x8x8xf32>
    %411 = vector.shape_cast %407 : vector<8x8xf32> to vector<1x8x8xf32>
    %412 = tpu.concatenate %408, %409, %410, %411 in 0 : vector<1x8x8xf32>, vector<1x8x8xf32>, vector<1x8x8xf32>, vector<1x8x8xf32> -> vector<4x8x8xf32>
    %413 = vector.extract_strided_slice %392 {offsets = [0, 0], sizes = [8, 8], strides = [1, 1]} : vector<8x32xf32> to vector<8x8xf32>
    %414 = vector.extract_strided_slice %392 {offsets = [0, 8], sizes = [8, 8], strides = [1, 1]} : vector<8x32xf32> to vector<8x8xf32>
    %415 = vector.extract_strided_slice %392 {offsets = [0, 16], sizes = [8, 8], strides = [1, 1]} : vector<8x32xf32> to vector<8x8xf32>
    %416 = vector.extract_strided_slice %392 {offsets = [0, 24], sizes = [8, 8], strides = [1, 1]} : vector<8x32xf32> to vector<8x8xf32>
    %417 = vector.shape_cast %413 : vector<8x8xf32> to vector<1x8x8xf32>
    %418 = vector.shape_cast %414 : vector<8x8xf32> to vector<1x8x8xf32>
    %419 = vector.shape_cast %415 : vector<8x8xf32> to vector<1x8x8xf32>
    %420 = vector.shape_cast %416 : vector<8x8xf32> to vector<1x8x8xf32>
    %421 = tpu.concatenate %417, %418, %419, %420 in 0 : vector<1x8x8xf32>, vector<1x8x8xf32>, vector<1x8x8xf32>, vector<1x8x8xf32> -> vector<4x8x8xf32>
    %422 = arith.truncf %403 : vector<4x8x8xf32> to vector<4x8x8xbf16>
    %423 = arith.truncf %412 : vector<4x8x8xf32> to vector<4x8x8xbf16>
    "tpu.trace_start"() <{level = 10 : i32, message = "hqd,hkd->hqk"}> : () -> ()
    %cst_107 = arith.constant dense<0.000000e+00> : vector<4x8x8xf32>
    %424 = tpu.matmul %422, %423, %cst_107 {dimension_numbers = #tpu.dot_dimension_numbers<[2], [2], [1], [1], [0, 0, 0, 1, 1, 1], [0], [0]>} : vector<4x8x8xbf16>, vector<4x8x8xbf16>, vector<4x8x8xf32> -> vector<4x8x8xf32>
    "tpu.trace_stop"() : () -> ()
    %cst_108 = arith.constant 0.353553385 : f32
    %425 = vector.broadcast %cst_108 : f32 to vector<4x8x8xf32>
    %426 = arith.mulf %424, %425 : vector<4x8x8xf32>
    %427 = vector.shape_cast %21 : vector<8x8xf32> to vector<1x8x8xf32>
    %428 = vector.broadcast %427 : vector<1x8x8xf32> to vector<4x8x8xf32>
    %429 = arith.addf %426, %428 : vector<4x8x8xf32>
    %cst_109 = arith.constant dense<0xFF800000> : vector<4x8xf32>
    %430 = vector.multi_reduction <maximumf>, %429, %cst_109 [2] : vector<4x8x8xf32> to vector<4x8xf32>
    %431 = vector.shape_cast %430 : vector<4x8xf32> to vector<4x8x1xf32>
    %432 = vector.broadcast %431 : vector<4x8x1xf32> to vector<4x8x8xf32>
    %433 = arith.subf %429, %432 : vector<4x8x8xf32>
    %434 = math.exp %433 : vector<4x8x8xf32>
    %cst_110 = arith.constant dense<0.000000e+00> : vector<4x8xf32>
    %435 = vector.multi_reduction <add>, %434, %cst_110 [2] : vector<4x8x8xf32> to vector<4x8xf32>
    %436 = vector.shape_cast %435 : vector<4x8xf32> to vector<4x8x1xf32>
    %437 = vector.broadcast %436 : vector<4x8x1xf32> to vector<4x8x8xf32>
    %438 = arith.divf %434, %437 : vector<4x8x8xf32>
    %439 = arith.truncf %438 : vector<4x8x8xf32> to vector<4x8x8xbf16>
    %440 = arith.truncf %421 : vector<4x8x8xf32> to vector<4x8x8xbf16>
    "tpu.trace_start"() <{level = 10 : i32, message = "hqk,hkd->hqd"}> : () -> ()
    %cst_111 = arith.constant dense<0.000000e+00> : vector<4x8x8xf32>
    %441 = tpu.matmul %439, %440, %cst_111 {dimension_numbers = #tpu.dot_dimension_numbers<[2], [1], [1], [2], [0, 0, 0, 1, 1, 2], [0], [0]>} : vector<4x8x8xbf16>, vector<4x8x8xbf16>, vector<4x8x8xf32> -> vector<4x8x8xf32>
    "tpu.trace_stop"() : () -> ()
    %442 = vector.extract_strided_slice %441 {offsets = [0, 0, 0], sizes = [1, 8, 8], strides = [1, 1, 1]} : vector<4x8x8xf32> to vector<1x8x8xf32>
    %443 = vector.shape_cast %442 : vector<1x8x8xf32> to vector<8x8xf32>
    %444 = vector.extract_strided_slice %441 {offsets = [1, 0, 0], sizes = [1, 8, 8], strides = [1, 1, 1]} : vector<4x8x8xf32> to vector<1x8x8xf32>
    %445 = vector.shape_cast %444 : vector<1x8x8xf32> to vector<8x8xf32>
    %446 = vector.extract_strided_slice %441 {offsets = [2, 0, 0], sizes = [1, 8, 8], strides = [1, 1, 1]} : vector<4x8x8xf32> to vector<1x8x8xf32>
    %447 = vector.shape_cast %446 : vector<1x8x8xf32> to vector<8x8xf32>
    %448 = vector.extract_strided_slice %441 {offsets = [3, 0, 0], sizes = [1, 8, 8], strides = [1, 1, 1]} : vector<4x8x8xf32> to vector<1x8x8xf32>
    %449 = vector.shape_cast %448 : vector<1x8x8xf32> to vector<8x8xf32>
    %450 = tpu.concatenate %443, %445, %447, %449 in 1 : vector<8x8xf32>, vector<8x8xf32>, vector<8x8xf32>, vector<8x8xf32> -> vector<8x32xf32>
    %451 = arith.truncf %450 : vector<8x32xf32> to vector<8x32xbf16>
    %cst_112 = arith.constant dense<0.000000e+00> : vector<8x128xf32>
    %452 = tpu.matmul %451, %393, %cst_112 {dimension_numbers = #tpu.dot_dimension_numbers<[1], [0], [0], [1], [0, 0, 1, 1], [], []>} : vector<8x32xbf16>, vector<32x128xbf16>, vector<8x128xf32> -> vector<8x128xf32>
    %453 = vector.broadcast %394 : vector<1x128xf32> to vector<8x128xf32>
    %454 = arith.addf %452, %453 : vector<8x128xf32>
    %455 = arith.addf %383, %454 : vector<8x128xf32>
    %c22 = arith.constant 22 : index
    %c0_113 = arith.constant 0 : index
    %456 = vector.load %arg1[%c22, %c0_113] : memref<48x128xf32, #tpu.memory_space<vmem>>, vector<2x128xf32>
    %457 = vector.extract_strided_slice %456 {offsets = [0, 0], sizes = [1, 128], strides = [1, 1]} : vector<2x128xf32> to vector<1x128xf32>
    %458 = vector.extract_strided_slice %456 {offsets = [1, 0], sizes = [1, 128], strides = [1, 1]} : vector<2x128xf32> to vector<1x128xf32>
    %cst_114 = arith.constant dense<0.000000e+00> : vector<8xf32>
    %459 = vector.multi_reduction <add>, %455, %cst_114 [1] : vector<8x128xf32> to vector<8xf32>
    %460 = vector.shape_cast %459 : vector<8xf32> to vector<8x1xf32>
    %cst_115 = arith.constant 3.125000e-02 : f32
    %461 = vector.broadcast %cst_115 : f32 to vector<8x1xf32>
    %462 = arith.mulf %460, %461 : vector<8x1xf32>
    %463 = arith.mulf %455, %455 : vector<8x128xf32>
    %cst_116 = arith.constant dense<0.000000e+00> : vector<8xf32>
    %464 = vector.multi_reduction <add>, %463, %cst_116 [1] : vector<8x128xf32> to vector<8xf32>
    %465 = vector.shape_cast %464 : vector<8xf32> to vector<8x1xf32>
    %cst_117 = arith.constant 3.125000e-02 : f32
    %466 = vector.broadcast %cst_117 : f32 to vector<8x1xf32>
    %467 = arith.mulf %465, %466 : vector<8x1xf32>
    %468 = arith.mulf %462, %462 : vector<8x1xf32>
    %469 = arith.subf %467, %468 : vector<8x1xf32>
    %cst_118 = arith.constant 0.000000e+00 : f32
    %470 = vector.broadcast %cst_118 : f32 to vector<8x1xf32>
    %471 = arith.maximumf %469, %470 : vector<8x1xf32>
    %cst_119 = arith.constant 9.99999996E-13 : f32
    %472 = vector.broadcast %cst_119 : f32 to vector<8x1xf32>
    %473 = arith.addf %471, %472 : vector<8x1xf32>
    %474 = math.rsqrt %473 : vector<8x1xf32>
    %475 = vector.broadcast %462 : vector<8x1xf32> to vector<8x128xf32>
    %476 = arith.subf %455, %475 : vector<8x128xf32>
    %477 = vector.broadcast %474 : vector<8x1xf32> to vector<8x128xf32>
    %478 = arith.mulf %476, %477 : vector<8x128xf32>
    %479 = vector.broadcast %457 : vector<1x128xf32> to vector<8x128xf32>
    %480 = arith.mulf %478, %479 : vector<8x128xf32>
    %481 = vector.broadcast %458 : vector<1x128xf32> to vector<8x128xf32>
    %482 = arith.addf %480, %481 : vector<8x128xf32>
    %c992 = arith.constant 992 : index
    %c0_120 = arith.constant 0 : index
    %483 = vector.load %arg2[%c992, %c0_120] : memref<2368x128xbf16, #tpu.memory_space<vmem>>, vector<128x128xbf16>
    %484 = arith.truncf %482 : vector<8x128xf32> to vector<8x128xbf16>
    %cst_121 = arith.constant dense<0.000000e+00> : vector<8x128xf32>
    %485 = tpu.matmul %484, %483, %cst_121 {dimension_numbers = #tpu.dot_dimension_numbers<[1], [0], [0], [1], [0, 0, 1, 1], [], []>} : vector<8x128xbf16>, vector<128x128xbf16>, vector<8x128xf32> -> vector<8x128xf32>
    %c24 = arith.constant 24 : index
    %c0_122 = arith.constant 0 : index
    %486 = vector.load %arg1[%c24, %c0_122] : memref<48x128xf32, #tpu.memory_space<vmem>>, vector<1x128xf32>
    %487 = vector.broadcast %486 : vector<1x128xf32> to vector<8x128xf32>
    %488 = arith.addf %485, %487 : vector<8x128xf32>
    %c1120 = arith.constant 1120 : index
    %c0_123 = arith.constant 0 : index
    %489 = vector.load %arg2[%c1120, %c0_123] : memref<2368x128xbf16, #tpu.memory_space<vmem>>, vector<128x128xbf16>
    %490 = arith.truncf %354 : vector<8x128xf32> to vector<8x128xbf16>
    %cst_124 = arith.constant dense<0.000000e+00> : vector<8x128xf32>
    %491 = tpu.matmul %490, %489, %cst_124 {dimension_numbers = #tpu.dot_dimension_numbers<[1], [0], [0], [1], [0, 0, 1, 1], [], []>} : vector<8x128xbf16>, vector<128x128xbf16>, vector<8x128xf32> -> vector<8x128xf32>
    %c25 = arith.constant 25 : index
    %c0_125 = arith.constant 0 : index
    %492 = vector.load %arg1[%c25, %c0_125] : memref<48x128xf32, #tpu.memory_space<vmem>>, vector<1x128xf32>
    %493 = vector.broadcast %492 : vector<1x128xf32> to vector<8x128xf32>
    %494 = arith.addf %491, %493 : vector<8x128xf32>
    %495 = vector.extract_strided_slice %488 {offsets = [0, 0], sizes = [8, 32], strides = [1, 1]} : vector<8x128xf32> to vector<8x32xf32>
    %496 = vector.extract_strided_slice %494 {offsets = [0, 0], sizes = [8, 32], strides = [1, 1]} : vector<8x128xf32> to vector<8x32xf32>
    %497 = vector.extract_strided_slice %494 {offsets = [0, 32], sizes = [8, 32], strides = [1, 1]} : vector<8x128xf32> to vector<8x32xf32>
    %c1248 = arith.constant 1248 : index
    %c0_126 = arith.constant 0 : index
    %498 = vector.load %arg2[%c1248, %c0_126] : memref<2368x128xbf16, #tpu.memory_space<vmem>>, vector<32x128xbf16>
    %c26 = arith.constant 26 : index
    %c0_127 = arith.constant 0 : index
    %499 = vector.load %arg1[%c26, %c0_127] : memref<48x128xf32, #tpu.memory_space<vmem>>, vector<1x128xf32>
    %500 = vector.extract_strided_slice %495 {offsets = [0, 0], sizes = [8, 8], strides = [1, 1]} : vector<8x32xf32> to vector<8x8xf32>
    %501 = vector.extract_strided_slice %495 {offsets = [0, 8], sizes = [8, 8], strides = [1, 1]} : vector<8x32xf32> to vector<8x8xf32>
    %502 = vector.extract_strided_slice %495 {offsets = [0, 16], sizes = [8, 8], strides = [1, 1]} : vector<8x32xf32> to vector<8x8xf32>
    %503 = vector.extract_strided_slice %495 {offsets = [0, 24], sizes = [8, 8], strides = [1, 1]} : vector<8x32xf32> to vector<8x8xf32>
    %504 = vector.shape_cast %500 : vector<8x8xf32> to vector<1x8x8xf32>
    %505 = vector.shape_cast %501 : vector<8x8xf32> to vector<1x8x8xf32>
    %506 = vector.shape_cast %502 : vector<8x8xf32> to vector<1x8x8xf32>
    %507 = vector.shape_cast %503 : vector<8x8xf32> to vector<1x8x8xf32>
    %508 = tpu.concatenate %504, %505, %506, %507 in 0 : vector<1x8x8xf32>, vector<1x8x8xf32>, vector<1x8x8xf32>, vector<1x8x8xf32> -> vector<4x8x8xf32>
    %509 = vector.extract_strided_slice %496 {offsets = [0, 0], sizes = [8, 8], strides = [1, 1]} : vector<8x32xf32> to vector<8x8xf32>
    %510 = vector.extract_strided_slice %496 {offsets = [0, 8], sizes = [8, 8], strides = [1, 1]} : vector<8x32xf32> to vector<8x8xf32>
    %511 = vector.extract_strided_slice %496 {offsets = [0, 16], sizes = [8, 8], strides = [1, 1]} : vector<8x32xf32> to vector<8x8xf32>
    %512 = vector.extract_strided_slice %496 {offsets = [0, 24], sizes = [8, 8], strides = [1, 1]} : vector<8x32xf32> to vector<8x8xf32>
    %513 = vector.shape_cast %509 : vector<8x8xf32> to vector<1x8x8xf32>
    %514 = vector.shape_cast %510 : vector<8x8xf32> to vector<1x8x8xf32>
    %515 = vector.shape_cast %511 : vector<8x8xf32> to vector<1x8x8xf32>
    %516 = vector.shape_cast %512 : vector<8x8xf32> to vector<1x8x8xf32>
    %517 = tpu.concatenate %513, %514, %515, %516 in 0 : vector<1x8x8xf32>, vector<1x8x8xf32>, vector<1x8x8xf32>, vector<1x8x8xf32> -> vector<4x8x8xf32>
    %518 = vector.extract_strided_slice %497 {offsets = [0, 0], sizes = [8, 8], strides = [1, 1]} : vector<8x32xf32> to vector<8x8xf32>
    %519 = vector.extract_strided_slice %497 {offsets = [0, 8], sizes = [8, 8], strides = [1, 1]} : vector<8x32xf32> to vector<8x8xf32>
    %520 = vector.extract_strided_slice %497 {offsets = [0, 16], sizes = [8, 8], strides = [1, 1]} : vector<8x32xf32> to vector<8x8xf32>
    %521 = vector.extract_strided_slice %497 {offsets = [0, 24], sizes = [8, 8], strides = [1, 1]} : vector<8x32xf32> to vector<8x8xf32>
    %522 = vector.shape_cast %518 : vector<8x8xf32> to vector<1x8x8xf32>
    %523 = vector.shape_cast %519 : vector<8x8xf32> to vector<1x8x8xf32>
    %524 = vector.shape_cast %520 : vector<8x8xf32> to vector<1x8x8xf32>
    %525 = vector.shape_cast %521 : vector<8x8xf32> to vector<1x8x8xf32>
    %526 = tpu.concatenate %522, %523, %524, %525 in 0 : vector<1x8x8xf32>, vector<1x8x8xf32>, vector<1x8x8xf32>, vector<1x8x8xf32> -> vector<4x8x8xf32>
    %527 = arith.truncf %508 : vector<4x8x8xf32> to vector<4x8x8xbf16>
    %528 = arith.truncf %517 : vector<4x8x8xf32> to vector<4x8x8xbf16>
    "tpu.trace_start"() <{level = 10 : i32, message = "hqd,hkd->hqk"}> : () -> ()
    %cst_128 = arith.constant dense<0.000000e+00> : vector<4x8x8xf32>
    %529 = tpu.matmul %527, %528, %cst_128 {dimension_numbers = #tpu.dot_dimension_numbers<[2], [2], [1], [1], [0, 0, 0, 1, 1, 1], [0], [0]>} : vector<4x8x8xbf16>, vector<4x8x8xbf16>, vector<4x8x8xf32> -> vector<4x8x8xf32>
    "tpu.trace_stop"() : () -> ()
    %cst_129 = arith.constant 0.353553385 : f32
    %530 = vector.broadcast %cst_129 : f32 to vector<4x8x8xf32>
    %531 = arith.mulf %529, %530 : vector<4x8x8xf32>
    %532 = vector.shape_cast %6 : vector<1x8xf32> to vector<1x1x8xf32>
    %533 = vector.broadcast %532 : vector<1x1x8xf32> to vector<4x8x8xf32>
    %534 = arith.addf %531, %533 : vector<4x8x8xf32>
    %cst_130 = arith.constant dense<0xFF800000> : vector<4x8xf32>
    %535 = vector.multi_reduction <maximumf>, %534, %cst_130 [2] : vector<4x8x8xf32> to vector<4x8xf32>
    %536 = vector.shape_cast %535 : vector<4x8xf32> to vector<4x8x1xf32>
    %537 = vector.broadcast %536 : vector<4x8x1xf32> to vector<4x8x8xf32>
    %538 = arith.subf %534, %537 : vector<4x8x8xf32>
    %539 = math.exp %538 : vector<4x8x8xf32>
    %cst_131 = arith.constant dense<0.000000e+00> : vector<4x8xf32>
    %540 = vector.multi_reduction <add>, %539, %cst_131 [2] : vector<4x8x8xf32> to vector<4x8xf32>
    %541 = vector.shape_cast %540 : vector<4x8xf32> to vector<4x8x1xf32>
    %542 = vector.broadcast %541 : vector<4x8x1xf32> to vector<4x8x8xf32>
    %543 = arith.divf %539, %542 : vector<4x8x8xf32>
    %544 = arith.truncf %543 : vector<4x8x8xf32> to vector<4x8x8xbf16>
    %545 = arith.truncf %526 : vector<4x8x8xf32> to vector<4x8x8xbf16>
    "tpu.trace_start"() <{level = 10 : i32, message = "hqk,hkd->hqd"}> : () -> ()
    %cst_132 = arith.constant dense<0.000000e+00> : vector<4x8x8xf32>
    %546 = tpu.matmul %544, %545, %cst_132 {dimension_numbers = #tpu.dot_dimension_numbers<[2], [1], [1], [2], [0, 0, 0, 1, 1, 2], [0], [0]>} : vector<4x8x8xbf16>, vector<4x8x8xbf16>, vector<4x8x8xf32> -> vector<4x8x8xf32>
    "tpu.trace_stop"() : () -> ()
    %547 = vector.extract_strided_slice %546 {offsets = [0, 0, 0], sizes = [1, 8, 8], strides = [1, 1, 1]} : vector<4x8x8xf32> to vector<1x8x8xf32>
    %548 = vector.shape_cast %547 : vector<1x8x8xf32> to vector<8x8xf32>
    %549 = vector.extract_strided_slice %546 {offsets = [1, 0, 0], sizes = [1, 8, 8], strides = [1, 1, 1]} : vector<4x8x8xf32> to vector<1x8x8xf32>
    %550 = vector.shape_cast %549 : vector<1x8x8xf32> to vector<8x8xf32>
    %551 = vector.extract_strided_slice %546 {offsets = [2, 0, 0], sizes = [1, 8, 8], strides = [1, 1, 1]} : vector<4x8x8xf32> to vector<1x8x8xf32>
    %552 = vector.shape_cast %551 : vector<1x8x8xf32> to vector<8x8xf32>
    %553 = vector.extract_strided_slice %546 {offsets = [3, 0, 0], sizes = [1, 8, 8], strides = [1, 1, 1]} : vector<4x8x8xf32> to vector<1x8x8xf32>
    %554 = vector.shape_cast %553 : vector<1x8x8xf32> to vector<8x8xf32>
    %555 = tpu.concatenate %548, %550, %552, %554 in 1 : vector<8x8xf32>, vector<8x8xf32>, vector<8x8xf32>, vector<8x8xf32> -> vector<8x32xf32>
    %556 = arith.truncf %555 : vector<8x32xf32> to vector<8x32xbf16>
    %cst_133 = arith.constant dense<0.000000e+00> : vector<8x128xf32>
    %557 = tpu.matmul %556, %498, %cst_133 {dimension_numbers = #tpu.dot_dimension_numbers<[1], [0], [0], [1], [0, 0, 1, 1], [], []>} : vector<8x32xbf16>, vector<32x128xbf16>, vector<8x128xf32> -> vector<8x128xf32>
    %558 = vector.broadcast %499 : vector<1x128xf32> to vector<8x128xf32>
    %559 = arith.addf %557, %558 : vector<8x128xf32>
    %560 = arith.addf %482, %559 : vector<8x128xf32>
    %c27 = arith.constant 27 : index
    %c0_134 = arith.constant 0 : index
    %561 = vector.load %arg1[%c27, %c0_134] : memref<48x128xf32, #tpu.memory_space<vmem>>, vector<2x128xf32>
    %562 = vector.extract_strided_slice %561 {offsets = [0, 0], sizes = [1, 128], strides = [1, 1]} : vector<2x128xf32> to vector<1x128xf32>
    %563 = vector.extract_strided_slice %561 {offsets = [1, 0], sizes = [1, 128], strides = [1, 1]} : vector<2x128xf32> to vector<1x128xf32>
    %cst_135 = arith.constant dense<0.000000e+00> : vector<8xf32>
    %564 = vector.multi_reduction <add>, %560, %cst_135 [1] : vector<8x128xf32> to vector<8xf32>
    %565 = vector.shape_cast %564 : vector<8xf32> to vector<8x1xf32>
    %cst_136 = arith.constant 3.125000e-02 : f32
    %566 = vector.broadcast %cst_136 : f32 to vector<8x1xf32>
    %567 = arith.mulf %565, %566 : vector<8x1xf32>
    %568 = arith.mulf %560, %560 : vector<8x128xf32>
    %cst_137 = arith.constant dense<0.000000e+00> : vector<8xf32>
    %569 = vector.multi_reduction <add>, %568, %cst_137 [1] : vector<8x128xf32> to vector<8xf32>
    %570 = vector.shape_cast %569 : vector<8xf32> to vector<8x1xf32>
    %cst_138 = arith.constant 3.125000e-02 : f32
    %571 = vector.broadcast %cst_138 : f32 to vector<8x1xf32>
    %572 = arith.mulf %570, %571 : vector<8x1xf32>
    %573 = arith.mulf %567, %567 : vector<8x1xf32>
    %574 = arith.subf %572, %573 : vector<8x1xf32>
    %cst_139 = arith.constant 0.000000e+00 : f32
    %575 = vector.broadcast %cst_139 : f32 to vector<8x1xf32>
    %576 = arith.maximumf %574, %575 : vector<8x1xf32>
    %cst_140 = arith.constant 9.99999996E-13 : f32
    %577 = vector.broadcast %cst_140 : f32 to vector<8x1xf32>
    %578 = arith.addf %576, %577 : vector<8x1xf32>
    %579 = math.rsqrt %578 : vector<8x1xf32>
    %580 = vector.broadcast %567 : vector<8x1xf32> to vector<8x128xf32>
    %581 = arith.subf %560, %580 : vector<8x128xf32>
    %582 = vector.broadcast %579 : vector<8x1xf32> to vector<8x128xf32>
    %583 = arith.mulf %581, %582 : vector<8x128xf32>
    %584 = vector.broadcast %562 : vector<1x128xf32> to vector<8x128xf32>
    %585 = arith.mulf %583, %584 : vector<8x128xf32>
    %586 = vector.broadcast %563 : vector<1x128xf32> to vector<8x128xf32>
    %587 = arith.addf %585, %586 : vector<8x128xf32>
    %c1280 = arith.constant 1280 : index
    %c0_141 = arith.constant 0 : index
    %588 = vector.load %arg2[%c1280, %c0_141] : memref<2368x128xbf16, #tpu.memory_space<vmem>>, vector<128x128xbf16>
    %589 = arith.truncf %587 : vector<8x128xf32> to vector<8x128xbf16>
    %cst_142 = arith.constant dense<0.000000e+00> : vector<8x128xf32>
    %590 = tpu.matmul %589, %588, %cst_142 {dimension_numbers = #tpu.dot_dimension_numbers<[1], [0], [0], [1], [0, 0, 1, 1], [], []>} : vector<8x128xbf16>, vector<128x128xbf16>, vector<8x128xf32> -> vector<8x128xf32>
    %c29 = arith.constant 29 : index
    %c0_143 = arith.constant 0 : index
    %591 = vector.load %arg1[%c29, %c0_143] : memref<48x128xf32, #tpu.memory_space<vmem>>, vector<1x128xf32>
    %592 = vector.broadcast %591 : vector<1x128xf32> to vector<8x128xf32>
    %593 = arith.addf %590, %592 : vector<8x128xf32>
    %594 = arith.mulf %593, %593 : vector<8x128xf32>
    %595 = arith.mulf %593, %594 : vector<8x128xf32>
    %cst_144 = arith.constant 4.471500e-02 : f32
    %596 = vector.broadcast %cst_144 : f32 to vector<8x128xf32>
    %597 = arith.mulf %596, %595 : vector<8x128xf32>
    %598 = arith.addf %593, %597 : vector<8x128xf32>
    %cst_145 = arith.constant 0.797884583 : f32
    %599 = vector.broadcast %cst_145 : f32 to vector<8x128xf32>
    %600 = arith.mulf %599, %598 : vector<8x128xf32>
    %601 = math.tanh %600 : vector<8x128xf32>
    %cst_146 = arith.constant 1.000000e+00 : f32
    %602 = vector.broadcast %cst_146 : f32 to vector<8x128xf32>
    %603 = arith.addf %602, %601 : vector<8x128xf32>
    %cst_147 = arith.constant 5.000000e-01 : f32
    %604 = vector.broadcast %cst_147 : f32 to vector<8x128xf32>
    %605 = arith.mulf %604, %603 : vector<8x128xf32>
    %606 = arith.mulf %593, %605 : vector<8x128xf32>
    %c1408 = arith.constant 1408 : index
    %c0_148 = arith.constant 0 : index
    %607 = vector.load %arg2[%c1408, %c0_148] : memref<2368x128xbf16, #tpu.memory_space<vmem>>, vector<128x128xbf16>
    %608 = arith.truncf %606 : vector<8x128xf32> to vector<8x128xbf16>
    %cst_149 = arith.constant dense<0.000000e+00> : vector<8x128xf32>
    %609 = tpu.matmul %608, %607, %cst_149 {dimension_numbers = #tpu.dot_dimension_numbers<[1], [0], [0], [1], [0, 0, 1, 1], [], []>} : vector<8x128xbf16>, vector<128x128xbf16>, vector<8x128xf32> -> vector<8x128xf32>
    %610 = arith.addf %587, %609 : vector<8x128xf32>
    %c30 = arith.constant 30 : index
    %c0_150 = arith.constant 0 : index
    %611 = vector.load %arg1[%c30, %c0_150] : memref<48x128xf32, #tpu.memory_space<vmem>>, vector<1x128xf32>
    %612 = vector.broadcast %611 : vector<1x128xf32> to vector<8x128xf32>
    %613 = arith.addf %610, %612 : vector<8x128xf32>
    %c31 = arith.constant 31 : index
    %c0_151 = arith.constant 0 : index
    %614 = vector.load %arg1[%c31, %c0_151] : memref<48x128xf32, #tpu.memory_space<vmem>>, vector<2x128xf32>
    %615 = vector.extract_strided_slice %614 {offsets = [0, 0], sizes = [1, 128], strides = [1, 1]} : vector<2x128xf32> to vector<1x128xf32>
    %616 = vector.extract_strided_slice %614 {offsets = [1, 0], sizes = [1, 128], strides = [1, 1]} : vector<2x128xf32> to vector<1x128xf32>
    %cst_152 = arith.constant dense<0.000000e+00> : vector<8xf32>
    %617 = vector.multi_reduction <add>, %613, %cst_152 [1] : vector<8x128xf32> to vector<8xf32>
    %618 = vector.shape_cast %617 : vector<8xf32> to vector<8x1xf32>
    %cst_153 = arith.constant 3.125000e-02 : f32
    %619 = vector.broadcast %cst_153 : f32 to vector<8x1xf32>
    %620 = arith.mulf %618, %619 : vector<8x1xf32>
    %621 = arith.mulf %613, %613 : vector<8x128xf32>
    %cst_154 = arith.constant dense<0.000000e+00> : vector<8xf32>
    %622 = vector.multi_reduction <add>, %621, %cst_154 [1] : vector<8x128xf32> to vector<8xf32>
    %623 = vector.shape_cast %622 : vector<8xf32> to vector<8x1xf32>
    %cst_155 = arith.constant 3.125000e-02 : f32
    %624 = vector.broadcast %cst_155 : f32 to vector<8x1xf32>
    %625 = arith.mulf %623, %624 : vector<8x1xf32>
    %626 = arith.mulf %620, %620 : vector<8x1xf32>
    %627 = arith.subf %625, %626 : vector<8x1xf32>
    %cst_156 = arith.constant 0.000000e+00 : f32
    %628 = vector.broadcast %cst_156 : f32 to vector<8x1xf32>
    %629 = arith.maximumf %627, %628 : vector<8x1xf32>
    %cst_157 = arith.constant 9.99999996E-13 : f32
    %630 = vector.broadcast %cst_157 : f32 to vector<8x1xf32>
    %631 = arith.addf %629, %630 : vector<8x1xf32>
    %632 = math.rsqrt %631 : vector<8x1xf32>
    %633 = vector.broadcast %620 : vector<8x1xf32> to vector<8x128xf32>
    %634 = arith.subf %613, %633 : vector<8x128xf32>
    %635 = vector.broadcast %632 : vector<8x1xf32> to vector<8x128xf32>
    %636 = arith.mulf %634, %635 : vector<8x128xf32>
    %637 = vector.broadcast %615 : vector<1x128xf32> to vector<8x128xf32>
    %638 = arith.mulf %636, %637 : vector<8x128xf32>
    %639 = vector.broadcast %616 : vector<1x128xf32> to vector<8x128xf32>
    %640 = arith.addf %638, %639 : vector<8x128xf32>
    %c1536 = arith.constant 1536 : index
    %c0_158 = arith.constant 0 : index
    %641 = vector.load %arg2[%c1536, %c0_158] : memref<2368x128xbf16, #tpu.memory_space<vmem>>, vector<128x128xbf16>
    %642 = arith.truncf %640 : vector<8x128xf32> to vector<8x128xbf16>
    %cst_159 = arith.constant dense<0.000000e+00> : vector<8x128xf32>
    %643 = tpu.matmul %642, %641, %cst_159 {dimension_numbers = #tpu.dot_dimension_numbers<[1], [0], [0], [1], [0, 0, 1, 1], [], []>} : vector<8x128xbf16>, vector<128x128xbf16>, vector<8x128xf32> -> vector<8x128xf32>
    %c33 = arith.constant 33 : index
    %c0_160 = arith.constant 0 : index
    %644 = vector.load %arg1[%c33, %c0_160] : memref<48x128xf32, #tpu.memory_space<vmem>>, vector<1x128xf32>
    %645 = vector.broadcast %644 : vector<1x128xf32> to vector<8x128xf32>
    %646 = arith.addf %643, %645 : vector<8x128xf32>
    %647 = vector.extract_strided_slice %646 {offsets = [0, 0], sizes = [8, 32], strides = [1, 1]} : vector<8x128xf32> to vector<8x32xf32>
    %648 = vector.extract_strided_slice %646 {offsets = [0, 32], sizes = [8, 32], strides = [1, 1]} : vector<8x128xf32> to vector<8x32xf32>
    %649 = vector.extract_strided_slice %646 {offsets = [0, 64], sizes = [8, 32], strides = [1, 1]} : vector<8x128xf32> to vector<8x32xf32>
    %c1664 = arith.constant 1664 : index
    %c0_161 = arith.constant 0 : index
    %650 = vector.load %arg2[%c1664, %c0_161] : memref<2368x128xbf16, #tpu.memory_space<vmem>>, vector<32x128xbf16>
    %c34 = arith.constant 34 : index
    %c0_162 = arith.constant 0 : index
    %651 = vector.load %arg1[%c34, %c0_162] : memref<48x128xf32, #tpu.memory_space<vmem>>, vector<1x128xf32>
    %652 = vector.extract_strided_slice %647 {offsets = [0, 0], sizes = [8, 8], strides = [1, 1]} : vector<8x32xf32> to vector<8x8xf32>
    %653 = vector.extract_strided_slice %647 {offsets = [0, 8], sizes = [8, 8], strides = [1, 1]} : vector<8x32xf32> to vector<8x8xf32>
    %654 = vector.extract_strided_slice %647 {offsets = [0, 16], sizes = [8, 8], strides = [1, 1]} : vector<8x32xf32> to vector<8x8xf32>
    %655 = vector.extract_strided_slice %647 {offsets = [0, 24], sizes = [8, 8], strides = [1, 1]} : vector<8x32xf32> to vector<8x8xf32>
    %656 = vector.shape_cast %652 : vector<8x8xf32> to vector<1x8x8xf32>
    %657 = vector.shape_cast %653 : vector<8x8xf32> to vector<1x8x8xf32>
    %658 = vector.shape_cast %654 : vector<8x8xf32> to vector<1x8x8xf32>
    %659 = vector.shape_cast %655 : vector<8x8xf32> to vector<1x8x8xf32>
    %660 = tpu.concatenate %656, %657, %658, %659 in 0 : vector<1x8x8xf32>, vector<1x8x8xf32>, vector<1x8x8xf32>, vector<1x8x8xf32> -> vector<4x8x8xf32>
    %661 = vector.extract_strided_slice %648 {offsets = [0, 0], sizes = [8, 8], strides = [1, 1]} : vector<8x32xf32> to vector<8x8xf32>
    %662 = vector.extract_strided_slice %648 {offsets = [0, 8], sizes = [8, 8], strides = [1, 1]} : vector<8x32xf32> to vector<8x8xf32>
    %663 = vector.extract_strided_slice %648 {offsets = [0, 16], sizes = [8, 8], strides = [1, 1]} : vector<8x32xf32> to vector<8x8xf32>
    %664 = vector.extract_strided_slice %648 {offsets = [0, 24], sizes = [8, 8], strides = [1, 1]} : vector<8x32xf32> to vector<8x8xf32>
    %665 = vector.shape_cast %661 : vector<8x8xf32> to vector<1x8x8xf32>
    %666 = vector.shape_cast %662 : vector<8x8xf32> to vector<1x8x8xf32>
    %667 = vector.shape_cast %663 : vector<8x8xf32> to vector<1x8x8xf32>
    %668 = vector.shape_cast %664 : vector<8x8xf32> to vector<1x8x8xf32>
    %669 = tpu.concatenate %665, %666, %667, %668 in 0 : vector<1x8x8xf32>, vector<1x8x8xf32>, vector<1x8x8xf32>, vector<1x8x8xf32> -> vector<4x8x8xf32>
    %670 = vector.extract_strided_slice %649 {offsets = [0, 0], sizes = [8, 8], strides = [1, 1]} : vector<8x32xf32> to vector<8x8xf32>
    %671 = vector.extract_strided_slice %649 {offsets = [0, 8], sizes = [8, 8], strides = [1, 1]} : vector<8x32xf32> to vector<8x8xf32>
    %672 = vector.extract_strided_slice %649 {offsets = [0, 16], sizes = [8, 8], strides = [1, 1]} : vector<8x32xf32> to vector<8x8xf32>
    %673 = vector.extract_strided_slice %649 {offsets = [0, 24], sizes = [8, 8], strides = [1, 1]} : vector<8x32xf32> to vector<8x8xf32>
    %674 = vector.shape_cast %670 : vector<8x8xf32> to vector<1x8x8xf32>
    %675 = vector.shape_cast %671 : vector<8x8xf32> to vector<1x8x8xf32>
    %676 = vector.shape_cast %672 : vector<8x8xf32> to vector<1x8x8xf32>
    %677 = vector.shape_cast %673 : vector<8x8xf32> to vector<1x8x8xf32>
    %678 = tpu.concatenate %674, %675, %676, %677 in 0 : vector<1x8x8xf32>, vector<1x8x8xf32>, vector<1x8x8xf32>, vector<1x8x8xf32> -> vector<4x8x8xf32>
    %679 = arith.truncf %660 : vector<4x8x8xf32> to vector<4x8x8xbf16>
    %680 = arith.truncf %669 : vector<4x8x8xf32> to vector<4x8x8xbf16>
    "tpu.trace_start"() <{level = 10 : i32, message = "hqd,hkd->hqk"}> : () -> ()
    %cst_163 = arith.constant dense<0.000000e+00> : vector<4x8x8xf32>
    %681 = tpu.matmul %679, %680, %cst_163 {dimension_numbers = #tpu.dot_dimension_numbers<[2], [2], [1], [1], [0, 0, 0, 1, 1, 1], [0], [0]>} : vector<4x8x8xbf16>, vector<4x8x8xbf16>, vector<4x8x8xf32> -> vector<4x8x8xf32>
    "tpu.trace_stop"() : () -> ()
    %cst_164 = arith.constant 0.353553385 : f32
    %682 = vector.broadcast %cst_164 : f32 to vector<4x8x8xf32>
    %683 = arith.mulf %681, %682 : vector<4x8x8xf32>
    %684 = vector.shape_cast %21 : vector<8x8xf32> to vector<1x8x8xf32>
    %685 = vector.broadcast %684 : vector<1x8x8xf32> to vector<4x8x8xf32>
    %686 = arith.addf %683, %685 : vector<4x8x8xf32>
    %cst_165 = arith.constant dense<0xFF800000> : vector<4x8xf32>
    %687 = vector.multi_reduction <maximumf>, %686, %cst_165 [2] : vector<4x8x8xf32> to vector<4x8xf32>
    %688 = vector.shape_cast %687 : vector<4x8xf32> to vector<4x8x1xf32>
    %689 = vector.broadcast %688 : vector<4x8x1xf32> to vector<4x8x8xf32>
    %690 = arith.subf %686, %689 : vector<4x8x8xf32>
    %691 = math.exp %690 : vector<4x8x8xf32>
    %cst_166 = arith.constant dense<0.000000e+00> : vector<4x8xf32>
    %692 = vector.multi_reduction <add>, %691, %cst_166 [2] : vector<4x8x8xf32> to vector<4x8xf32>
    %693 = vector.shape_cast %692 : vector<4x8xf32> to vector<4x8x1xf32>
    %694 = vector.broadcast %693 : vector<4x8x1xf32> to vector<4x8x8xf32>
    %695 = arith.divf %691, %694 : vector<4x8x8xf32>
    %696 = arith.truncf %695 : vector<4x8x8xf32> to vector<4x8x8xbf16>
    %697 = arith.truncf %678 : vector<4x8x8xf32> to vector<4x8x8xbf16>
    "tpu.trace_start"() <{level = 10 : i32, message = "hqk,hkd->hqd"}> : () -> ()
    %cst_167 = arith.constant dense<0.000000e+00> : vector<4x8x8xf32>
    %698 = tpu.matmul %696, %697, %cst_167 {dimension_numbers = #tpu.dot_dimension_numbers<[2], [1], [1], [2], [0, 0, 0, 1, 1, 2], [0], [0]>} : vector<4x8x8xbf16>, vector<4x8x8xbf16>, vector<4x8x8xf32> -> vector<4x8x8xf32>
    "tpu.trace_stop"() : () -> ()
    %699 = vector.extract_strided_slice %698 {offsets = [0, 0, 0], sizes = [1, 8, 8], strides = [1, 1, 1]} : vector<4x8x8xf32> to vector<1x8x8xf32>
    %700 = vector.shape_cast %699 : vector<1x8x8xf32> to vector<8x8xf32>
    %701 = vector.extract_strided_slice %698 {offsets = [1, 0, 0], sizes = [1, 8, 8], strides = [1, 1, 1]} : vector<4x8x8xf32> to vector<1x8x8xf32>
    %702 = vector.shape_cast %701 : vector<1x8x8xf32> to vector<8x8xf32>
    %703 = vector.extract_strided_slice %698 {offsets = [2, 0, 0], sizes = [1, 8, 8], strides = [1, 1, 1]} : vector<4x8x8xf32> to vector<1x8x8xf32>
    %704 = vector.shape_cast %703 : vector<1x8x8xf32> to vector<8x8xf32>
    %705 = vector.extract_strided_slice %698 {offsets = [3, 0, 0], sizes = [1, 8, 8], strides = [1, 1, 1]} : vector<4x8x8xf32> to vector<1x8x8xf32>
    %706 = vector.shape_cast %705 : vector<1x8x8xf32> to vector<8x8xf32>
    %707 = tpu.concatenate %700, %702, %704, %706 in 1 : vector<8x8xf32>, vector<8x8xf32>, vector<8x8xf32>, vector<8x8xf32> -> vector<8x32xf32>
    %708 = arith.truncf %707 : vector<8x32xf32> to vector<8x32xbf16>
    %cst_168 = arith.constant dense<0.000000e+00> : vector<8x128xf32>
    %709 = tpu.matmul %708, %650, %cst_168 {dimension_numbers = #tpu.dot_dimension_numbers<[1], [0], [0], [1], [0, 0, 1, 1], [], []>} : vector<8x32xbf16>, vector<32x128xbf16>, vector<8x128xf32> -> vector<8x128xf32>
    %710 = vector.broadcast %651 : vector<1x128xf32> to vector<8x128xf32>
    %711 = arith.addf %709, %710 : vector<8x128xf32>
    %712 = arith.addf %640, %711 : vector<8x128xf32>
    %c35 = arith.constant 35 : index
    %c0_169 = arith.constant 0 : index
    %713 = vector.load %arg1[%c35, %c0_169] : memref<48x128xf32, #tpu.memory_space<vmem>>, vector<2x128xf32>
    %714 = vector.extract_strided_slice %713 {offsets = [0, 0], sizes = [1, 128], strides = [1, 1]} : vector<2x128xf32> to vector<1x128xf32>
    %715 = vector.extract_strided_slice %713 {offsets = [1, 0], sizes = [1, 128], strides = [1, 1]} : vector<2x128xf32> to vector<1x128xf32>
    %cst_170 = arith.constant dense<0.000000e+00> : vector<8xf32>
    %716 = vector.multi_reduction <add>, %712, %cst_170 [1] : vector<8x128xf32> to vector<8xf32>
    %717 = vector.shape_cast %716 : vector<8xf32> to vector<8x1xf32>
    %cst_171 = arith.constant 3.125000e-02 : f32
    %718 = vector.broadcast %cst_171 : f32 to vector<8x1xf32>
    %719 = arith.mulf %717, %718 : vector<8x1xf32>
    %720 = arith.mulf %712, %712 : vector<8x128xf32>
    %cst_172 = arith.constant dense<0.000000e+00> : vector<8xf32>
    %721 = vector.multi_reduction <add>, %720, %cst_172 [1] : vector<8x128xf32> to vector<8xf32>
    %722 = vector.shape_cast %721 : vector<8xf32> to vector<8x1xf32>
    %cst_173 = arith.constant 3.125000e-02 : f32
    %723 = vector.broadcast %cst_173 : f32 to vector<8x1xf32>
    %724 = arith.mulf %722, %723 : vector<8x1xf32>
    %725 = arith.mulf %719, %719 : vector<8x1xf32>
    %726 = arith.subf %724, %725 : vector<8x1xf32>
    %cst_174 = arith.constant 0.000000e+00 : f32
    %727 = vector.broadcast %cst_174 : f32 to vector<8x1xf32>
    %728 = arith.maximumf %726, %727 : vector<8x1xf32>
    %cst_175 = arith.constant 9.99999996E-13 : f32
    %729 = vector.broadcast %cst_175 : f32 to vector<8x1xf32>
    %730 = arith.addf %728, %729 : vector<8x1xf32>
    %731 = math.rsqrt %730 : vector<8x1xf32>
    %732 = vector.broadcast %719 : vector<8x1xf32> to vector<8x128xf32>
    %733 = arith.subf %712, %732 : vector<8x128xf32>
    %734 = vector.broadcast %731 : vector<8x1xf32> to vector<8x128xf32>
    %735 = arith.mulf %733, %734 : vector<8x128xf32>
    %736 = vector.broadcast %714 : vector<1x128xf32> to vector<8x128xf32>
    %737 = arith.mulf %735, %736 : vector<8x128xf32>
    %738 = vector.broadcast %715 : vector<1x128xf32> to vector<8x128xf32>
    %739 = arith.addf %737, %738 : vector<8x128xf32>
    %c1696 = arith.constant 1696 : index
    %c0_176 = arith.constant 0 : index
    %740 = vector.load %arg2[%c1696, %c0_176] : memref<2368x128xbf16, #tpu.memory_space<vmem>>, vector<128x128xbf16>
    %741 = arith.truncf %739 : vector<8x128xf32> to vector<8x128xbf16>
    %cst_177 = arith.constant dense<0.000000e+00> : vector<8x128xf32>
    %742 = tpu.matmul %741, %740, %cst_177 {dimension_numbers = #tpu.dot_dimension_numbers<[1], [0], [0], [1], [0, 0, 1, 1], [], []>} : vector<8x128xbf16>, vector<128x128xbf16>, vector<8x128xf32> -> vector<8x128xf32>
    %c37 = arith.constant 37 : index
    %c0_178 = arith.constant 0 : index
    %743 = vector.load %arg1[%c37, %c0_178] : memref<48x128xf32, #tpu.memory_space<vmem>>, vector<1x128xf32>
    %744 = vector.broadcast %743 : vector<1x128xf32> to vector<8x128xf32>
    %745 = arith.addf %742, %744 : vector<8x128xf32>
    %c1824 = arith.constant 1824 : index
    %c0_179 = arith.constant 0 : index
    %746 = vector.load %arg2[%c1824, %c0_179] : memref<2368x128xbf16, #tpu.memory_space<vmem>>, vector<128x128xbf16>
    %747 = arith.truncf %354 : vector<8x128xf32> to vector<8x128xbf16>
    %cst_180 = arith.constant dense<0.000000e+00> : vector<8x128xf32>
    %748 = tpu.matmul %747, %746, %cst_180 {dimension_numbers = #tpu.dot_dimension_numbers<[1], [0], [0], [1], [0, 0, 1, 1], [], []>} : vector<8x128xbf16>, vector<128x128xbf16>, vector<8x128xf32> -> vector<8x128xf32>
    %c38 = arith.constant 38 : index
    %c0_181 = arith.constant 0 : index
    %749 = vector.load %arg1[%c38, %c0_181] : memref<48x128xf32, #tpu.memory_space<vmem>>, vector<1x128xf32>
    %750 = vector.broadcast %749 : vector<1x128xf32> to vector<8x128xf32>
    %751 = arith.addf %748, %750 : vector<8x128xf32>
    %752 = vector.extract_strided_slice %745 {offsets = [0, 0], sizes = [8, 32], strides = [1, 1]} : vector<8x128xf32> to vector<8x32xf32>
    %753 = vector.extract_strided_slice %751 {offsets = [0, 0], sizes = [8, 32], strides = [1, 1]} : vector<8x128xf32> to vector<8x32xf32>
    %754 = vector.extract_strided_slice %751 {offsets = [0, 32], sizes = [8, 32], strides = [1, 1]} : vector<8x128xf32> to vector<8x32xf32>
    %c1952 = arith.constant 1952 : index
    %c0_182 = arith.constant 0 : index
    %755 = vector.load %arg2[%c1952, %c0_182] : memref<2368x128xbf16, #tpu.memory_space<vmem>>, vector<32x128xbf16>
    %c39 = arith.constant 39 : index
    %c0_183 = arith.constant 0 : index
    %756 = vector.load %arg1[%c39, %c0_183] : memref<48x128xf32, #tpu.memory_space<vmem>>, vector<1x128xf32>
    %757 = vector.extract_strided_slice %752 {offsets = [0, 0], sizes = [8, 8], strides = [1, 1]} : vector<8x32xf32> to vector<8x8xf32>
    %758 = vector.extract_strided_slice %752 {offsets = [0, 8], sizes = [8, 8], strides = [1, 1]} : vector<8x32xf32> to vector<8x8xf32>
    %759 = vector.extract_strided_slice %752 {offsets = [0, 16], sizes = [8, 8], strides = [1, 1]} : vector<8x32xf32> to vector<8x8xf32>
    %760 = vector.extract_strided_slice %752 {offsets = [0, 24], sizes = [8, 8], strides = [1, 1]} : vector<8x32xf32> to vector<8x8xf32>
    %761 = vector.shape_cast %757 : vector<8x8xf32> to vector<1x8x8xf32>
    %762 = vector.shape_cast %758 : vector<8x8xf32> to vector<1x8x8xf32>
    %763 = vector.shape_cast %759 : vector<8x8xf32> to vector<1x8x8xf32>
    %764 = vector.shape_cast %760 : vector<8x8xf32> to vector<1x8x8xf32>
    %765 = tpu.concatenate %761, %762, %763, %764 in 0 : vector<1x8x8xf32>, vector<1x8x8xf32>, vector<1x8x8xf32>, vector<1x8x8xf32> -> vector<4x8x8xf32>
    %766 = vector.extract_strided_slice %753 {offsets = [0, 0], sizes = [8, 8], strides = [1, 1]} : vector<8x32xf32> to vector<8x8xf32>
    %767 = vector.extract_strided_slice %753 {offsets = [0, 8], sizes = [8, 8], strides = [1, 1]} : vector<8x32xf32> to vector<8x8xf32>
    %768 = vector.extract_strided_slice %753 {offsets = [0, 16], sizes = [8, 8], strides = [1, 1]} : vector<8x32xf32> to vector<8x8xf32>
    %769 = vector.extract_strided_slice %753 {offsets = [0, 24], sizes = [8, 8], strides = [1, 1]} : vector<8x32xf32> to vector<8x8xf32>
    %770 = vector.shape_cast %766 : vector<8x8xf32> to vector<1x8x8xf32>
    %771 = vector.shape_cast %767 : vector<8x8xf32> to vector<1x8x8xf32>
    %772 = vector.shape_cast %768 : vector<8x8xf32> to vector<1x8x8xf32>
    %773 = vector.shape_cast %769 : vector<8x8xf32> to vector<1x8x8xf32>
    %774 = tpu.concatenate %770, %771, %772, %773 in 0 : vector<1x8x8xf32>, vector<1x8x8xf32>, vector<1x8x8xf32>, vector<1x8x8xf32> -> vector<4x8x8xf32>
    %775 = vector.extract_strided_slice %754 {offsets = [0, 0], sizes = [8, 8], strides = [1, 1]} : vector<8x32xf32> to vector<8x8xf32>
    %776 = vector.extract_strided_slice %754 {offsets = [0, 8], sizes = [8, 8], strides = [1, 1]} : vector<8x32xf32> to vector<8x8xf32>
    %777 = vector.extract_strided_slice %754 {offsets = [0, 16], sizes = [8, 8], strides = [1, 1]} : vector<8x32xf32> to vector<8x8xf32>
    %778 = vector.extract_strided_slice %754 {offsets = [0, 24], sizes = [8, 8], strides = [1, 1]} : vector<8x32xf32> to vector<8x8xf32>
    %779 = vector.shape_cast %775 : vector<8x8xf32> to vector<1x8x8xf32>
    %780 = vector.shape_cast %776 : vector<8x8xf32> to vector<1x8x8xf32>
    %781 = vector.shape_cast %777 : vector<8x8xf32> to vector<1x8x8xf32>
    %782 = vector.shape_cast %778 : vector<8x8xf32> to vector<1x8x8xf32>
    %783 = tpu.concatenate %779, %780, %781, %782 in 0 : vector<1x8x8xf32>, vector<1x8x8xf32>, vector<1x8x8xf32>, vector<1x8x8xf32> -> vector<4x8x8xf32>
    %784 = arith.truncf %765 : vector<4x8x8xf32> to vector<4x8x8xbf16>
    %785 = arith.truncf %774 : vector<4x8x8xf32> to vector<4x8x8xbf16>
    "tpu.trace_start"() <{level = 10 : i32, message = "hqd,hkd->hqk"}> : () -> ()
    %cst_184 = arith.constant dense<0.000000e+00> : vector<4x8x8xf32>
    %786 = tpu.matmul %784, %785, %cst_184 {dimension_numbers = #tpu.dot_dimension_numbers<[2], [2], [1], [1], [0, 0, 0, 1, 1, 1], [0], [0]>} : vector<4x8x8xbf16>, vector<4x8x8xbf16>, vector<4x8x8xf32> -> vector<4x8x8xf32>
    "tpu.trace_stop"() : () -> ()
    %cst_185 = arith.constant 0.353553385 : f32
    %787 = vector.broadcast %cst_185 : f32 to vector<4x8x8xf32>
    %788 = arith.mulf %786, %787 : vector<4x8x8xf32>
    %789 = vector.shape_cast %6 : vector<1x8xf32> to vector<1x1x8xf32>
    %790 = vector.broadcast %789 : vector<1x1x8xf32> to vector<4x8x8xf32>
    %791 = arith.addf %788, %790 : vector<4x8x8xf32>
    %cst_186 = arith.constant dense<0xFF800000> : vector<4x8xf32>
    %792 = vector.multi_reduction <maximumf>, %791, %cst_186 [2] : vector<4x8x8xf32> to vector<4x8xf32>
    %793 = vector.shape_cast %792 : vector<4x8xf32> to vector<4x8x1xf32>
    %794 = vector.broadcast %793 : vector<4x8x1xf32> to vector<4x8x8xf32>
    %795 = arith.subf %791, %794 : vector<4x8x8xf32>
    %796 = math.exp %795 : vector<4x8x8xf32>
    %cst_187 = arith.constant dense<0.000000e+00> : vector<4x8xf32>
    %797 = vector.multi_reduction <add>, %796, %cst_187 [2] : vector<4x8x8xf32> to vector<4x8xf32>
    %798 = vector.shape_cast %797 : vector<4x8xf32> to vector<4x8x1xf32>
    %799 = vector.broadcast %798 : vector<4x8x1xf32> to vector<4x8x8xf32>
    %800 = arith.divf %796, %799 : vector<4x8x8xf32>
    %801 = arith.truncf %800 : vector<4x8x8xf32> to vector<4x8x8xbf16>
    %802 = arith.truncf %783 : vector<4x8x8xf32> to vector<4x8x8xbf16>
    "tpu.trace_start"() <{level = 10 : i32, message = "hqk,hkd->hqd"}> : () -> ()
    %cst_188 = arith.constant dense<0.000000e+00> : vector<4x8x8xf32>
    %803 = tpu.matmul %801, %802, %cst_188 {dimension_numbers = #tpu.dot_dimension_numbers<[2], [1], [1], [2], [0, 0, 0, 1, 1, 2], [0], [0]>} : vector<4x8x8xbf16>, vector<4x8x8xbf16>, vector<4x8x8xf32> -> vector<4x8x8xf32>
    "tpu.trace_stop"() : () -> ()
    %804 = vector.extract_strided_slice %803 {offsets = [0, 0, 0], sizes = [1, 8, 8], strides = [1, 1, 1]} : vector<4x8x8xf32> to vector<1x8x8xf32>
    %805 = vector.shape_cast %804 : vector<1x8x8xf32> to vector<8x8xf32>
    %806 = vector.extract_strided_slice %803 {offsets = [1, 0, 0], sizes = [1, 8, 8], strides = [1, 1, 1]} : vector<4x8x8xf32> to vector<1x8x8xf32>
    %807 = vector.shape_cast %806 : vector<1x8x8xf32> to vector<8x8xf32>
    %808 = vector.extract_strided_slice %803 {offsets = [2, 0, 0], sizes = [1, 8, 8], strides = [1, 1, 1]} : vector<4x8x8xf32> to vector<1x8x8xf32>
    %809 = vector.shape_cast %808 : vector<1x8x8xf32> to vector<8x8xf32>
    %810 = vector.extract_strided_slice %803 {offsets = [3, 0, 0], sizes = [1, 8, 8], strides = [1, 1, 1]} : vector<4x8x8xf32> to vector<1x8x8xf32>
    %811 = vector.shape_cast %810 : vector<1x8x8xf32> to vector<8x8xf32>
    %812 = tpu.concatenate %805, %807, %809, %811 in 1 : vector<8x8xf32>, vector<8x8xf32>, vector<8x8xf32>, vector<8x8xf32> -> vector<8x32xf32>
    %813 = arith.truncf %812 : vector<8x32xf32> to vector<8x32xbf16>
    %cst_189 = arith.constant dense<0.000000e+00> : vector<8x128xf32>
    %814 = tpu.matmul %813, %755, %cst_189 {dimension_numbers = #tpu.dot_dimension_numbers<[1], [0], [0], [1], [0, 0, 1, 1], [], []>} : vector<8x32xbf16>, vector<32x128xbf16>, vector<8x128xf32> -> vector<8x128xf32>
    %815 = vector.broadcast %756 : vector<1x128xf32> to vector<8x128xf32>
    %816 = arith.addf %814, %815 : vector<8x128xf32>
    %817 = arith.addf %739, %816 : vector<8x128xf32>
    %c40 = arith.constant 40 : index
    %c0_190 = arith.constant 0 : index
    %818 = vector.load %arg1[%c40, %c0_190] : memref<48x128xf32, #tpu.memory_space<vmem>>, vector<2x128xf32>
    %819 = vector.extract_strided_slice %818 {offsets = [0, 0], sizes = [1, 128], strides = [1, 1]} : vector<2x128xf32> to vector<1x128xf32>
    %820 = vector.extract_strided_slice %818 {offsets = [1, 0], sizes = [1, 128], strides = [1, 1]} : vector<2x128xf32> to vector<1x128xf32>
    %cst_191 = arith.constant dense<0.000000e+00> : vector<8xf32>
    %821 = vector.multi_reduction <add>, %817, %cst_191 [1] : vector<8x128xf32> to vector<8xf32>
    %822 = vector.shape_cast %821 : vector<8xf32> to vector<8x1xf32>
    %cst_192 = arith.constant 3.125000e-02 : f32
    %823 = vector.broadcast %cst_192 : f32 to vector<8x1xf32>
    %824 = arith.mulf %822, %823 : vector<8x1xf32>
    %825 = arith.mulf %817, %817 : vector<8x128xf32>
    %cst_193 = arith.constant dense<0.000000e+00> : vector<8xf32>
    %826 = vector.multi_reduction <add>, %825, %cst_193 [1] : vector<8x128xf32> to vector<8xf32>
    %827 = vector.shape_cast %826 : vector<8xf32> to vector<8x1xf32>
    %cst_194 = arith.constant 3.125000e-02 : f32
    %828 = vector.broadcast %cst_194 : f32 to vector<8x1xf32>
    %829 = arith.mulf %827, %828 : vector<8x1xf32>
    %830 = arith.mulf %824, %824 : vector<8x1xf32>
    %831 = arith.subf %829, %830 : vector<8x1xf32>
    %cst_195 = arith.constant 0.000000e+00 : f32
    %832 = vector.broadcast %cst_195 : f32 to vector<8x1xf32>
    %833 = arith.maximumf %831, %832 : vector<8x1xf32>
    %cst_196 = arith.constant 9.99999996E-13 : f32
    %834 = vector.broadcast %cst_196 : f32 to vector<8x1xf32>
    %835 = arith.addf %833, %834 : vector<8x1xf32>
    %836 = math.rsqrt %835 : vector<8x1xf32>
    %837 = vector.broadcast %824 : vector<8x1xf32> to vector<8x128xf32>
    %838 = arith.subf %817, %837 : vector<8x128xf32>
    %839 = vector.broadcast %836 : vector<8x1xf32> to vector<8x128xf32>
    %840 = arith.mulf %838, %839 : vector<8x128xf32>
    %841 = vector.broadcast %819 : vector<1x128xf32> to vector<8x128xf32>
    %842 = arith.mulf %840, %841 : vector<8x128xf32>
    %843 = vector.broadcast %820 : vector<1x128xf32> to vector<8x128xf32>
    %844 = arith.addf %842, %843 : vector<8x128xf32>
    %c1984 = arith.constant 1984 : index
    %c0_197 = arith.constant 0 : index
    %845 = vector.load %arg2[%c1984, %c0_197] : memref<2368x128xbf16, #tpu.memory_space<vmem>>, vector<128x128xbf16>
    %846 = arith.truncf %844 : vector<8x128xf32> to vector<8x128xbf16>
    %cst_198 = arith.constant dense<0.000000e+00> : vector<8x128xf32>
    %847 = tpu.matmul %846, %845, %cst_198 {dimension_numbers = #tpu.dot_dimension_numbers<[1], [0], [0], [1], [0, 0, 1, 1], [], []>} : vector<8x128xbf16>, vector<128x128xbf16>, vector<8x128xf32> -> vector<8x128xf32>
    %c42 = arith.constant 42 : index
    %c0_199 = arith.constant 0 : index
    %848 = vector.load %arg1[%c42, %c0_199] : memref<48x128xf32, #tpu.memory_space<vmem>>, vector<1x128xf32>
    %849 = vector.broadcast %848 : vector<1x128xf32> to vector<8x128xf32>
    %850 = arith.addf %847, %849 : vector<8x128xf32>
    %851 = arith.mulf %850, %850 : vector<8x128xf32>
    %852 = arith.mulf %850, %851 : vector<8x128xf32>
    %cst_200 = arith.constant 4.471500e-02 : f32
    %853 = vector.broadcast %cst_200 : f32 to vector<8x128xf32>
    %854 = arith.mulf %853, %852 : vector<8x128xf32>
    %855 = arith.addf %850, %854 : vector<8x128xf32>
    %cst_201 = arith.constant 0.797884583 : f32
    %856 = vector.broadcast %cst_201 : f32 to vector<8x128xf32>
    %857 = arith.mulf %856, %855 : vector<8x128xf32>
    %858 = math.tanh %857 : vector<8x128xf32>
    %cst_202 = arith.constant 1.000000e+00 : f32
    %859 = vector.broadcast %cst_202 : f32 to vector<8x128xf32>
    %860 = arith.addf %859, %858 : vector<8x128xf32>
    %cst_203 = arith.constant 5.000000e-01 : f32
    %861 = vector.broadcast %cst_203 : f32 to vector<8x128xf32>
    %862 = arith.mulf %861, %860 : vector<8x128xf32>
    %863 = arith.mulf %850, %862 : vector<8x128xf32>
    %c2112 = arith.constant 2112 : index
    %c0_204 = arith.constant 0 : index
    %864 = vector.load %arg2[%c2112, %c0_204] : memref<2368x128xbf16, #tpu.memory_space<vmem>>, vector<128x128xbf16>
    %865 = arith.truncf %863 : vector<8x128xf32> to vector<8x128xbf16>
    %cst_205 = arith.constant dense<0.000000e+00> : vector<8x128xf32>
    %866 = tpu.matmul %865, %864, %cst_205 {dimension_numbers = #tpu.dot_dimension_numbers<[1], [0], [0], [1], [0, 0, 1, 1], [], []>} : vector<8x128xbf16>, vector<128x128xbf16>, vector<8x128xf32> -> vector<8x128xf32>
    %867 = arith.addf %844, %866 : vector<8x128xf32>
    %c43 = arith.constant 43 : index
    %c0_206 = arith.constant 0 : index
    %868 = vector.load %arg1[%c43, %c0_206] : memref<48x128xf32, #tpu.memory_space<vmem>>, vector<1x128xf32>
    %869 = vector.broadcast %868 : vector<1x128xf32> to vector<8x128xf32>
    %870 = arith.addf %867, %869 : vector<8x128xf32>
    %c44 = arith.constant 44 : index
    %c0_207 = arith.constant 0 : index
    %871 = vector.load %arg1[%c44, %c0_207] : memref<48x128xf32, #tpu.memory_space<vmem>>, vector<2x128xf32>
    %872 = vector.extract_strided_slice %871 {offsets = [0, 0], sizes = [1, 128], strides = [1, 1]} : vector<2x128xf32> to vector<1x128xf32>
    %873 = vector.extract_strided_slice %871 {offsets = [1, 0], sizes = [1, 128], strides = [1, 1]} : vector<2x128xf32> to vector<1x128xf32>
    %cst_208 = arith.constant dense<0.000000e+00> : vector<8xf32>
    %874 = vector.multi_reduction <add>, %870, %cst_208 [1] : vector<8x128xf32> to vector<8xf32>
    %875 = vector.shape_cast %874 : vector<8xf32> to vector<8x1xf32>
    %cst_209 = arith.constant 3.125000e-02 : f32
    %876 = vector.broadcast %cst_209 : f32 to vector<8x1xf32>
    %877 = arith.mulf %875, %876 : vector<8x1xf32>
    %878 = arith.mulf %870, %870 : vector<8x128xf32>
    %cst_210 = arith.constant dense<0.000000e+00> : vector<8xf32>
    %879 = vector.multi_reduction <add>, %878, %cst_210 [1] : vector<8x128xf32> to vector<8xf32>
    %880 = vector.shape_cast %879 : vector<8xf32> to vector<8x1xf32>
    %cst_211 = arith.constant 3.125000e-02 : f32
    %881 = vector.broadcast %cst_211 : f32 to vector<8x1xf32>
    %882 = arith.mulf %880, %881 : vector<8x1xf32>
    %883 = arith.mulf %877, %877 : vector<8x1xf32>
    %884 = arith.subf %882, %883 : vector<8x1xf32>
    %cst_212 = arith.constant 0.000000e+00 : f32
    %885 = vector.broadcast %cst_212 : f32 to vector<8x1xf32>
    %886 = arith.maximumf %884, %885 : vector<8x1xf32>
    %cst_213 = arith.constant 9.99999996E-13 : f32
    %887 = vector.broadcast %cst_213 : f32 to vector<8x1xf32>
    %888 = arith.addf %886, %887 : vector<8x1xf32>
    %889 = math.rsqrt %888 : vector<8x1xf32>
    %890 = vector.broadcast %877 : vector<8x1xf32> to vector<8x128xf32>
    %891 = arith.subf %870, %890 : vector<8x128xf32>
    %892 = vector.broadcast %889 : vector<8x1xf32> to vector<8x128xf32>
    %893 = arith.mulf %891, %892 : vector<8x128xf32>
    %894 = vector.broadcast %872 : vector<1x128xf32> to vector<8x128xf32>
    %895 = arith.mulf %893, %894 : vector<8x128xf32>
    %896 = vector.broadcast %873 : vector<1x128xf32> to vector<8x128xf32>
    %897 = arith.addf %895, %896 : vector<8x128xf32>
    %c2240 = arith.constant 2240 : index
    %c0_214 = arith.constant 0 : index
    %898 = vector.load %arg2[%c2240, %c0_214] : memref<2368x128xbf16, #tpu.memory_space<vmem>>, vector<128x128xbf16>
    %899 = arith.truncf %897 : vector<8x128xf32> to vector<8x128xbf16>
    %cst_215 = arith.constant dense<0.000000e+00> : vector<8x128xf32>
    %900 = tpu.matmul %899, %898, %cst_215 {dimension_numbers = #tpu.dot_dimension_numbers<[1], [0], [0], [1], [0, 0, 1, 1], [], []>} : vector<8x128xbf16>, vector<128x128xbf16>, vector<8x128xf32> -> vector<8x128xf32>
    %c46 = arith.constant 46 : index
    %c0_216 = arith.constant 0 : index
    %901 = vector.load %arg1[%c46, %c0_216] : memref<48x128xf32, #tpu.memory_space<vmem>>, vector<1x128xf32>
    %902 = vector.broadcast %901 : vector<1x128xf32> to vector<8x128xf32>
    %903 = arith.addf %900, %902 : vector<8x128xf32>
    %cst_217 = arith.constant dense<0xFF800000> : vector<8xf32>
    %904 = vector.multi_reduction <maximumf>, %903, %cst_217 [1] : vector<8x128xf32> to vector<8xf32>
    %905 = vector.shape_cast %904 : vector<8xf32> to vector<8x1xf32>
    %906 = vector.broadcast %905 : vector<8x1xf32> to vector<8x128xf32>
    %907 = arith.subf %903, %906 : vector<8x128xf32>
    %908 = math.exp %907 : vector<8x128xf32>
    %cst_218 = arith.constant dense<0.000000e+00> : vector<8xf32>
    %909 = vector.multi_reduction <add>, %908, %cst_218 [1] : vector<8x128xf32> to vector<8xf32>
    %910 = vector.shape_cast %909 : vector<8xf32> to vector<8x1xf32>
    %911 = math.log %910 : vector<8x1xf32>
    %912 = arith.addf %911, %905 : vector<8x1xf32>
    %c0_219 = arith.constant 0 : index
    %c18_220 = arith.constant 18 : index
    %c0_221 = arith.constant 0 : index
    %913 = vector.load %arg3[%c0_219, %c18_220, %c0_221] : memref<1x32x128xf32, #tpu.memory_space<vmem>>, vector<1x8x128xf32>
    %914 = vector.shape_cast %913 : vector<1x8x128xf32> to vector<8x128xf32>
    %915 = arith.mulf %903, %914 : vector<8x128xf32>
    %cst_222 = arith.constant dense<0.000000e+00> : vector<8xf32>
    %916 = vector.multi_reduction <add>, %915, %cst_222 [1] : vector<8x128xf32> to vector<8xf32>
    %917 = vector.shape_cast %916 : vector<8xf32> to vector<8x1xf32>
    %918 = tpu.iota {dimensions = array<i32: 0>} : vector<8x1xi32>
    %c7_i32 = arith.constant 7 : i32
    %919 = vector.broadcast %c7_i32 : i32 to vector<8x1xi32>
    %920 = arith.cmpi slt, %918, %919 : vector<8x1xi32>
    %cst_223 = arith.constant 1.000000e+00 : f32
    %cst_224 = arith.constant 0.000000e+00 : f32
    %921 = vector.broadcast %cst_223 : f32 to vector<8x1xf32>
    %922 = vector.broadcast %cst_224 : f32 to vector<8x1xf32>
    %923 = arith.select %920, %921, %922 : vector<8x1xi1>, vector<8x1xf32>
    %924 = arith.subf %912, %917 : vector<8x1xf32>
    %925 = arith.mulf %924, %923 : vector<8x1xf32>
    %926 = vector.shape_cast %925 : vector<8x1xf32> to vector<1x8x1xf32>
    %cst_225 = arith.constant dense<0.000000e+00> : vector<1xf32>
    %927 = vector.multi_reduction <add>, %926, %cst_225 [1, 2] : vector<1x8x1xf32> to vector<1xf32>
    %928 = vector.shape_cast %927 : vector<1xf32> to vector<1x1x1xf32>
    %929 = vector.extract %928[0, 0, 0] : f32 from vector<1x1x1xf32>
    %930 = vector.broadcast %929 : f32 to vector<1x128xf32>
    %c0_226 = arith.constant 0 : index
    %c0_227 = arith.constant 0 : index
    %c0_228 = arith.constant 0 : index
    %931 = vector.load %arg4[%c0_226, %c0_227, %c0_228] : memref<1x1x128xf32, #tpu.memory_space<vmem>>, vector<1x1x128xf32>
    %932 = vector.shape_cast %931 : vector<1x1x128xf32> to vector<1x128xf32>
    %933 = vector.shape_cast %930 : vector<1x128xf32> to vector<1x1x128xf32>
    tpu.vector_store %arg4[%c0_226, %c0_227, %c0_228], %933 {strides = array<i32>} : memref<1x1x128xf32, #tpu.memory_space<vmem>>, vector<1x1x128xf32>,
    return
  }
  func.func @transform_0(%arg0: i32) -> (i32, i32) {
    %c0_i32 = arith.constant 0 : i32
    %c0_i32_0 = arith.constant 0 : i32
    %c0_i32_1 = arith.constant 0 : i32
    return %c0_i32, %c0_i32_0 : i32, i32
  }
  func.func @transform_1(%arg0: i32) -> (i32, i32) {
    %c0_i32 = arith.constant 0 : i32
    %c0_i32_0 = arith.constant 0 : i32
    %c0_i32_1 = arith.constant 0 : i32
    return %c0_i32, %c0_i32_0 : i32, i32
  }
  func.func @transform_2(%arg0: i32) -> (i32, i32, i32) {
    %c0_i32 = arith.constant 0 : i32
    %c0_i32_0 = arith.constant 0 : i32
    %c0_i32_1 = arith.constant 0 : i32
    return %arg0, %c0_i32, %c0_i32_0 : i32, i32, i32
  }
  func.func @transform_3(%arg0: i32) -> (i32, i32, i32) {
    %c0_i32 = arith.constant 0 : i32
    %c0_i32_0 = arith.constant 0 : i32
    %c0_i32_1 = arith.constant 0 : i32
    return %arg0, %c0_i32, %c0_i32_0 : i32, i32, i32
  }
}

</mosaic_0001>

<bundles_post_ra>
// kernel: forward.1
= control target key start
LH: loop header
LB: loop body
LE: loop exit
PB: predicated region body
PF: predicated region fallthrough
CT: control target
= control target key end

     0   :  { %s7251_s12 = smov 0   ;;  %s8638_s0 = inlined_call_operand.vmem [shape: f32[48,128], index: 0, kind: input, shape index: {}]   ;;  %s8639_s1 = inlined_call_operand.vmem [shape: bf16[2368,128], index: 1, kind: input, shape index: {}]   ;;  %s8640_s2 = inlined_call_operand.vmem [shape: f32[2,32,128], index: 2, kind: input, shape index: {}]   ;;  %s8641_s3 = inlined_call_operand.vmem [shape: f32[2,1,128], index: 3, kind: output, shape index: {}]  }
   0x1 LB: > { %s5733_s13 = sadd.s32 4294967295, %s7218_s12   ;;  %p5737_p0 = scmp.ge.s32.totalorder %s7218_s12, 1  ;;  %s7218_s12 = sphi %s7251_s12, %s13_s12  }
   0x2   : > { %p137_p1 = scmp.lt.s32.totalorder %s7218_s12, 3 }
   0x4   : > { %p138_p2 = pnand %p5737_p0, %p137_p1 }
   0x5   : > { %p159_p3 = scmp.lt.s32.totalorder (!%p138_p2), %s5733_s13, 1  ;;  %v7220_v0 = vmov (!%p138_p2), 0.0   ;;  %v6932_v3 = vld [vmem:[%s8639_s1] sm:$0xff] (!%p138_p2)   ;;  %v6933_v4 = vld [vmem:[%s8639_s1 + $0x8] sm:$0xff] (!%p138_p2)   ;;  %v6934_v5 = vld [vmem:[%s8639_s1 + $0x10] sm:$0xff] (!%p138_p2)   ;;  %vm7221_vm0 = vmmov (!%p138_p2), 0   ;;  %v172_v18 = vlaneseq (!%p138_p2) }
   0x6   : > { %141 = sbr.rel (%p138_p2) target bundleno = 12917 (0x3275), region = 32  ;;  %6235 = vmatprep.subr.bf16.mxu0 (!%p138_p2), %v7220_v0  ;;  %6255 = vmatprep.subr.bf16.mxu1 (!%p138_p2), %v7220_v0  ;;  %v6935_v6 = vld [vmem:[%s8639_s1 + $0x18] sm:$0xff] (!%p138_p2)   ;;  %v6936_v7 = vld [vmem:[%s8639_s1 + $0x20] sm:$0xff] (!%p138_p2)   ;;  %v6937_v8 = vld [vmem:[%s8639_s1 + $0x28] sm:$0xff] (!%p138_p2)   ;;  %s7222_s11 = smov (!%p138_p2), 104   ;;  %vm343_vm1 = vcmask (!%p138_p2), 64512  }
   0x7   : > { %6236 = vmatpush3.bf16.msra.mxu0 (!%p138_p2), %v6932_v3  ;;  %6251 = vmatprep.mubr.msk.bf16.mxu0 (!%p138_p2), %vm7221_vm0, %v7220_v0  ;;  %v6938_v9 = vld [vmem:[%s8639_s1 + $0x30] sm:$0xff] (!%p138_p2)   ;;  %v6939_v10 = vld [vmem:[%s8639_s1 + $0x38] sm:$0xff] (!%p138_p2)   ;;  %v7307_v20 = vshrl.u32 (!%p138_p2), %v172_v18, 7  ;;  %v186_v22 = vld [vmem:[%s8638_s0] sm:$0x3] (!%p138_p2)  ;;  %s7224_s15 = smov (!%p138_p2), 112  }
   0x8   : > { %6237 = vmatprep.subr.bf16.mxu0 (!%p138_p2), %v7220_v0  ;;  %6257 = vmatprep.mubr.msk.bf16.mxu1 (!%p138_p2), %vm7221_vm0, %v7220_v0  ;;  %v5740_v32 = vld [vmem:[%s8638_s0 + $0x4] ss:$0 sm:$0xff] (!%p138_p2)  ;;  %s7225_s16 = smov (!%p138_p2), 96   ;;  %s7226_s18 = smov (!%p138_p2), 64   ;;  %vm602_vm2 = vcmask (!%p138_p2), 1043456   ;;  %vm803_vm3 = vcmask (!%p138_p2), 130048  }
   0x9   : > { %v7310_v21 = vsub.s32 (!%p138_p2), 0, %v7307_v20  ;;  %v7316_v23 = vsub.s32 (!%p138_p2), 1, %v7307_v20  ;;  %s7227_s21 = smov (!%p138_p2), 8   ;;  %s7228_s24 = smov (!%p138_p2), 16   ;;  %vm805_vm4 = vcmask (!%p138_p2), 195584   ;;  %vm824_vm5 = vcmask (!%p138_p2), 261120  }
   0xa   : > { %s7229_s25 = smov (!%p138_p2), 24   ;;  %vm5669_vm7 = vcmp.lt.s32.totalorder (!%p138_p2), %v7307_v20, 7  ;;  %vm5673_vm8 = vcmask (!%p138_p2), 7168  }
   0xb   : > { %6238 = vmatpush3.bf16.msra.mxu0 (!%p138_p2), %v6933_v4  ;;  %v204_v25 = vrot.slane (!%p138_p2), %v186_v22, %v7310_v21  ;;  %v209_v28 = vrot.slane (!%p138_p2), %v186_v22, %v7316_v23 }
   0xc   : > { %6239 = vmatprep.subr.bf16.mxu0 (!%p138_p2), %v7220_v0 }
   0xd   : > { %s8643_s13 = smov (!%p159_p3, %s5733_s13), 1 }
   0xe   : > { %s5967_s14 = sshll.u32 %s8643_s13, 5  ;;  %s166_s19 = scalar_lea.vmem %s8641_s3, %s8643_s13 }
   0xf   : > { %s7267_s17 = scalar_lea.vmem %s8640_s2, %s5967_s14  ;;  %6240 = vmatpush3.bf16.msra.mxu0 %v6934_v5  ;;  %s7223_s14 = smov 120  }
  0x10   : > { %v185_v1 = vld [vmem:[%s7267_s17] sm:$0xff]  ;;  %6241 = vmatprep.subr.bf16.mxu0 %v7220_v0  ;;  %v168_v53 = vld [vmem:[%s7267_s17 + $0x10] sm:$0x1] }
  0x11   : > { %187 = vadd.xlane.f32.xlu0 %v185_v1  ;;  %v190_v2 = vmul.f32 %v185_v1, %v185_v1  ;;  %v169_v54 = vsub.f32 1.0, %v168_v53 }
  0x13   : > { %6242 = vmatpush3.bf16.msra.mxu0 %v6935_v6  ;;  %v170_v55 = vmul.f32 -1e+09, %v169_v54 }
  0x14   : > { %6243 = vmatprep.subr.bf16.mxu0 %v7220_v0 }
  0x15   : > { %191 = vadd.xlane.f32.xlu0 %v190_v2  ;;  %v7374_v56 = vrot.slane %v170_v55, %v7310_v21 }
  0x17   : > { %6244 = vmatpush3.bf16.msra.mxu0 %v6936_v7 }
  0x18   : > { %6245 = vmatprep.subr.bf16.mxu0 %v7220_v0 }
  0x1b   : > { %6246 = vmatpush3.bf16.msra.mxu0 %v6937_v8 }
  0x1c   : > { %6247 = vmatprep.subr.bf16.mxu0 %v7220_v0 }
  0x1f   : > { %6248 = vmatpush3.bf16.msra.mxu0 %v6938_v9 }
  0x20   : > { %6249 = vmatprep.subr.bf16.mxu0 %v7220_v0 }
  0x23   : > { %6250 = vmatpush3.bf16.msra.mxu0 %v6939_v10 }
  0x24   : > { %6303 = vmatprep.subr.bf16.mxu0 %v7220_v0 }
  0x9e   : > { %v188_v11 = vpop.xlane.xlu0 %187 }
  0x9f   : > { %v189_v12 = vmul.f32 0.03125, %v188_v11 }
  0xa1   : > { %v194_v14 = vmul.f32 %v189_v12, %v189_v12  ;;  %v199_v24 = vsub.f32 %v185_v1, %v189_v12 }
  0xa2   : > { %v192_v13 = vpop.xlane.xlu0 %191 }
  0xa3   : > { %v193_v15 = vmul.f32 0.03125, %v192_v13 }
  0xa5   : > { %v195_v16 = vsub.f32 %v193_v15, %v194_v14 }
  0xa7   : > { %v196_v17 = vmax.f32 %v195_v16, 0.0 }
  0xa9   : > { %v197_v19 = vadd.f32 1e-12, %v196_v17 }
  0xab   : > { %7080 = vrsqrt.f32 %v197_v19 }
  0xb5   : > { %v7081_v26 = vpop.eup %7080 }
  0xb6   : > { %v200_v27 = vmul.f32 %v7081_v26, %v199_v24 }
  0xb8   : > { %v205_v29 = vmul.f32 %v204_v25, %v200_v27 }
  0xba   : > { %v7320_v30 = vadd.f32 %v209_v28, %v205_v29 }
  0xbc   : > { %v227_v31 = vpack.c.bf16 %v7320_v30, %v7320_v30 }
  0xbe   : > { %6252 = vmatmul.mubr.bf16.vlgmr.msra.gmra.mrb[0].mxu0 %v227_v31 }
  0xbf   : > { %6307 = vmatprep.mubr.msk.bf16.mxu0 %vm7221_vm0, %v7220_v0 }
 0x191   : > { %v315_v33 = vpop.f32.mrb[0].mxu0 }
 0x192   : > { %v316_v34 = vadd.f32 %v5740_v32, %v315_v33  ;;  %v6253_v35 = vpop.f32.mrb[1].mxu0 }
 0x193   : > { %v318_v36 = vpop.f32.mrb[2].mxu0 }
 0x194   : > { %333 = vrot.lane.b32.xlu0 %v316_v34, %s7222_s11  ;;  %327 = vrot.lane.b32.xlu1 %v316_v34, %s7223_s14  ;;  %v6254_v37 = vpop.f32.mrb[3].mxu0  ;;  %v7332_v38 = vpack.c.bf16 %v316_v34, %v316_v34 }
 0x198   : > { %330 = vrot.lane.b32.xlu1 %v316_v34, %s7224_s15 }
 0x19c   : > { %341 = vrot.lane.b32.xlu1 %v7332_v38, %s7225_s16 }
 0x206   : > { %v328_v39 = vpop.permute.xlu1 %327  ;;  %v334_v43 = vpop.permute.xlu0 %333 }
 0x207   : > { %v7336_v40 = vpack.c.bf16 %v328_v39, %v328_v39  ;;  %v7344_v45 = vpack.c.bf16 %v334_v43, %v334_v43 }
 0x209   : > { %391 = vrot.lane.b32.xlu1 %v7336_v40, %s7225_s16 }
 0x20a   : > { %v331_v41 = vpop.permute.xlu1 %330 }
 0x20b   : > { %v7340_v42 = vpack.c.bf16 %v331_v41, %v331_v41 }
 0x20d   : > { %440 = vrot.lane.b32.xlu1 %v7340_v42, %s7225_s16 }
 0x20e   : > { %v342_v44 = vpop.permute.xlu1 %341 }
 0x20f   : > { %v348_v46 = vsel %vm343_vm1, %v342_v44, 0 }
 0x210   : > { %6256 = vmatpush3.bf16.xpose.msra.mxu1 %v348_v46 }
 0x211   : > { %489 = vrot.lane.b32.xlu1 %v7344_v45, %s7225_s16  ;;  %6261 = vmatprep.subr.bf16.mxu1 %v7220_v0 }
 0x217   : > { %6258 = vmatmul.mubr.msk.bf16.vlgmr.msra.gmra.mrb[0].mxu1 %vm343_vm1, %v7332_v38 }
 0x218   : > { %6263 = vmatprep.mubr.msk.bf16.mxu1 %vm7221_vm0, %v7220_v0 }
 0x27b   : > { %v392_v47 = vpop.permute.xlu1 %391 }
 0x27c   : > { %v397_v48 = vsel %vm343_vm1, %v392_v47, 0 }
 0x27d   : > { %6262 = vmatpush3.bf16.xpose.msra.mxu1 %v397_v48 }
 0x27e   : > { %6267 = vmatprep.subr.bf16.mxu1 %v7220_v0 }
 0x27f   : > { %v441_v49 = vpop.permute.xlu1 %440 }
 0x280   : > { %v446_v50 = vsel %vm343_vm1, %v441_v49, 0 }
 0x283   : > { %v490_v51 = vpop.permute.xlu1 %489 }
 0x284   : > { %6264 = vmatmul.mubr.msk.bf16.vlgmr.msra.gmra.mrb[4].mxu1 %vm343_vm1, %v7336_v40  ;;  %v495_v52 = vsel %vm343_vm1, %v490_v51, 0 }
 0x285   : > { %6268 = vmatpush3.bf16.xpose.msra.mxu1 %v446_v50  ;;  %6269 = vmatprep.mubr.msk.bf16.mxu1 %vm7221_vm0, %v7220_v0 }
 0x286   : > { %6273 = vmatprep.subr.bf16.mxu1 %v7220_v0 }
 0x28c   : > { %6270 = vmatmul.mubr.msk.bf16.vlgmr.msra.gmra.mrb[8].mxu1 %vm343_vm1, %v7340_v42 }
 0x28d   : > { %6274 = vmatpush3.bf16.xpose.msra.mxu1 %v495_v52  ;;  %6275 = vmatprep.mubr.msk.bf16.mxu1 %vm7221_vm0, %v7220_v0 }
 0x28e   : > { %6279 = vmatprep.subr.bf16.mxu1 %v7220_v0 }
 0x294   : > { %6276 = vmatmul.mubr.msk.bf16.vlgmr.msra.gmra.mrb[12].mxu1 %vm343_vm1, %v7344_v45 }
 0x295   : > { %6281 = vmatprep.mubr.msk.bf16.mxu1 %vm7221_vm0, %v7220_v0 }
 0x2ea   : > { %v384_v57 = vpop.f32.mrb[0].mxu1 }
 0x2eb   : > { %v537_v58 = vmul.f32 0.35355338, %v384_v57  ;;  %v6259_v59 = vpop.f32.mrb[1].mxu1 }
 0x2ec   : > { %v387_v60 = vpop.f32.mrb[2].mxu1 }
 0x2ed   : > { %v6260_v61 = vpop.f32.mrb[3].mxu1  ;;  %v545_v62 = vadd.f32 %v7374_v56, %v537_v58 }
 0x2ef   : > { %v549_v63 = vsel %vm343_vm1, %v545_v62, -inf }
 0x2f0   : > { %550 = vmax.xlane.f32.xlu1 %v549_v63 }
 0x357   : > { %v433_v1 = vpop.f32.mrb[4].mxu1 }
 0x358   : > { %v538_v2 = vmul.f32 0.35355338, %v433_v1  ;;  %v6265_v3 = vpop.f32.mrb[5].mxu1 }
 0x359   : > { %v436_v4 = vpop.f32.mrb[6].mxu1 }
 0x35a   : > { %v6266_v5 = vpop.f32.mrb[7].mxu1  ;;  %v546_v6 = vadd.f32 %v7374_v56, %v538_v2 }
 0x35c   : > { %v552_v7 = vsel %vm343_vm1, %v546_v6, -inf }
 0x35d   : > { %553 = vmax.xlane.f32.xlu0 %v552_v7 }
 0x35f   : > { %v482_v8 = vpop.f32.mrb[8].mxu1 }
 0x360   : > { %v539_v9 = vmul.f32 0.35355338, %v482_v8  ;;  %v6271_v10 = vpop.f32.mrb[9].mxu1 }
 0x361   : > { %v485_v11 = vpop.f32.mrb[10].mxu1 }
 0x362   : > { %v6272_v12 = vpop.f32.mrb[11].mxu1  ;;  %v547_v13 = vadd.f32 %v7374_v56, %v539_v9 }
 0x364   : > { %v555_v14 = vsel %vm343_vm1, %v547_v13, -inf }
 0x365   : > { %556 = vmax.xlane.f32.xlu1 %v555_v14 }
 0x367   : > { %v531_v15 = vpop.f32.mrb[12].mxu1 }
 0x368   : > { %v540_v16 = vmul.f32 0.35355338, %v531_v15  ;;  %v6277_v17 = vpop.f32.mrb[13].mxu1 }
 0x369   : > { %v534_v19 = vpop.f32.mrb[14].mxu1 }
 0x36a   : > { %v6278_v22 = vpop.f32.mrb[15].mxu1  ;;  %v548_v24 = vadd.f32 %v7374_v56, %v540_v16  ;;  %v6941_v19 = vld [vmem:[%s8639_s1 + $0x48] sm:$0xff]  }
 0x36c   : > { %v558_v25 = vsel %vm343_vm1, %v548_v24, -inf }
 0x36d   : > { %559 = vmax.xlane.f32.xlu0 %v558_v25 }
 0x37d   : > { %v551_v26 = vpop.xlane.xlu1 %550 }
 0x37e   : > { %v561_v27 = vsub.f32 %v545_v62, %v551_v26 }
 0x380   : > { %v565_v28 = vmul.f32 1.442695, %v561_v27 }
 0x382   : > { %7082 = vpow2.f32 %v565_v28 }
 0x38c   : > { %v7083_v29 = vpop.eup %7082 }
 0x38d   : > { %v573_v31 = vsel %vm343_vm1, %v7083_v29, 0.0 }
 0x38e   : > { %574 = vadd.xlane.f32.xlu1 %v573_v31 }
 0x39f   : > { %597 = vrot.lane.b32.xlu1 %v7332_v38, %s7226_s18 }
 0x3ea   : > { %v554_v32 = vpop.xlane.xlu0 %553 }
 0x3eb   : > { %v562_v33 = vsub.f32 %v546_v6, %v554_v32 }
 0x3ed   : > { %v567_v34 = vmul.f32 1.442695, %v562_v33 }
 0x3ef   : > { %7084 = vpow2.f32 %v567_v34 }
 0x3f2   : > { %v557_v35 = vpop.xlane.xlu1 %556 }
 0x3f3   : > { %v563_v36 = vsub.f32 %v547_v13, %v557_v35  ;;  %v6940_v13 = vld [vmem:[%s8639_s1 + $0x40] sm:$0xff]  }
 0x3f4   : > { %6304 = vmatpush3.bf16.msra.mxu0 %v6940_v13  ;;  %v6954_v13 = vld [vmem:[%s8639_s1 + $0xb0] sm:$0xff]  }
 0x3f5   : > { %v569_v37 = vmul.f32 1.442695, %v563_v36  ;;  %6305 = vmatprep.subr.bf16.mxu0 %v7220_v0 }
 0x3f7   : > { %7086 = vpow2.f32 %v569_v37 }
 0x3f8   : > { %6306 = vmatpush3.bf16.msra.mxu0 %v6941_v19 }
 0x3f9   : > { %v7085_v39 = vpop.eup %7084  ;;  %6331 = vmatprep.subr.bf16.mxu0 %v7220_v0 }
 0x3fa   : > { %v560_v41 = vpop.xlane.xlu0 %559  ;;  %v576_v43 = vsel %vm343_vm1, %v7085_v39, 0.0 }
 0x3fb   : > { %v564_v44 = vsub.f32 %v548_v24, %v560_v41  ;;  %577 = vadd.xlane.f32.xlu0 %v576_v43  ;;  %v6942_v41 = vld [vmem:[%s8639_s1 + $0x50] sm:$0xff]   ;;  %v5757_v43 = vld [vmem:[%s8638_s0 + $0x5] ss:$0 sm:$0xff] }
 0x3fd   : > { %v571_v46 = vmul.f32 1.442695, %v564_v44 }
 0x3ff   : > { %7088 = vpow2.f32 %v571_v46 }
 0x401   : > { %v7087_v47 = vpop.eup %7086 }
 0x402   : > { %v579_v48 = vsel %vm343_vm1, %v7087_v47, 0.0 }
 0x403   : > { %580 = vadd.xlane.f32.xlu1 %v579_v48 }
 0x409   : > { %v7089_v38 = vpop.eup %7088 }
 0x40a   : > { %v582_v49 = vsel %vm343_vm1, %v7089_v38, 0.0 }
 0x40b   : > { %583 = vadd.xlane.f32.xlu0 %v582_v49 }
 0x414   : > { %694 = vrot.lane.b32.xlu1 %v7340_v42, %s7226_s18 }
 0x418   : > { %742 = vrot.lane.b32.xlu1 %v7344_v45, %s7226_s18 }
 0x41b   : > { %v575_v50 = vpop.xlane.xlu1 %574 }
 0x41c   : > { %7090 = vrcp.f32 %v575_v50 }
 0x41f   : > { %v598_v51 = vpop.permute.xlu1 %597 }
 0x420   : > { %v604_v52 = vsel %vm602_vm2, %v598_v51, 0  ;;  %v6943_v51 = vld [vmem:[%s8639_s1 + $0x58] sm:$0xff]  }
 0x421   : > { %646 = vrot.lane.b32.xlu0 %v7336_v40, %s7226_s18  ;;  %6280 = vmatpush3.bf16.msra.mxu1 %v604_v52  ;;  %v6944_v52 = vld [vmem:[%s8639_s1 + $0x60] sm:$0xff]  }
 0x422   : > { %6285 = vmatprep.subr.bf16.mxu1 %v7220_v0 }
 0x426   : > { %v7091_v53 = vpop.eup %7090 }
 0x427   : > { %v586_v54 = vmul.f32 %v7091_v53, %v7083_v29  ;;  %v6946_v53 = vld [vmem:[%s8639_s1 + $0x70] sm:$0xff]  }
 0x429   : > { %v593_v55 = vpack.c.bf16 %v586_v54, %v586_v54  ;;  %v6947_v54 = vld [vmem:[%s8639_s1 + $0x78] sm:$0xff]  }
 0x42b   : > { %6282 = vmatmul.mubr.msk.bf16.vlgmr.msra.gmra.mrb[16].mxu1 %vm343_vm1, %v593_v55  ;;  %v6948_v55 = vld [vmem:[%s8639_s1 + $0x80] sm:$0xff]  }
 0x42c   : > { %6287 = vmatprep.mubr.msk.bf16.mxu1 %vm7221_vm0, %v7220_v0 }
 0x488   : > { %v578_v42 = vpop.xlane.xlu0 %577 }
 0x489   : > { %7092 = vrcp.f32 %v578_v42  ;;  %v6949_v42 = vld [vmem:[%s8639_s1 + $0x88] sm:$0xff]  }
 0x490   : > { %v581_v45 = vpop.xlane.xlu1 %580 }
 0x491   : > { %7094 = vrcp.f32 %v581_v45 }
 0x493   : > { %v7093_v57 = vpop.eup %7092 }
 0x494   : > { %v588_v59 = vmul.f32 %v7093_v57, %v7085_v39  ;;  %v695_v61 = vpop.permute.xlu1 %694 }
 0x495   : > { %v700_v1 = vsel %vm602_vm2, %v695_v61, 0 }
 0x496   : > { %v594_v62 = vpack.c.bf16 %v588_v59, %v588_v59 }
 0x498   : > { %v584_v58 = vpop.xlane.xlu0 %583  ;;  %v743_v3 = vpop.permute.xlu1 %742 }
 0x499   : > { %7096 = vrcp.f32 %v584_v58  ;;  %v748_v6 = vsel %vm602_vm2, %v743_v3, 0 }
 0x49b   : > { %v7095_v63 = vpop.eup %7094 }
 0x49c   : > { %v647_v60 = vpop.permute.xlu0 %646  ;;  %v590_v2 = vmul.f32 %v7095_v63, %v7087_v47  ;;  %v869_v63 = vld [vmem:[%s8638_s0 + $0x6] sm:$0x3] }
 0x49d   : > { %v652_v40 = vsel %vm602_vm2, %v647_v60, 0 }
 0x49e   : > { %6286 = vmatpush3.bf16.msra.mxu1 %v652_v40  ;;  %v595_v4 = vpack.c.bf16 %v590_v2, %v590_v2  ;;  %v887_v2 = vrot.slane %v869_v63, %v7310_v21 }
 0x49f   : > { %6291 = vmatprep.subr.bf16.mxu1 %v7220_v0 }
 0x4a1   : > { %6288 = vmatmul.mubr.msk.bf16.vlgmr.msra.gmra.mrb[20].mxu1 %vm343_vm1, %v594_v62 }
 0x4a2   : > { %6292 = vmatpush3.bf16.msra.mxu1 %v700_v1  ;;  %6293 = vmatprep.mubr.msk.bf16.mxu1 %vm7221_vm0, %v7220_v0 }
 0x4a3   : > { %6297 = vmatprep.subr.bf16.mxu1 %v7220_v0  ;;  %v7097_v5 = vpop.eup %7096 }
 0x4a4   : > { %v592_v7 = vmul.f32 %v7097_v5, %v7089_v38  ;;  %v892_v5 = vrot.slane %v869_v63, %v7316_v23 }
 0x4a6   : > { %v596_v8 = vpack.c.bf16 %v592_v7, %v592_v7 }
 0x4a9   : > { %6294 = vmatmul.mubr.msk.bf16.vlgmr.msra.gmra.mrb[24].mxu1 %vm343_vm1, %v595_v4 }
 0x4aa   : > { %6298 = vmatpush3.bf16.msra.mxu1 %v748_v6  ;;  %6299 = vmatprep.mubr.msk.bf16.mxu1 %vm7221_vm0, %v7220_v0 }
 0x4ab   : > { %6311 = vmatprep.subr.bf16.mxu1 %v7220_v0 }
 0x4b1   : > { %6300 = vmatmul.mubr.msk.bf16.vlgmr.msra.gmra.mrb[28].mxu1 %vm343_vm1, %v596_v8 }
 0x4b2   : > { %6327 = vmatprep.mubr.msk.bf16.mxu1 %vm7221_vm0, %v7220_v0  ;;  %6312 = vmatpush3.bf16.msra.mxu1 %v6942_v41 }
 0x4b3   : > { %6313 = vmatprep.subr.bf16.mxu1 %v7220_v0 }
 0x4b6   : > { %6314 = vmatpush3.bf16.msra.mxu1 %v6943_v51  ;;  %v6960_v51 = vld [vmem:[%s8639_s1 + $0xe0] sm:$0xff]  }
 0x4b7   : > { %6315 = vmatprep.subr.bf16.mxu1 %v7220_v0 }
 0x4ba   : > { %6316 = vmatpush3.bf16.msra.mxu1 %v6944_v52  ;;  %v6961_v52 = vld [vmem:[%s8639_s1 + $0xe8] sm:$0xff]  }
 0x4bb   : > { %6317 = vmatprep.subr.bf16.mxu1 %v7220_v0 }
 0x4fe   : > { %v640_v9 = vpop.f32.mrb[16].mxu1 }
 0x4ff   : > { %v6283_v10 = vpop.f32.mrb[17].mxu1 }
 0x500   : > { %v643_v11 = vpop.f32.mrb[18].mxu1  ;;  %v6951_v10 = vld [vmem:[%s8639_s1 + $0x98] sm:$0xff]  }
 0x501   : > { %v6284_v12 = vpop.f32.mrb[19].mxu1  ;;  %v6952_v11 = vld [vmem:[%s8639_s1 + $0xa0] sm:$0xff]  }
 0x502   : > { %v6953_v12 = vld [vmem:[%s8639_s1 + $0xa8] sm:$0xff]  }
 0x574   : > { %v688_v14 = vpop.f32.mrb[20].mxu1 }
 0x575   : > { %791 = vrot.lane.b32.xlu0 %v688_v14, %s7227_s21  ;;  %v6289_v15 = vpop.f32.mrb[21].mxu1  ;;  %v6955_v14 = vld [vmem:[%s8639_s1 + $0xb8] sm:$0xff]  }
 0x576   : > { %v691_v16 = vpop.f32.mrb[22].mxu1  ;;  %v6956_v15 = vld [vmem:[%s8639_s1 + $0xc0] sm:$0xff]  }
 0x577   : > { %v6290_v17 = vpop.f32.mrb[23].mxu1  ;;  %v6957_v16 = vld [vmem:[%s8639_s1 + $0xc8] sm:$0xff]  }
 0x578   : > { %v5761_v17 = vld [vmem:[%s8638_s0 + $0x8] ss:$0 sm:$0xff] }
 0x57c   : > { %v736_v22 = vpop.f32.mrb[24].mxu1 }
 0x57d   : > { %795 = vrot.lane.b32.xlu1 %v736_v22, %s7228_s24  ;;  %v6295_v24 = vpop.f32.mrb[25].mxu1 }
 0x57e   : > { %v739_v25 = vpop.f32.mrb[26].mxu1 }
 0x57f   : > { %v6296_v26 = vpop.f32.mrb[27].mxu1 }
 0x584   : > { %v784_v27 = vpop.f32.mrb[28].mxu1 }
 0x585   : > { %799 = vrot.lane.b32.xlu0 %v784_v27, %s7229_s25  ;;  %v6301_v28 = vpop.f32.mrb[29].mxu1 }
 0x586   : > { %v787_v29 = vpop.f32.mrb[30].mxu1 }
 0x587   : > { %v6302_v31 = vpop.f32.mrb[31].mxu1 }
 0x5e7   : > { %v792_v32 = vpop.permute.xlu0 %791 }
 0x5e8   : > { %v802_v34 = vsel %vm343_vm1, %v640_v9, %v792_v32  ;;  %v6950_v9 = vld [vmem:[%s8639_s1 + $0x90] sm:$0xff]  }
 0x5ef   : > { %v796_v33 = vpop.permute.xlu1 %795 }
 0x5f0   : > { %v804_v35 = vsel %vm803_vm3, %v802_v34, %v796_v33 }
 0x5f7   : > { %v800_v36 = vpop.permute.xlu0 %799 }
 0x5f8   : > { %v806_v37 = vsel %vm805_vm4, %v804_v35, %v800_v36 }
 0x5f9   : > { %v807_v39 = vpack.c.bf16 %v806_v37, %v806_v37 }
 0x5fb   : > { %6308 = vmatmul.mubr.msk.bf16.vlgmr.msra.gmra.mrb[4].mxu0 %vm824_vm5, %v807_v39  ;;  %v6958_v39 = vld [vmem:[%s8639_s1 + $0xd0] sm:$0xff]  }
 0x5fc   : > { %6347 = vmatprep.mubr.msk.bf16.mxu0 %vm7221_vm0, %v7220_v0  ;;  %6332 = vmatpush3.bf16.msra.mxu0 %v6950_v9 }
 0x5fd   : > { %6333 = vmatprep.subr.bf16.mxu0 %v7220_v0 }
 0x600   : > { %6334 = vmatpush3.bf16.msra.mxu0 %v6951_v10 }
 0x601   : > { %6335 = vmatprep.subr.bf16.mxu0 %v7220_v0 }
 0x604   : > { %6336 = vmatpush3.bf16.msra.mxu0 %v6952_v11 }
 0x605   : > { %6337 = vmatprep.subr.bf16.mxu0 %v7220_v0 }
 0x608   : > { %6338 = vmatpush3.bf16.msra.mxu0 %v6953_v12 }
 0x609   : > { %6339 = vmatprep.subr.bf16.mxu0 %v7220_v0 }
 0x60c   : > { %6340 = vmatpush3.bf16.msra.mxu0 %v6954_v13 }
 0x60d   : > { %6341 = vmatprep.subr.bf16.mxu0 %v7220_v0 }
 0x610   : > { %6342 = vmatpush3.bf16.msra.mxu0 %v6955_v14 }
 0x611   : > { %6343 = vmatprep.subr.bf16.mxu0 %v7220_v0 }
 0x614   : > { %6344 = vmatpush3.bf16.msra.mxu0 %v6956_v15 }
 0x615   : > { %6345 = vmatprep.subr.bf16.mxu0 %v7220_v0 }
 0x618   : > { %6346 = vmatpush3.bf16.msra.mxu0 %v6957_v16 }
 0x619   : > { %6371 = vmatprep.subr.bf16.mxu0 %v7220_v0 }
 0x6ce   : > { %v862_v44 = vpop.f32.mrb[4].mxu0 }
 0x6cf   : > { %v863_v46 = vadd.f32 %v5757_v43, %v862_v44  ;;  %v6309_v47 = vpop.f32.mrb[5].mxu0  ;;  %v5778_v43 = vld [vmem:[%s8638_s0 + $0x9] ss:$0 sm:$0xff] }
 0x6d0   : > { %v865_v48 = vpop.f32.mrb[6].mxu0 }
 0x6d1   : > { %v868_v38 = vadd.f32 %v863_v46, %v7320_v30  ;;  %v6310_v49 = vpop.f32.mrb[7].mxu0  ;;  %v6945_v30 = vld [vmem:[%s8639_s1 + $0x68] sm:$0xff]  }
 0x6d2   : > { %6318 = vmatpush3.bf16.msra.mxu1 %v6945_v30  ;;  %v6962_v30 = vld [vmem:[%s8639_s1 + $0xf0] sm:$0xff]  }
 0x6d3   : > { %870 = vadd.xlane.f32.xlu1 %v868_v38  ;;  %v873_v50 = vmul.f32 %v868_v38, %v868_v38  ;;  %6319 = vmatprep.subr.bf16.mxu1 %v7220_v0 }
 0x6d5   : > { %874 = vadd.xlane.f32.xlu0 %v873_v50  ;;  %v6959_v50 = vld [vmem:[%s8639_s1 + $0xd8] sm:$0xff]  }
 0x6d6   : > { %6320 = vmatpush3.bf16.msra.mxu1 %v6946_v53  ;;  %v6963_v53 = vld [vmem:[%s8639_s1 + $0xf8] sm:$0xff]  }
 0x6d7   : > { %6321 = vmatprep.subr.bf16.mxu1 %v7220_v0 }
 0x6da   : > { %6322 = vmatpush3.bf16.msra.mxu1 %v6947_v54  ;;  %v6964_v54 = vld [vmem:[%s8639_s1 + $0x100] sm:$0xff]  }
 0x6db   : > { %6323 = vmatprep.subr.bf16.mxu1 %v7220_v0 }
 0x6de   : > { %6324 = vmatpush3.bf16.msra.mxu1 %v6948_v55  ;;  %v6965_v55 = vld [vmem:[%s8639_s1 + $0x108] sm:$0xff]  }
 0x6df   : > { %6325 = vmatprep.subr.bf16.mxu1 %v7220_v0 }
 0x6e2   : > { %6326 = vmatpush3.bf16.msra.mxu1 %v6949_v42 }
 0x6e3   : > { %6351 = vmatprep.subr.bf16.mxu1 %v7220_v0 }
 0x760   : > { %v871_v45 = vpop.xlane.xlu1 %870 }
 0x761   : > { %v872_v57 = vmul.f32 0.03125, %v871_v45 }
 0x762   : > { %v875_v58 = vpop.xlane.xlu0 %874 }
 0x763   : > { %v877_v59 = vmul.f32 %v872_v57, %v872_v57  ;;  %v876_v60 = vmul.f32 0.03125, %v875_v58  ;;  %v882_v1 = vsub.f32 %v868_v38, %v872_v57 }
 0x765   : > { %v878_v40 = vsub.f32 %v876_v60, %v877_v59 }
 0x767   : > { %v879_v61 = vmax.f32 %v878_v40, 0.0 }
 0x769   : > { %v880_v62 = vadd.f32 1e-12, %v879_v61 }
 0x76b   : > { %7098 = vrsqrt.f32 %v880_v62  ;;  %v1125_v62 = vld [vmem:[%s8638_s0 + $0xa] sm:$0x3] }
 0x775   : > { %v7099_v3 = vpop.eup %7098 }
 0x776   : > { %v883_v4 = vmul.f32 %v7099_v3, %v882_v1  ;;  %v1143_v1 = vrot.slane %v1125_v62, %v7310_v21 }
 0x778   : > { %v888_v6 = vmul.f32 %v887_v2, %v883_v4  ;;  %v1148_v4 = vrot.slane %v1125_v62, %v7316_v23 }
 0x77a   : > { %v893_v7 = vadd.f32 %v892_v5, %v888_v6 }
 0x77c   : > { %v910_v8 = vpack.c.bf16 %v893_v7, %v893_v7 }
 0x77e   : > { %6328 = vmatmul.mubr.bf16.vlgmr.msra.gmra.mrb[32].mxu1 %v910_v8  ;;  %v5779_v8 = vld [vmem:[%s8638_s0 + $0xc] ss:$0 sm:$0xff] }
 0x77f   : > { %6367 = vmatprep.mubr.msk.bf16.mxu1 %vm7221_vm0, %v7220_v0  ;;  %6352 = vmatpush3.bf16.msra.mxu1 %v6958_v39 }
 0x780   : > { %6353 = vmatprep.subr.bf16.mxu1 %v7220_v0 }
 0x783   : > { %6354 = vmatpush3.bf16.msra.mxu1 %v6959_v50 }
 0x784   : > { %6355 = vmatprep.subr.bf16.mxu1 %v7220_v0 }
 0x787   : > { %6356 = vmatpush3.bf16.msra.mxu1 %v6960_v51 }
 0x788   : > { %6357 = vmatprep.subr.bf16.mxu1 %v7220_v0 }
 0x78b   : > { %6358 = vmatpush3.bf16.msra.mxu1 %v6961_v52 }
 0x78c   : > { %6359 = vmatprep.subr.bf16.mxu1 %v7220_v0 }
 0x78f   : > { %6360 = vmatpush3.bf16.msra.mxu1 %v6962_v30 }
 0x790   : > { %6361 = vmatprep.subr.bf16.mxu1 %v7220_v0 }
 0x793   : > { %6362 = vmatpush3.bf16.msra.mxu1 %v6963_v53 }
 0x794   : > { %6363 = vmatprep.subr.bf16.mxu1 %v7220_v0 }
 0x797   : > { %6364 = vmatpush3.bf16.msra.mxu1 %v6964_v54 }
 0x798   : > { %6365 = vmatprep.subr.bf16.mxu1 %v7220_v0 }
 0x79b   : > { %6366 = vmatpush3.bf16.msra.mxu1 %v6965_v55 }
 0x79c   : > { %6395 = vmatprep.subr.bf16.mxu1 %v7220_v0 }
 0x851   : > { %v998_v19 = vpop.f32.mrb[32].mxu1 }
 0x852   : > { %v999_v22 = vadd.f32 %v5761_v17, %v998_v19  ;;  %v6329_v24 = vpop.f32.mrb[33].mxu1 }
 0x853   : > { %v1001_v25 = vpop.f32.mrb[34].mxu1 }
 0x854   : > { %v1004_v26 = vmul.f32 %v999_v22, %v999_v22  ;;  %v6330_v27 = vpop.f32.mrb[35].mxu1 }
 0x856   : > { %v1005_v28 = vmul.f32 %v1004_v26, %v999_v22 }
 0x858   : > { %v1006_v29 = vmul.f32 0.044715, %v1005_v28 }
 0x85a   : > { %v1007_v31 = vadd.f32 %v1006_v29, %v999_v22 }
 0x85c   : > { %v1008_v32 = vmul.f32 0.7978846, %v1007_v31 }
 0x85e   : > { %7100 = vtanh.f32 %v1008_v32 }
 0x868   : > { %v7101_v33 = vpop.eup %7100 }
 0x869   : > { %v1010_v34 = vadd.f32 1.0, %v7101_v33 }
 0x86b   : > { %v1011_v35 = vmul.f32 0.5, %v1010_v34 }
 0x86d   : > { %v1012_v36 = vmul.f32 %v1011_v35, %v999_v22 }
 0x86f   : > { %v1029_v37 = vpack.c.bf16 %v1012_v36, %v1012_v36 }
 0x871   : > { %6348 = vmatmul.mubr.bf16.vlgmr.msra.gmra.mrb[8].mxu0 %v1029_v37 }
 0x872   : > { %6373 = vmatprep.mubr.msk.bf16.mxu0 %vm7221_vm0, %v7220_v0 }
 0x944   : > { %v1112_v41 = vpop.f32.mrb[8].mxu0 }
 0x945   : > { %v1118_v44 = vadd.f32 %v1112_v41, %v893_v7  ;;  %v6349_v46 = vpop.f32.mrb[9].mxu0 }
 0x946   : > { %v1115_v47 = vpop.f32.mrb[10].mxu0 }
 0x947   : > { %v1124_v48 = vadd.f32 %v5778_v43, %v1118_v44  ;;  %v6350_v38 = vpop.f32.mrb[11].mxu0 }
 0x949   : > { %1126 = vadd.xlane.f32.xlu0 %v1124_v48  ;;  %v1129_v49 = vmul.f32 %v1124_v48, %v1124_v48 }
 0x94b   : > { %1130 = vadd.xlane.f32.xlu1 %v1129_v49 }
 0x9d6   : > { %v1127_v42 = vpop.xlane.xlu0 %1126 }
 0x9d7   : > { %v1128_v45 = vmul.f32 0.03125, %v1127_v42 }
 0x9d8   : > { %v1131_v57 = vpop.xlane.xlu1 %1130 }
 0x9d9   : > { %v1133_v58 = vmul.f32 %v1128_v45, %v1128_v45  ;;  %v1132_v59 = vmul.f32 0.03125, %v1131_v57  ;;  %v1138_v63 = vsub.f32 %v1124_v48, %v1128_v45 }
 0x9db   : > { %v1134_v60 = vsub.f32 %v1132_v59, %v1133_v58 }
 0x9dd   : > { %v1135_v40 = vmax.f32 %v1134_v60, 0.0 }
 0x9df   : > { %v1136_v61 = vadd.f32 1e-12, %v1135_v40 }
 0x9e1   : > { %7102 = vrsqrt.f32 %v1136_v61 }
 0x9eb   : > { %v7103_v2 = vpop.eup %7102 }
 0x9ec   : > { %v1139_v3 = vmul.f32 %v7103_v2, %v1138_v63 }
 0x9ee   : > { %v1144_v5 = vmul.f32 %v1143_v1, %v1139_v3 }
 0x9f0   : > { %v7553_v6 = vadd.f32 %v1148_v4, %v1144_v5 }
 0x9f2   : > { %v1166_v7 = vpack.c.bf16 %v7553_v6, %v7553_v6 }
 0x9f4   : > { %6368 = vmatmul.mubr.bf16.vlgmr.msra.gmra.mrb[36].mxu1 %v1166_v7 }
 0x9f5   : > { %6397 = vmatprep.mubr.msk.bf16.mxu1 %vm7221_vm0, %v7220_v0 }
 0xac7   : > { %v1254_v9 = vpop.f32.mrb[36].mxu1 }
 0xac8   : > { %v1255_v10 = vadd.f32 %v5779_v8, %v1254_v9  ;;  %v6369_v11 = vpop.f32.mrb[37].mxu1 }
 0xac9   : > { %v1257_v12 = vpop.f32.mrb[38].mxu1 }
 0xaca   : > { %1269 = vrot.lane.b32.xlu1 %v1255_v10, %s7224_s15  ;;  %1266 = vrot.lane.b32.xlu0 %v1255_v10, %s7223_s14  ;;  %v6370_v13 = vpop.f32.mrb[39].mxu1  ;;  %v7564_v14 = vpack.c.bf16 %v1255_v10, %v1255_v10 }
 0xace   : > { %1272 = vrot.lane.b32.xlu1 %v1255_v10, %s7222_s11  ;;  %1280 = vrot.lane.b32.xlu0 %v7564_v14, %s7225_s16 }
 0xb3c   : > { %v1270_v15 = vpop.permute.xlu1 %1269  ;;  %v1267_v16 = vpop.permute.xlu0 %1266 }
 0xb3d   : > { %v7569_v17 = vpack.c.bf16 %v1270_v15, %v1270_v15  ;;  %v7571_v19 = vpack.c.bf16 %v1267_v16, %v1267_v16 }
 0xb3f   : > { %1329 = vrot.lane.b32.xlu1 %v7571_v19, %s7225_s16  ;;  %1378 = vrot.lane.b32.xlu0 %v7569_v17, %s7225_s16 }
 0xb40   : > { %v1273_v22 = vpop.permute.xlu1 %1272  ;;  %v1281_v24 = vpop.permute.xlu0 %1280 }
 0xb41   : > { %v7577_v25 = vpack.c.bf16 %v1273_v22, %v1273_v22  ;;  %v1286_v26 = vsel %vm343_vm1, %v1281_v24, 0 }
 0xb42   : > { %6372 = vmatpush3.bf16.xpose.msra.mxu0 %v1286_v26 }
 0xb43   : > { %1427 = vrot.lane.b32.xlu1 %v7577_v25, %s7225_s16  ;;  %6377 = vmatprep.subr.bf16.mxu0 %v7220_v0 }
 0xb49   : > { %6374 = vmatmul.mubr.msk.bf16.vlgmr.msra.gmra.mrb[12].mxu0 %vm343_vm1, %v7564_v14 }
 0xb4a   : > { %6379 = vmatprep.mubr.msk.bf16.mxu0 %vm7221_vm0, %v7220_v0 }
 0xbb1   : > { %v1330_v27 = vpop.permute.xlu1 %1329  ;;  %v1379_v29 = vpop.permute.xlu0 %1378 }
 0xbb2   : > { %v1335_v28 = vsel %vm343_vm1, %v1330_v27, 0  ;;  %v1384_v31 = vsel %vm343_vm1, %v1379_v29, 0 }
 0xbb3   : > { %6378 = vmatpush3.bf16.xpose.msra.mxu0 %v1335_v28 }
 0xbb4   : > { %6383 = vmatprep.subr.bf16.mxu0 %v7220_v0 }
 0xbb5   : > { %v1428_v32 = vpop.permute.xlu1 %1427 }
 0xbb6   : > { %v1433_v33 = vsel %vm343_vm1, %v1428_v32, 0 }
 0xbba   : > { %6380 = vmatmul.mubr.msk.bf16.vlgmr.msra.gmra.mrb[16].mxu0 %vm343_vm1, %v7571_v19 }
 0xbbb   : > { %6384 = vmatpush3.bf16.xpose.msra.mxu0 %v1384_v31  ;;  %6385 = vmatprep.mubr.msk.bf16.mxu0 %vm7221_vm0, %v7220_v0 }
 0xbbc   : > { %6389 = vmatprep.subr.bf16.mxu0 %v7220_v0 }
 0xbc2   : > { %6386 = vmatmul.mubr.msk.bf16.vlgmr.msra.gmra.mrb[20].mxu0 %vm343_vm1, %v7569_v17 }
 0xbc3   : > { %6390 = vmatpush3.bf16.xpose.msra.mxu0 %v1433_v33  ;;  %6391 = vmatprep.mubr.msk.bf16.mxu0 %vm7221_vm0, %v7220_v0 }
 0xbc4   : > { %6401 = vmatprep.subr.bf16.mxu0 %v7220_v0 }
 0xbca   : > { %6392 = vmatmul.mubr.msk.bf16.vlgmr.msra.gmra.mrb[24].mxu0 %vm343_vm1, %v7577_v25 }
 0xbcb   : > { %6403 = vmatprep.mubr.msk.bf16.mxu0 %vm7221_vm0, %v7220_v0 }
 0xc1c   : > { %v1322_v34 = vpop.f32.mrb[12].mxu0 }
 0xc1d   : > { %v1475_v35 = vmul.f32 0.35355338, %v1322_v34  ;;  %v6375_v36 = vpop.f32.mrb[13].mxu0 }
 0xc1e   : > { %v1325_v37 = vpop.f32.mrb[14].mxu0 }
 0xc1f   : > { %v6376_v39 = vpop.f32.mrb[15].mxu0  ;;  %v1479_v41 = vadd.f32 %v1475_v35, %v7374_v56 }
 0xc21   : > { %v1483_v43 = vsel %vm343_vm1, %v1479_v41, -inf }
 0xc22   : > { %1484 = vmax.xlane.f32.xlu0 %v1483_v43 }
 0xc8d   : > { %v1371_v44 = vpop.f32.mrb[16].mxu0 }
 0xc8e   : > { %v1476_v46 = vmul.f32 0.35355338, %v1371_v44  ;;  %v6381_v47 = vpop.f32.mrb[17].mxu0 }
 0xc8f   : > { %v1374_v48 = vpop.f32.mrb[18].mxu0 }
 0xc90   : > { %v6382_v38 = vpop.f32.mrb[19].mxu0  ;;  %v1480_v49 = vadd.f32 %v1476_v46, %v7374_v56 }
 0xc92   : > { %v1486_v50 = vsel %vm343_vm1, %v1480_v49, -inf }
 0xc93   : > { %1487 = vmax.xlane.f32.xlu1 %v1486_v50 }
 0xc95   : > { %v1420_v51 = vpop.f32.mrb[20].mxu0 }
 0xc96   : > { %v1477_v52 = vmul.f32 0.35355338, %v1420_v51  ;;  %v6387_v30 = vpop.f32.mrb[21].mxu0 }
 0xc97   : > { %v1423_v53 = vpop.f32.mrb[22].mxu0 }
 0xc98   : > { %v6388_v54 = vpop.f32.mrb[23].mxu0  ;;  %v1481_v55 = vadd.f32 %v1477_v52, %v7374_v56 }
 0xc9a   : > { %v1489_v42 = vsel %vm343_vm1, %v1481_v55, -inf }
 0xc9b   : > { %1490 = vmax.xlane.f32.xlu0 %v1489_v42  ;;  %v6967_v42 = vld [vmem:[%s8639_s1 + $0x118] sm:$0xff]  }
 0xc9d   : > { %v1469_v45 = vpop.f32.mrb[24].mxu0 }
 0xc9e   : > { %v1478_v57 = vmul.f32 0.35355338, %v1469_v45  ;;  %v6393_v58 = vpop.f32.mrb[25].mxu0 }
 0xc9f   : > { %v1472_v59 = vpop.f32.mrb[26].mxu0 }
 0xca0   : > { %v6394_v60 = vpop.f32.mrb[27].mxu0  ;;  %v1482_v40 = vadd.f32 %v1478_v57, %v7374_v56 }
 0xca2   : > { %v1492_v61 = vsel %vm343_vm1, %v1482_v40, -inf }
 0xca3   : > { %1493 = vmax.xlane.f32.xlu0 %v1492_v61 }
 0xca4   : > { %1531 = vrot.lane.b32.xlu1 %v7564_v14, %s7226_s18 }
 0xcaf   : > { %v1485_v62 = vpop.xlane.xlu0 %1484 }
 0xcb0   : > { %v1495_v63 = vsub.f32 %v1479_v41, %v1485_v62 }
 0xcb2   : > { %v1499_v1 = vmul.f32 1.442695, %v1495_v63 }
 0xcb4   : > { %7104 = vpow2.f32 %v1499_v1 }
 0xcbe   : > { %v7105_v2 = vpop.eup %7104 }
 0xcbf   : > { %v1507_v3 = vsel %vm343_vm1, %v7105_v2, 0.0 }
 0xcc8   : > { %1508 = vadd.xlane.f32.xlu1 %v1507_v3 }
 0xd20   : > { %v1488_v4 = vpop.xlane.xlu1 %1487 }
 0xd21   : > { %v1496_v5 = vsub.f32 %v1480_v49, %v1488_v4 }
 0xd23   : > { %v1501_v7 = vmul.f32 1.442695, %v1496_v5 }
 0xd24   : > { %v1532_v8 = vpop.permute.xlu1 %1531 }
 0xd25   : > { %7106 = vpow2.f32 %v1501_v7  ;;  %v1537_v9 = vsel %vm602_vm2, %v1532_v8, 0 }
 0xd26   : > { %6396 = vmatpush3.bf16.msra.mxu1 %v1537_v9 }
 0xd27   : > { %6407 = vmatprep.subr.bf16.mxu1 %v7220_v0 }
 0xd28   : > { %v1491_v10 = vpop.xlane.xlu0 %1490 }
 0xd29   : > { %v1497_v11 = vsub.f32 %v1481_v55, %v1491_v10  ;;  %v6966_v55 = vld [vmem:[%s8639_s1 + $0x110] sm:$0xff]  }
 0xd2b   : > { %v1503_v12 = vmul.f32 1.442695, %v1497_v11 }
 0xd2d   : > { %7108 = vpow2.f32 %v1503_v12  ;;  %v6968_v12 = vld [vmem:[%s8639_s1 + $0x120] sm:$0xff]  }
 0xd2f   : > { %v7107_v13 = vpop.eup %7106 }
 0xd30   : > { %v1494_v14 = vpop.xlane.xlu0 %1493  ;;  %v1510_v15 = vsel %vm343_vm1, %v7107_v13, 0.0 }
 0xd31   : > { %v1498_v16 = vsub.f32 %v1482_v40, %v1494_v14  ;;  %1511 = vadd.xlane.f32.xlu0 %v1510_v15 }
 0xd33   : > { %v1505_v22 = vmul.f32 1.442695, %v1498_v16 }
 0xd35   : > { %7110 = vpow2.f32 %v1505_v22 }
 0xd37   : > { %v7109_v24 = vpop.eup %7108 }
 0xd38   : > { %v1513_v26 = vsel %vm343_vm1, %v7109_v24, 0.0 }
 0xd39   : > { %1514 = vadd.xlane.f32.xlu1 %v1513_v26 }
 0xd3f   : > { %v7111_v27 = vpop.eup %7110 }
 0xd40   : > { %v1516_v28 = vsel %vm343_vm1, %v7111_v27, 0.0 }
 0xd41   : > { %1517 = vadd.xlane.f32.xlu0 %v1516_v28 }
 0xd4a   : > { %1627 = vrot.lane.b32.xlu1 %v7569_v17, %s7226_s18 }
 0xd4e   : > { %1675 = vrot.lane.b32.xlu1 %v7577_v25, %s7226_s18 }
 0xd55   : > { %v1509_v29 = vpop.xlane.xlu1 %1508 }
 0xd56   : > { %7112 = vrcp.f32 %v1509_v29 }
 0xd57   : > { %1579 = vrot.lane.b32.xlu0 %v7571_v19, %s7226_s18 }
 0xd60   : > { %v7113_v31 = vpop.eup %7112 }
 0xd61   : > { %v1520_v32 = vmul.f32 %v7113_v31, %v7105_v2  ;;  %v6969_v31 = vld [vmem:[%s8639_s1 + $0x128] sm:$0xff]  }
 0xd63   : > { %v1527_v33 = vpack.c.bf16 %v1520_v32, %v1520_v32  ;;  %v6971_v32 = vld [vmem:[%s8639_s1 + $0x138] sm:$0xff]  }
 0xd65   : > { %6398 = vmatmul.mubr.msk.bf16.vlgmr.msra.gmra.mrb[40].mxu1 %vm343_vm1, %v1527_v33  ;;  %v6972_v33 = vld [vmem:[%s8639_s1 + $0x140] sm:$0xff]  }
 0xd66   : > { %6409 = vmatprep.mubr.msk.bf16.mxu1 %vm7221_vm0, %v7220_v0 }
 0xdbe   : > { %v1512_v34 = vpop.xlane.xlu0 %1511 }
 0xdbf   : > { %7114 = vrcp.f32 %v1512_v34  ;;  %v6973_v34 = vld [vmem:[%s8639_s1 + $0x148] sm:$0xff]  }
 0xdc6   : > { %v1515_v35 = vpop.xlane.xlu1 %1514 }
 0xdc7   : > { %7116 = vrcp.f32 %v1515_v35  ;;  %v6974_v35 = vld [vmem:[%s8639_s1 + $0x150] sm:$0xff]  }
 0xdc9   : > { %v7115_v36 = vpop.eup %7114 }
 0xdca   : > { %v1628_v17 = vpop.permute.xlu1 %1627  ;;  %v1522_v39 = vmul.f32 %v7115_v36, %v7107_v13  ;;  %v5796_v13 = vld [vmem:[%s8638_s0 + $0xd] ss:$0 sm:$0xff] }
 0xdcb   : > { %v1633_v25 = vsel %vm602_vm2, %v1628_v17, 0  ;;  %v6975_v17 = vld [vmem:[%s8639_s1 + $0x158] sm:$0xff]  }
 0xdcc   : > { %6408 = vmatpush3.bf16.msra.mxu1 %v1633_v25  ;;  %v1528_v48 = vpack.c.bf16 %v1522_v39, %v1522_v39 }
 0xdcd   : > { %6419 = vmatprep.subr.bf16.mxu1 %v7220_v0 }
 0xdce   : > { %v1518_v19 = vpop.xlane.xlu0 %1517  ;;  %v1676_v46 = vpop.permute.xlu1 %1675 }
 0xdcf   : > { %7118 = vrcp.f32 %v1518_v19  ;;  %v1681_v38 = vsel %vm602_vm2, %v1676_v46, 0 }
 0xdd1   : > { %v7117_v37 = vpop.eup %7116 }
 0xdd2   : > { %v1580_v41 = vpop.permute.xlu0 %1579  ;;  %v1524_v43 = vmul.f32 %v7117_v37, %v7109_v24  ;;  %v7670_v24 = vld [vmem:[%s7267_s17 + $0x8] sm:$0xff] }
 0xdd3   : > { %v1585_v44 = vsel %vm602_vm2, %v1580_v41, 0  ;;  %v2085_v29 = vmul.f32 %v7670_v24, %v7670_v24 }
 0xdd4   : > { %6402 = vmatpush3.bf16.msra.mxu0 %v1585_v44  ;;  %v1529_v47 = vpack.c.bf16 %v1524_v43, %v1524_v43 }
 0xdd5   : > { %6413 = vmatprep.subr.bf16.mxu0 %v7220_v0 }
 0xdd6   : > { %6410 = vmatmul.mubr.msk.bf16.vlgmr.msra.gmra.mrb[44].mxu1 %vm343_vm1, %v1529_v47 }
 0xdd7   : > { %6404 = vmatmul.mubr.msk.bf16.vlgmr.msra.gmra.mrb[28].mxu0 %vm343_vm1, %v1528_v48  ;;  %6423 = vmatprep.mubr.msk.bf16.mxu1 %vm7221_vm0, %v7220_v0 }
 0xdd8   : > { %6414 = vmatpush3.bf16.msra.mxu0 %v1681_v38  ;;  %6415 = vmatprep.mubr.msk.bf16.mxu0 %vm7221_vm0, %v7220_v0  ;;  %v1799_v38 = vld [vmem:[%s8638_s0 + $0xe] sm:$0x3] }
 0xdd9   : > { %v7119_v49 = vpop.eup %7118  ;;  %6427 = vmatprep.subr.bf16.mxu0 %v7220_v0  ;;  %6420 = vmatpush3.bf16.msra.mxu1 %v6966_v55 }
 0xdda   : > { %v1526_v50 = vmul.f32 %v7119_v49, %v7111_v27  ;;  %6421 = vmatprep.subr.bf16.mxu1 %v7220_v0 }
 0xddc   : > { %v1530_v51 = vpack.c.bf16 %v1526_v50, %v1526_v50 }
 0xddd   : > { %6422 = vmatpush3.bf16.msra.mxu1 %v6967_v42 }
 0xdde   : > { %6447 = vmatprep.subr.bf16.mxu1 %v7220_v0 }
 0xddf   : > { %6416 = vmatmul.mubr.msk.bf16.vlgmr.msra.gmra.mrb[32].mxu0 %vm343_vm1, %v1530_v51 }
 0xde0   : > { %6443 = vmatprep.mubr.msk.bf16.mxu0 %vm7221_vm0, %v7220_v0  ;;  %6428 = vmatpush3.bf16.msra.mxu0 %v6968_v12 }
 0xde1   : > { %6429 = vmatprep.subr.bf16.mxu0 %v7220_v0 }
 0xde4   : > { %6430 = vmatpush3.bf16.msra.mxu0 %v6969_v31 }
 0xde5   : > { %6431 = vmatprep.subr.bf16.mxu0 %v7220_v0 }
 0xe38   : > { %v1573_v52 = vpop.f32.mrb[40].mxu1 }
 0xe39   : > { %v6399_v30 = vpop.f32.mrb[41].mxu1 }
 0xe3a   : > { %v1576_v53 = vpop.f32.mrb[42].mxu1 }
 0xe3b   : > { %v6400_v54 = vpop.f32.mrb[43].mxu1 }
 0xe3c   : > { %v1822_v54 = vrot.slane %v1799_v38, %v7316_v23 }
 0xea9   : > { %v1669_v45 = vpop.f32.mrb[44].mxu1 }
 0xeaa   : > { %1728 = vrot.lane.b32.xlu1 %v1669_v45, %s7228_s24  ;;  %v1621_v57 = vpop.f32.mrb[28].mxu0  ;;  %v6411_v58 = vpop.f32.mrb[45].mxu1 }
 0xeab   : > { %v1672_v59 = vpop.f32.mrb[46].mxu1  ;;  %1724 = vrot.lane.b32.xlu0 %v1621_v57, %s7227_s21  ;;  %v6405_v60 = vpop.f32.mrb[29].mxu0  ;;  %v6976_v58 = vld [vmem:[%s8639_s1 + $0x1a0] sm:$0xff]  }
 0xeac   : > { %v1624_v40 = vpop.f32.mrb[30].mxu0  ;;  %v6412_v61 = vpop.f32.mrb[47].mxu1 }
 0xead   : > { %v6406_v62 = vpop.f32.mrb[31].mxu0  ;;  %v6977_v40 = vld [vmem:[%s8639_s1 + $0x1a8] sm:$0xff]   ;;  %v6978_v61 = vld [vmem:[%s8639_s1 + $0x1b0] sm:$0xff]  }
 0xeae   : > { %v6979_v62 = vld [vmem:[%s8639_s1 + $0x1b8] sm:$0xff]  }
 0xeb2   : > { %v1717_v63 = vpop.f32.mrb[32].mxu0 }
 0xeb3   : > { %1732 = vrot.lane.b32.xlu0 %v1717_v63, %s7229_s25  ;;  %v6417_v1 = vpop.f32.mrb[33].mxu0  ;;  %v6980_v63 = vld [vmem:[%s8639_s1 + $0x1c0] sm:$0xff]  }
 0xeb4   : > { %v1720_v2 = vpop.f32.mrb[34].mxu0 }
 0xeb5   : > { %v6418_v3 = vpop.f32.mrb[35].mxu0 }
 0xeb6   : > { %v2081_v3 = vld [vmem:[%s8638_s0 + $0x2] sm:$0x3] }
 0xf1c   : > { %v1729_v7 = vpop.permute.xlu1 %1728 }
 0xf1d   : > { %v1725_v4 = vpop.permute.xlu0 %1724 }
 0xf1e   : > { %v1735_v5 = vsel %vm343_vm1, %v1573_v52, %v1725_v4  ;;  %v1817_v52 = vrot.slane %v1799_v38, %v7310_v21  ;;  %v6981_v4 = vld [vmem:[%s8639_s1 + $0x1c8] sm:$0xff]  }
 0xf1f   : > { %v1736_v8 = vsel %vm803_vm3, %v1735_v5, %v1729_v7  ;;  %v2099_v7 = vrot.slane %v2081_v3, %v7310_v21 }
 0xf25   : > { %v1733_v9 = vpop.permute.xlu0 %1732 }
 0xf26   : > { %v1737_v10 = vsel %vm805_vm4, %v1736_v8, %v1733_v9  ;;  %v6982_v8 = vld [vmem:[%s8639_s1 + $0x1d0] sm:$0xff]  }
 0xf27   : > { %v1738_v11 = vpack.c.bf16 %v1737_v10, %v1737_v10  ;;  %v2104_v10 = vrot.slane %v2081_v3, %v7316_v23 }
 0xf29   : > { %6424 = vmatmul.mubr.msk.bf16.vlgmr.msra.gmra.mrb[48].mxu1 %vm824_vm5, %v1738_v11  ;;  %v6983_v11 = vld [vmem:[%s8639_s1 + $0x1d8] sm:$0xff]  }
 0xf2a   : > { %6463 = vmatprep.mubr.msk.bf16.mxu1 %vm7221_vm0, %v7220_v0 }
 0xffc   : > { %v1792_v14 = vpop.f32.mrb[48].mxu1 }
 0xffd   : > { %v1793_v15 = vadd.f32 %v5796_v13, %v1792_v14  ;;  %v6425_v16 = vpop.f32.mrb[49].mxu1  ;;  %v6984_v14 = vld [vmem:[%s8639_s1 + $0x160] sm:$0xff]  }
 0xffe   : > { %v1795_v22 = vpop.f32.mrb[50].mxu1  ;;  %6448 = vmatpush3.bf16.msra.mxu1 %v6984_v14  ;;  %v6986_v16 = vld [vmem:[%s8639_s1 + $0x170] sm:$0xff]  }
 0xfff   : > { %v1798_v26 = vadd.f32 %v1793_v15, %v7553_v6  ;;  %v6426_v27 = vpop.f32.mrb[51].mxu1  ;;  %v6970_v6 = vld [vmem:[%s8639_s1 + $0x130] sm:$0xff]   ;;  %6449 = vmatprep.subr.bf16.mxu1 %v7220_v0  ;;  %v6985_v15 = vld [vmem:[%s8639_s1 + $0x168] sm:$0xff]   ;;  %v6987_v22 = vld [vmem:[%s8639_s1 + $0x178] sm:$0xff]  }
0x1000   : > { %6432 = vmatpush3.bf16.msra.mxu0 %v6970_v6  ;;  %v6990_v27 = vld [vmem:[%s8639_s1 + $0x190] sm:$0xff]  }
0x1001   : > { %1800 = vadd.xlane.f32.xlu1 %v1798_v26  ;;  %v1803_v28 = vmul.f32 %v1798_v26, %v1798_v26  ;;  %6433 = vmatprep.subr.bf16.mxu0 %v7220_v0 }
0x1002   : > { %6450 = vmatpush3.bf16.msra.mxu1 %v6985_v15 }
0x1003   : > { %1804 = vadd.xlane.f32.xlu0 %v1803_v28  ;;  %6451 = vmatprep.subr.bf16.mxu1 %v7220_v0  ;;  %v6991_v28 = vld [vmem:[%s8639_s1 + $0x198] sm:$0xff]  }
0x1004   : > { %6434 = vmatpush3.bf16.msra.mxu0 %v6971_v32 }
0x1005   : > { %2086 = vadd.xlane.f32.xlu1 %v2085_v29  ;;  %6435 = vmatprep.subr.bf16.mxu0 %v7220_v0  ;;  %v5800_v29 = vld [vmem:[%s8638_s0 + $0x10] ss:$0 sm:$0xff] }
0x1006   : > { %6452 = vmatpush3.bf16.msra.mxu1 %v6986_v16 }
0x1007   : > { %2082 = vadd.xlane.f32.xlu0 %v7670_v24  ;;  %6453 = vmatprep.subr.bf16.mxu1 %v7220_v0 }
0x1008   : > { %6436 = vmatpush3.bf16.msra.mxu0 %v6972_v33 }
0x1009   : > { %6437 = vmatprep.subr.bf16.mxu0 %v7220_v0 }
0x100a   : > { %6454 = vmatpush3.bf16.msra.mxu1 %v6987_v22 }
0x100b   : > { %6455 = vmatprep.subr.bf16.mxu1 %v7220_v0 }
0x100c   : > { %6438 = vmatpush3.bf16.msra.mxu0 %v6973_v34 }
0x100d   : > { %6439 = vmatprep.subr.bf16.mxu0 %v7220_v0 }
0x1010   : > { %6440 = vmatpush3.bf16.msra.mxu0 %v6974_v35 }
0x1011   : > { %6441 = vmatprep.subr.bf16.mxu0 %v7220_v0 }
0x1014   : > { %6442 = vmatpush3.bf16.msra.mxu0 %v6975_v17 }
0x1015   : > { %6467 = vmatprep.subr.bf16.mxu0 %v7220_v0 }
0x108e   : > { %v1801_v25 = vpop.xlane.xlu1 %1800 }
0x108f   : > { %v1802_v36 = vmul.f32 0.03125, %v1801_v25 }
0x1090   : > { %v1805_v19 = vpop.xlane.xlu0 %1804 }
0x1091   : > { %v1807_v37 = vmul.f32 %v1802_v36, %v1802_v36  ;;  %v1806_v39 = vmul.f32 0.03125, %v1805_v19  ;;  %v1812_v51 = vsub.f32 %v1798_v26, %v1802_v36  ;;  %v6989_v26 = vld [vmem:[%s8639_s1 + $0x188] sm:$0xff]  }
0x1092   : > { %v2087_v48 = vpop.xlane.xlu1 %2086 }
0x1093   : > { %v1808_v41 = vsub.f32 %v1806_v39, %v1807_v37  ;;  %v2088_v50 = vmul.f32 0.03125, %v2087_v48 }
0x1094   : > { %v2083_v46 = vpop.xlane.xlu0 %2082 }
0x1095   : > { %v1809_v43 = vmax.f32 %v1808_v41, 0.0  ;;  %v2084_v47 = vmul.f32 0.03125, %v2083_v46 }
0x1097   : > { %v1810_v44 = vadd.f32 1e-12, %v1809_v43  ;;  %v2089_v49 = vmul.f32 %v2084_v47, %v2084_v47  ;;  %v2094_v1 = vsub.f32 %v7670_v24, %v2084_v47  ;;  %v6988_v24 = vld [vmem:[%s8639_s1 + $0x180] sm:$0xff]  }
0x1098   : > { %6456 = vmatpush3.bf16.msra.mxu1 %v6988_v24 }
0x1099   : > { %7120 = vrsqrt.f32 %v1810_v44  ;;  %v2090_v55 = vsub.f32 %v2088_v50, %v2089_v49  ;;  %6457 = vmatprep.subr.bf16.mxu1 %v7220_v0  ;;  %v5818_v44 = vld [vmem:[%s8638_s0 + $0x14] ss:$0 sm:$0xff] }
0x109b   : > { %v2091_v57 = vmax.f32 %v2090_v55, 0.0 }
0x109c   : > { %6458 = vmatpush3.bf16.msra.mxu1 %v6989_v26 }
0x109d   : > { %v2092_v60 = vadd.f32 1e-12, %v2091_v57  ;;  %6459 = vmatprep.subr.bf16.mxu1 %v7220_v0 }
0x109f   : > { %7122 = vrsqrt.f32 %v2092_v60 }
0x10a0   : > { %6460 = vmatpush3.bf16.msra.mxu1 %v6990_v27 }
0x10a1   : > { %6461 = vmatprep.subr.bf16.mxu1 %v7220_v0 }
0x10a3   : > { %v7121_v30 = vpop.eup %7120 }
0x10a4   : > { %v1813_v53 = vmul.f32 %v7121_v30, %v1812_v51  ;;  %6462 = vmatpush3.bf16.msra.mxu1 %v6991_v28 }
0x10a5   : > { %6487 = vmatprep.subr.bf16.mxu1 %v7220_v0 }
0x10a6   : > { %v1818_v42 = vmul.f32 %v1817_v52, %v1813_v53 }
0x10a8   : > { %v7709_v45 = vadd.f32 %v1822_v54, %v1818_v42 }
0x10a9   : > { %v7123_v2 = vpop.eup %7122 }
0x10aa   : > { %v1840_v59 = vpack.c.bf16 %v7709_v45, %v7709_v45  ;;  %v2095_v5 = vmul.f32 %v7123_v2, %v2094_v1 }
0x10ac   : > { %6444 = vmatmul.mubr.bf16.vlgmr.msra.gmra.mrb[36].mxu0 %v1840_v59  ;;  %v2100_v9 = vmul.f32 %v2099_v7, %v2095_v5  ;;  %v171_v5 = vld [vmem:[%s7267_s17 + $0x11] sm:$0x1] }
0x10ad   : > { %6468 = vmatpush3.bf16.msra.mxu0 %v6976_v58  ;;  %6483 = vmatprep.mubr.msk.bf16.mxu0 %vm7221_vm0, %v7220_v0  ;;  %v178_v7 = vsub.f32 1.0, %v171_v5 }
0x10ae   : > { %6469 = vmatprep.subr.bf16.mxu0 %v7220_v0  ;;  %v7752_v12 = vadd.f32 %v2104_v10, %v2100_v9 }
0x10af   : > { %v179_v9 = vmul.f32 -1e+09, %v178_v7 }
0x10b0   : > { %v2122_v13 = vpack.c.bf16 %v7752_v12, %v7752_v12 }
0x10b1   : > { %6470 = vmatpush3.bf16.msra.mxu0 %v6977_v40  ;;  %v183_v10 = vrot.slane %v179_v9, %v7310_v21 }
0x10b2   : > { %6471 = vmatprep.subr.bf16.mxu0 %v7220_v0 }
0x10b5   : > { %6472 = vmatpush3.bf16.msra.mxu0 %v6978_v61 }
0x10b6   : > { %6473 = vmatprep.subr.bf16.mxu0 %v7220_v0 }
0x10b9   : > { %6474 = vmatpush3.bf16.msra.mxu0 %v6979_v62 }
0x10ba   : > { %6475 = vmatprep.subr.bf16.mxu0 %v7220_v0 }
0x10bd   : > { %6476 = vmatpush3.bf16.msra.mxu0 %v6980_v63 }
0x10be   : > { %6477 = vmatprep.subr.bf16.mxu0 %v7220_v0 }
0x10c1   : > { %6478 = vmatpush3.bf16.msra.mxu0 %v6981_v4 }
0x10c2   : > { %6479 = vmatprep.subr.bf16.mxu0 %v7220_v0 }
0x10c5   : > { %6480 = vmatpush3.bf16.msra.mxu0 %v6982_v8  ;;  %v175_v8 = vand.u32 127, %v172_v18 }
0x10c6   : > { %6481 = vmatprep.subr.bf16.mxu0 %v7220_v0 }
0x10c7   : > { %vm176_vm6 = vcmp.le.s32.totalorder %v175_v8, %v7307_v20 }
0x10c9   : > { %6482 = vmatpush3.bf16.msra.mxu0 %v6983_v11  ;;  %v7230_v11 = vmov -1e+09  }
0x10ca   : > { %6511 = vmatprep.subr.bf16.mxu0 %v7220_v0 }
0x10cc   : > { %6484 = vmatmul.mubr.bf16.vlgmr.msra.gmra.mrb[40].mxu0 %v2122_v13  ;;  %v177_v13 = vsel %vm176_vm6, 0.0, %v7230_v11 }
0x10cd   : > { %6513 = vmatprep.mubr.msk.bf16.mxu0 %vm7221_vm0, %v7220_v0  ;;  %v7848_v14 = vadd.f32 %v183_v10, %v177_v13 }
0x117f   : > { %v1928_v31 = vpop.f32.mrb[36].mxu0 }
0x1180   : > { %v1929_v6 = vadd.f32 %v5800_v29, %v1928_v31  ;;  %v6445_v32 = vpop.f32.mrb[37].mxu0 }
0x1181   : > { %v1931_v33 = vpop.f32.mrb[38].mxu0 }
0x1182   : > { %v1934_v34 = vmul.f32 %v1929_v6, %v1929_v6  ;;  %v6446_v35 = vpop.f32.mrb[39].mxu0 }
0x1184   : > { %v1935_v17 = vmul.f32 %v1934_v34, %v1929_v6 }
0x1186   : > { %v1936_v25 = vmul.f32 0.044715, %v1935_v17 }
0x1188   : > { %v1937_v36 = vadd.f32 %v1936_v25, %v1929_v6 }
0x118a   : > { %v1938_v19 = vmul.f32 0.7978846, %v1937_v36 }
0x118c   : > { %7124 = vtanh.f32 %v1938_v19 }
0x1196   : > { %v7125_v37 = vpop.eup %7124 }
0x1197   : > { %v1940_v39 = vadd.f32 1.0, %v7125_v37 }
0x1199   : > { %v1941_v41 = vmul.f32 0.5, %v1940_v39 }
0x119b   : > { %v1942_v43 = vmul.f32 %v1941_v41, %v1929_v6 }
0x119d   : > { %v1959_v46 = vpack.c.bf16 %v1942_v43, %v1942_v43 }
0x119f   : > { %v2210_v47 = vpop.f32.mrb[40].mxu0  ;;  %6464 = vmatmul.mubr.bf16.vlgmr.msra.gmra.mrb[52].mxu1 %v1959_v46 }
0x11a0   : > { %v2211_v48 = vadd.f32 %v5818_v44, %v2210_v47  ;;  %v6485_v38 = vpop.f32.mrb[41].mxu0  ;;  %6489 = vmatprep.mubr.msk.bf16.mxu1 %vm7221_vm0, %v7220_v0 }
0x11a1   : > { %v2213_v49 = vpop.f32.mrb[42].mxu0 }
0x11a2   : > { %2225 = vrot.lane.b32.xlu1 %v2211_v48, %s7224_s15  ;;  %2222 = vrot.lane.b32.xlu0 %v2211_v48, %s7223_s14  ;;  %v6486_v50 = vpop.f32.mrb[43].mxu0  ;;  %v7801_v51 = vpack.c.bf16 %v2211_v48, %v2211_v48 }
0x11a6   : > { %2228 = vrot.lane.b32.xlu1 %v2211_v48, %s7222_s11  ;;  %2236 = vrot.lane.b32.xlu0 %v7801_v51, %s7225_s16 }
0x1214   : > { %v2226_v52 = vpop.permute.xlu1 %2225  ;;  %v2223_v30 = vpop.permute.xlu0 %2222 }
0x1215   : > { %v7806_v53 = vpack.c.bf16 %v2226_v52, %v2226_v52  ;;  %v7808_v54 = vpack.c.bf16 %v2223_v30, %v2223_v30 }
0x1217   : > { %2285 = vrot.lane.b32.xlu1 %v7808_v54, %s7225_s16  ;;  %2334 = vrot.lane.b32.xlu0 %v7806_v53, %s7225_s16 }
0x1218   : > { %v2229_v55 = vpop.permute.xlu1 %2228  ;;  %v2237_v42 = vpop.permute.xlu0 %2236 }
0x1219   : > { %v7814_v57 = vpack.c.bf16 %v2229_v55, %v2229_v55  ;;  %v2242_v58 = vsel %vm343_vm1, %v2237_v42, 0 }
0x121a   : > { %6488 = vmatpush3.bf16.xpose.msra.mxu1 %v2242_v58 }
0x121b   : > { %2383 = vrot.lane.b32.xlu1 %v7814_v57, %s7225_s16  ;;  %6493 = vmatprep.subr.bf16.mxu1 %v7220_v0 }
0x1221   : > { %6490 = vmatmul.mubr.msk.bf16.vlgmr.msra.gmra.mrb[56].mxu1 %vm343_vm1, %v7801_v51 }
0x1222   : > { %6495 = vmatprep.mubr.msk.bf16.mxu1 %vm7221_vm0, %v7220_v0 }
0x1272   : > { %v7824_v59 = vpop.f32.mrb[52].mxu1 }
0x1273   : > { %v6465_v60 = vpop.f32.mrb[53].mxu1 }
0x1274   : > { %v2045_v40 = vpop.f32.mrb[54].mxu1 }
0x1275   : > { %v6466_v61 = vpop.f32.mrb[55].mxu1 }
0x1289   : > { %v2286_v62 = vpop.permute.xlu1 %2285  ;;  %v2335_v1 = vpop.permute.xlu0 %2334 }
0x128a   : > { %v2291_v63 = vsel %vm343_vm1, %v2286_v62, 0  ;;  %v2340_v2 = vsel %vm343_vm1, %v2335_v1, 0 }
0x128b   : > { %6494 = vmatpush3.bf16.xpose.msra.mxu1 %v2291_v63 }
0x128c   : > { %6499 = vmatprep.subr.bf16.mxu1 %v7220_v0 }
0x128d   : > { %v2384_v3 = vpop.permute.xlu1 %2383 }
0x128e   : > { %v2389_v4 = vsel %vm343_vm1, %v2384_v3, 0 }
0x1292   : > { %6496 = vmatmul.mubr.msk.bf16.vlgmr.msra.gmra.mrb[60].mxu1 %vm343_vm1, %v7808_v54 }
0x1293   : > { %6500 = vmatpush3.bf16.xpose.msra.mxu1 %v2340_v2  ;;  %6501 = vmatprep.mubr.msk.bf16.mxu1 %vm7221_vm0, %v7220_v0 }
0x1294   : > { %6505 = vmatprep.subr.bf16.mxu1 %v7220_v0 }
0x129a   : > { %6502 = vmatmul.mubr.msk.bf16.vlgmr.msra.gmra.mrb[64].mxu1 %vm343_vm1, %v7806_v53 }
0x129b   : > { %6506 = vmatpush3.bf16.xpose.msra.mxu1 %v2389_v4  ;;  %6507 = vmatprep.mubr.msk.bf16.mxu1 %vm7221_vm0, %v7220_v0 }
0x129c   : > { %6517 = vmatprep.subr.bf16.mxu1 %v7220_v0 }
0x12a2   : > { %6508 = vmatmul.mubr.msk.bf16.vlgmr.msra.gmra.mrb[68].mxu1 %vm343_vm1, %v7814_v57 }
0x12a3   : > { %6519 = vmatprep.mubr.msk.bf16.mxu1 %vm7221_vm0, %v7220_v0 }
0x12f4   : > { %v2278_v15 = vpop.f32.mrb[56].mxu1 }
0x12f5   : > { %v2431_v16 = vmul.f32 0.35355338, %v2278_v15  ;;  %v6491_v22 = vpop.f32.mrb[57].mxu1 }
0x12f6   : > { %v2281_v24 = vpop.f32.mrb[58].mxu1 }
0x12f7   : > { %v6492_v26 = vpop.f32.mrb[59].mxu1  ;;  %v2435_v27 = vadd.f32 %v2431_v16, %v7848_v14 }
0x12f9   : > { %v2439_v28 = vsel %vm343_vm1, %v2435_v27, -inf }
0x12fa   : > { %2440 = vmax.xlane.f32.xlu0 %v2439_v28 }
0x1365   : > { %v2327_v18 = vpop.f32.mrb[60].mxu1 }
0x1366   : > { %v2432_v29 = vmul.f32 0.35355338, %v2327_v18  ;;  %v6497_v31 = vpop.f32.mrb[61].mxu1 }
0x1367   : > { %v2330_v6 = vpop.f32.mrb[62].mxu1 }
0x1368   : > { %v6498_v32 = vpop.f32.mrb[63].mxu1  ;;  %v2436_v33 = vadd.f32 %v2432_v29, %v7848_v14 }
0x136a   : > { %v2442_v34 = vsel %vm343_vm1, %v2436_v33, -inf }
0x136b   : > { %2443 = vmax.xlane.f32.xlu1 %v2442_v34 }
0x136d   : > { %v2376_v35 = vpop.f32.mrb[64].mxu1 }
0x136e   : > { %v2433_v17 = vmul.f32 0.35355338, %v2376_v35  ;;  %v6503_v25 = vpop.f32.mrb[65].mxu1 }
0x136f   : > { %v2379_v36 = vpop.f32.mrb[66].mxu1 }
0x1370   : > { %v6504_v19 = vpop.f32.mrb[67].mxu1  ;;  %v2437_v37 = vadd.f32 %v2433_v17, %v7848_v14 }
0x1372   : > { %v2445_v39 = vsel %vm343_vm1, %v2437_v37, -inf }
0x1373   : > { %2446 = vmax.xlane.f32.xlu0 %v2445_v39 }
0x1375   : > { %v2425_v41 = vpop.f32.mrb[68].mxu1 }
0x1376   : > { %v2434_v43 = vmul.f32 0.35355338, %v2425_v41  ;;  %v6509_v44 = vpop.f32.mrb[69].mxu1  ;;  %v6992_v41 = vld [vmem:[%s8639_s1 + $0x1e0] sm:$0xff]  }
0x1377   : > { %v2428_v46 = vpop.f32.mrb[70].mxu1 }
0x1378   : > { %v6510_v47 = vpop.f32.mrb[71].mxu1  ;;  %v2438_v48 = vadd.f32 %v2434_v43, %v7848_v14  ;;  %v6993_v43 = vld [vmem:[%s8639_s1 + $0x1e8] sm:$0xff]  }
0x137a   : > { %v2448_v38 = vsel %vm343_vm1, %v2438_v48, -inf }
0x137b   : > { %2449 = vmax.xlane.f32.xlu0 %v2448_v38 }
0x137c   : > { %2487 = vrot.lane.b32.xlu1 %v7801_v51, %s7226_s18 }
0x1387   : > { %v2441_v49 = vpop.xlane.xlu0 %2440 }
0x1388   : > { %v2451_v50 = vsub.f32 %v2435_v27, %v2441_v49 }
0x138a   : > { %v2455_v52 = vmul.f32 1.442695, %v2451_v50 }
0x138c   : > { %7126 = vpow2.f32 %v2455_v52 }
0x1396   : > { %v7127_v30 = vpop.eup %7126 }
0x1397   : > { %v2463_v55 = vsel %vm343_vm1, %v7127_v30, 0.0 }
0x13a0   : > { %2464 = vadd.xlane.f32.xlu1 %v2463_v55 }
0x13f8   : > { %v2444_v42 = vpop.xlane.xlu1 %2443 }
0x13f9   : > { %v2452_v58 = vsub.f32 %v2436_v33, %v2444_v42 }
0x13fb   : > { %v2457_v60 = vmul.f32 1.442695, %v2452_v58 }
0x13fc   : > { %v2488_v40 = vpop.permute.xlu1 %2487 }
0x13fd   : > { %7128 = vpow2.f32 %v2457_v60  ;;  %v2493_v61 = vsel %vm602_vm2, %v2488_v40, 0  ;;  %v2048_v60 = vadd.f32 %v7824_v59, %v7709_v45  ;;  %v5817_v40 = vld [vmem:[%s8638_s0 + $0x11] ss:$0 sm:$0xff] }
0x13fe   : > { %6512 = vmatpush3.bf16.msra.mxu0 %v2493_v61  ;;  %v6994_v45 = vld [vmem:[%s8639_s1 + $0x230] sm:$0xff]  }
0x13ff   : > { %6523 = vmatprep.subr.bf16.mxu0 %v7220_v0  ;;  %v2054_v61 = vadd.f32 %v5817_v40, %v2048_v60 }
0x1400   : > { %v2447_v62 = vpop.xlane.xlu0 %2446 }
0x1401   : > { %v2453_v51 = vsub.f32 %v2437_v37, %v2447_v62  ;;  %v2059_v62 = vmul.f32 %v2054_v61, %v2054_v61 }
0x1403   : > { %v2459_v63 = vmul.f32 1.442695, %v2453_v51 }
0x1405   : > { %7130 = vpow2.f32 %v2459_v63 }
0x1407   : > { %v7129_v1 = vpop.eup %7128 }
0x1408   : > { %v2450_v2 = vpop.xlane.xlu0 %2449  ;;  %v2466_v3 = vsel %vm343_vm1, %v7129_v1, 0.0 }
0x1409   : > { %v2454_v4 = vsub.f32 %v2438_v48, %v2450_v2  ;;  %2467 = vadd.xlane.f32.xlu0 %v2466_v3 }
0x140b   : > { %v2461_v5 = vmul.f32 1.442695, %v2454_v4 }
0x140d   : > { %7132 = vpow2.f32 %v2461_v5  ;;  %v6995_v5 = vld [vmem:[%s8639_s1 + $0x238] sm:$0xff]  }
0x140f   : > { %v7131_v7 = vpop.eup %7130 }
0x1410   : > { %v2469_v8 = vsel %vm343_vm1, %v7131_v7, 0.0 }
0x1411   : > { %2470 = vadd.xlane.f32.xlu1 %v2469_v8  ;;  %v6997_v8 = vld [vmem:[%s8639_s1 + $0x248] sm:$0xff]  }
0x1417   : > { %v7133_v9 = vpop.eup %7132 }
0x1418   : > { %v2472_v10 = vsel %vm343_vm1, %v7133_v9, 0.0 }
0x1419   : > { %2473 = vadd.xlane.f32.xlu0 %v2472_v10  ;;  %v6999_v10 = vld [vmem:[%s8639_s1 + $0x258] sm:$0xff]  }
0x1422   : > { %2583 = vrot.lane.b32.xlu1 %v7806_v53, %s7226_s18 }
0x1426   : > { %2631 = vrot.lane.b32.xlu1 %v7814_v57, %s7226_s18 }
0x142d   : > { %v2465_v11 = vpop.xlane.xlu1 %2464 }
0x142e   : > { %7134 = vrcp.f32 %v2465_v11  ;;  %v7000_v11 = vld [vmem:[%s8639_s1 + $0x260] sm:$0xff]  }
0x142f   : > { %2535 = vrot.lane.b32.xlu0 %v7808_v54, %s7226_s18 }
0x1438   : > { %v7135_v13 = vpop.eup %7134 }
0x1439   : > { %v2476_v15 = vmul.f32 %v7135_v13, %v7127_v30  ;;  %v7001_v13 = vld [vmem:[%s8639_s1 + $0x268] sm:$0xff]  }
0x143b   : > { %v2483_v16 = vpack.c.bf16 %v2476_v15, %v2476_v15 }
0x143d   : > { %6514 = vmatmul.mubr.msk.bf16.vlgmr.msra.gmra.mrb[44].mxu0 %vm343_vm1, %v2483_v16 }
0x143e   : > { %6525 = vmatprep.mubr.msk.bf16.mxu0 %vm7221_vm0, %v7220_v0 }
0x1496   : > { %v2468_v22 = vpop.xlane.xlu0 %2467 }
0x1497   : > { %7136 = vrcp.f32 %v2468_v22 }
0x149e   : > { %v2471_v24 = vpop.xlane.xlu1 %2470 }
0x149f   : > { %7138 = vrcp.f32 %v2471_v24 }
0x14a1   : > { %v7137_v26 = vpop.eup %7136 }
0x14a2   : > { %v2584_v53 = vpop.permute.xlu1 %2583  ;;  %v2478_v28 = vmul.f32 %v7137_v26, %v7129_v1 }
0x14a3   : > { %v2589_v57 = vsel %vm602_vm2, %v2584_v53, 0 }
0x14a4   : > { %6524 = vmatpush3.bf16.msra.mxu0 %v2589_v57  ;;  %v2484_v33 = vpack.c.bf16 %v2478_v28, %v2478_v28 }
0x14a5   : > { %6535 = vmatprep.subr.bf16.mxu0 %v7220_v0 }
0x14a6   : > { %v2474_v54 = vpop.xlane.xlu0 %2473  ;;  %v2632_v6 = vpop.permute.xlu1 %2631 }
0x14a7   : > { %7140 = vrcp.f32 %v2474_v54  ;;  %v2637_v34 = vsel %vm602_vm2, %v2632_v6, 0 }
0x14a9   : > { %v7139_v27 = vpop.eup %7138 }
0x14aa   : > { %v2480_v18 = vmul.f32 %v7139_v27, %v7131_v7  ;;  %v2536_v29 = vpop.permute.xlu0 %2535  ;;  %v6996_v7 = vld [vmem:[%s8639_s1 + $0x240] sm:$0xff]   ;;  %v2055_v27 = vld [vmem:[%s8638_s0 + $0x12] sm:$0x3] }
0x14ab   : > { %v2541_v31 = vsel %vm602_vm2, %v2536_v29, 0  ;;  %v2078_v6 = vrot.slane %v2055_v27, %v7316_v23 }
0x14ac   : > { %6518 = vmatpush3.bf16.msra.mxu1 %v2541_v31  ;;  %v2485_v32 = vpack.c.bf16 %v2480_v18, %v2480_v18  ;;  %v2073_v18 = vrot.slane %v2055_v27, %v7310_v21 }
0x14ad   : > { %6529 = vmatprep.subr.bf16.mxu1 %v7220_v0 }
0x14ae   : > { %6526 = vmatmul.mubr.msk.bf16.vlgmr.msra.gmra.mrb[48].mxu0 %vm343_vm1, %v2485_v32 }
0x14af   : > { %6520 = vmatmul.mubr.msk.bf16.vlgmr.msra.gmra.mrb[72].mxu1 %vm343_vm1, %v2484_v33  ;;  %6539 = vmatprep.mubr.msk.bf16.mxu0 %vm7221_vm0, %v7220_v0 }
0x14b0   : > { %6530 = vmatpush3.bf16.msra.mxu1 %v2637_v34  ;;  %6531 = vmatprep.mubr.msk.bf16.mxu1 %vm7221_vm0, %v7220_v0 }
0x14b1   : > { %v7141_v35 = vpop.eup %7140  ;;  %6543 = vmatprep.subr.bf16.mxu1 %v7220_v0  ;;  %6536 = vmatpush3.bf16.msra.mxu0 %v6992_v41 }
0x14b2   : > { %v2482_v17 = vmul.f32 %v7141_v35, %v7133_v9  ;;  %6537 = vmatprep.subr.bf16.mxu0 %v7220_v0  ;;  %v6998_v9 = vld [vmem:[%s8639_s1 + $0x250] sm:$0xff]  }
0x14b3   : > { %v7002_v35 = vld [vmem:[%s8639_s1 + $0x1f0] sm:$0xff]  }
0x14b4   : > { %v2486_v25 = vpack.c.bf16 %v2482_v17, %v2482_v17  ;;  %v7003_v17 = vld [vmem:[%s8639_s1 + $0x1f8] sm:$0xff]  }
0x14b5   : > { %6538 = vmatpush3.bf16.msra.mxu0 %v6993_v43 }
0x14b6   : > { %6563 = vmatprep.subr.bf16.mxu0 %v7220_v0 }
0x14b7   : > { %6532 = vmatmul.mubr.msk.bf16.vlgmr.msra.gmra.mrb[76].mxu1 %vm343_vm1, %v2486_v25  ;;  %v5835_v25 = vld [vmem:[%s8638_s0 + $0x15] ss:$0 sm:$0xff] }
0x14b8   : > { %6559 = vmatprep.mubr.msk.bf16.mxu1 %vm7221_vm0, %v7220_v0  ;;  %6544 = vmatpush3.bf16.msra.mxu1 %v7002_v35 }
0x14b9   : > { %6545 = vmatprep.subr.bf16.mxu1 %v7220_v0 }
0x14bc   : > { %6546 = vmatpush3.bf16.msra.mxu1 %v7003_v17 }
0x14bd   : > { %6547 = vmatprep.subr.bf16.mxu1 %v7220_v0 }
0x1510   : > { %v2529_v36 = vpop.f32.mrb[44].mxu0 }
0x1511   : > { %v6515_v19 = vpop.f32.mrb[45].mxu0 }
0x1512   : > { %v2532_v37 = vpop.f32.mrb[46].mxu0 }
0x1513   : > { %v6516_v39 = vpop.f32.mrb[47].mxu0 }
0x1581   : > { %v2625_v44 = vpop.f32.mrb[48].mxu0 }
0x1582   : > { %v2577_v46 = vpop.f32.mrb[72].mxu1  ;;  %2684 = vrot.lane.b32.xlu1 %v2625_v44, %s7228_s24  ;;  %v6527_v47 = vpop.f32.mrb[49].mxu0 }
0x1583   : > { %2680 = vrot.lane.b32.xlu0 %v2577_v46, %s7227_s21  ;;  %v6521_v48 = vpop.f32.mrb[73].mxu1  ;;  %v2628_v38 = vpop.f32.mrb[50].mxu0  ;;  %v7004_v46 = vld [vmem:[%s8639_s1 + $0x200] sm:$0xff]   ;;  %v7005_v47 = vld [vmem:[%s8639_s1 + $0x208] sm:$0xff]  }
0x1584   : > { %v2580_v49 = vpop.f32.mrb[74].mxu1  ;;  %v6528_v50 = vpop.f32.mrb[51].mxu0  ;;  %6548 = vmatpush3.bf16.msra.mxu1 %v7004_v46  ;;  %v7007_v48 = vld [vmem:[%s8639_s1 + $0x218] sm:$0xff]   ;;  %v7008_v38 = vld [vmem:[%s8639_s1 + $0x220] sm:$0xff]  }
0x1585   : > { %v6522_v52 = vpop.f32.mrb[75].mxu1  ;;  %6549 = vmatprep.subr.bf16.mxu1 %v7220_v0  ;;  %v7009_v49 = vld [vmem:[%s8639_s1 + $0x228] sm:$0xff]   ;;  %v5848_v50 = vld [vmem:[%s8638_s0 + $0x19] ss:$0 sm:$0xff] }
0x1588   : > { %6550 = vmatpush3.bf16.msra.mxu1 %v7005_v47 }
0x1589   : > { %6551 = vmatprep.subr.bf16.mxu1 %v7220_v0 }
0x158a   : > { %v2673_v30 = vpop.f32.mrb[76].mxu1 }
0x158b   : > { %2688 = vrot.lane.b32.xlu0 %v2673_v30, %s7229_s25  ;;  %v6533_v55 = vpop.f32.mrb[77].mxu1 }
0x158c   : > { %v2676_v42 = vpop.f32.mrb[78].mxu1 }
0x158d   : > { %v6534_v58 = vpop.f32.mrb[79].mxu1 }
0x15a6   : > { %2056 = vadd.xlane.f32.xlu1 %v2054_v61 }
0x15aa   : > { %2060 = vadd.xlane.f32.xlu0 %v2059_v62 }
0x15f4   : > { %v2685_v1 = vpop.permute.xlu1 %2684 }
0x15f5   : > { %v2681_v51 = vpop.permute.xlu0 %2680 }
0x15f6   : > { %v2691_v63 = vsel %vm343_vm1, %v2529_v36, %v2681_v51 }
0x15f7   : > { %v2692_v3 = vsel %vm803_vm3, %v2691_v63, %v2685_v1 }
0x15fd   : > { %v2689_v2 = vpop.permute.xlu0 %2688 }
0x15fe   : > { %v2693_v4 = vsel %vm805_vm4, %v2692_v3, %v2689_v2  ;;  %v2755_v3 = vld [vmem:[%s8638_s0 + $0x16] sm:$0x3] }
0x15ff   : > { %v2694_v59 = vpack.c.bf16 %v2693_v4, %v2693_v4 }
0x1601   : > { %6540 = vmatmul.mubr.msk.bf16.vlgmr.msra.gmra.mrb[52].mxu0 %vm824_vm5, %v2694_v59 }
0x1602   : > { %6564 = vmatpush3.bf16.msra.mxu0 %v6994_v45  ;;  %6579 = vmatprep.mubr.msk.bf16.mxu0 %vm7221_vm0, %v7220_v0  ;;  %v2773_v45 = vrot.slane %v2755_v3, %v7310_v21 }
0x1603   : > { %6565 = vmatprep.subr.bf16.mxu0 %v7220_v0 }
0x1606   : > { %6566 = vmatpush3.bf16.msra.mxu0 %v6995_v5 }
0x1607   : > { %6567 = vmatprep.subr.bf16.mxu0 %v7220_v0 }
0x160a   : > { %6568 = vmatpush3.bf16.msra.mxu0 %v6996_v7  ;;  %v2778_v7 = vrot.slane %v2755_v3, %v7316_v23 }
0x160b   : > { %6569 = vmatprep.subr.bf16.mxu0 %v7220_v0 }
0x160e   : > { %6570 = vmatpush3.bf16.msra.mxu0 %v6997_v8 }
0x160f   : > { %6571 = vmatprep.subr.bf16.mxu0 %v7220_v0 }
0x1612   : > { %6572 = vmatpush3.bf16.msra.mxu0 %v6998_v9 }
0x1613   : > { %6573 = vmatprep.subr.bf16.mxu0 %v7220_v0 }
0x1616   : > { %6574 = vmatpush3.bf16.msra.mxu0 %v6999_v10 }
0x1617   : > { %6575 = vmatprep.subr.bf16.mxu0 %v7220_v0 }
0x161a   : > { %6576 = vmatpush3.bf16.msra.mxu0 %v7000_v11 }
0x161b   : > { %6577 = vmatprep.subr.bf16.mxu0 %v7220_v0 }
0x161e   : > { %6578 = vmatpush3.bf16.msra.mxu0 %v7001_v13 }
0x161f   : > { %6589 = vmatprep.subr.bf16.mxu0 %v7220_v0 }
0x1633   : > { %v2057_v15 = vpop.xlane.xlu1 %2056 }
0x1634   : > { %v2058_v16 = vmul.f32 0.03125, %v2057_v15 }
0x1636   : > { %v2063_v24 = vmul.f32 %v2058_v16, %v2058_v16  ;;  %v2068_v28 = vsub.f32 %v2054_v61, %v2058_v16 }
0x1637   : > { %v2061_v22 = vpop.xlane.xlu0 %2060 }
0x1638   : > { %v2062_v53 = vmul.f32 0.03125, %v2061_v22 }
0x163a   : > { %v2064_v57 = vsub.f32 %v2062_v53, %v2063_v24  ;;  %v5839_v53 = vld [vmem:[%s8638_s0 + $0x18] ss:$0 sm:$0xff] }
0x163c   : > { %v2065_v26 = vmax.f32 %v2064_v57, 0.0 }
0x163e   : > { %v2066_v54 = vadd.f32 1e-12, %v2065_v26 }
0x1640   : > { %7142 = vrsqrt.f32 %v2066_v54 }
0x164a   : > { %v7143_v29 = vpop.eup %7142 }
0x164b   : > { %v2069_v31 = vmul.f32 %v7143_v29, %v2068_v28 }
0x164d   : > { %v2074_v32 = vmul.f32 %v2073_v18, %v2069_v31 }
0x164f   : > { %v2079_v33 = vadd.f32 %v2078_v6, %v2074_v32 }
0x1651   : > { %v7949_v34 = vpack.c.bf16 %v2079_v33, %v2079_v33 }
0x1653   : > { %6580 = vmatmul.mubr.bf16.vlgmr.msra.gmra.mrb[56].mxu0 %v7949_v34 }
0x1654   : > { %6591 = vmatprep.mubr.msk.bf16.mxu0 %vm7221_vm0, %v7220_v0 }
0x16d4   : > { %v2748_v36 = vpop.f32.mrb[52].mxu0 }
0x16d5   : > { %v2749_v19 = vadd.f32 %v5835_v25, %v2748_v36  ;;  %v6541_v37 = vpop.f32.mrb[53].mxu0 }
0x16d6   : > { %v2751_v39 = vpop.f32.mrb[54].mxu0 }
0x16d7   : > { %v2754_v41 = vadd.f32 %v2749_v19, %v7752_v12  ;;  %v6542_v43 = vpop.f32.mrb[55].mxu0  ;;  %v7006_v12 = vld [vmem:[%s8639_s1 + $0x210] sm:$0xff]  }
0x16d8   : > { %6552 = vmatpush3.bf16.msra.mxu1 %v7006_v12 }
0x16d9   : > { %2756 = vadd.xlane.f32.xlu0 %v2754_v41  ;;  %v2759_v44 = vmul.f32 %v2754_v41, %v2754_v41  ;;  %6553 = vmatprep.subr.bf16.mxu1 %v7220_v0 }
0x16db   : > { %2760 = vadd.xlane.f32.xlu1 %v2759_v44 }
0x16dc   : > { %6554 = vmatpush3.bf16.msra.mxu1 %v7007_v48 }
0x16dd   : > { %6555 = vmatprep.subr.bf16.mxu1 %v7220_v0 }
0x16e0   : > { %6556 = vmatpush3.bf16.msra.mxu1 %v7008_v38 }
0x16e1   : > { %6557 = vmatprep.subr.bf16.mxu1 %v7220_v0 }
0x16e4   : > { %6558 = vmatpush3.bf16.msra.mxu1 %v7009_v49 }
0x16e5   : > { %6583 = vmatprep.subr.bf16.mxu1 %v7220_v0 }
0x1726   : > { %v2994_v52 = vpop.f32.mrb[56].mxu0 }
0x1727   : > { %v2995_v30 = vadd.f32 %v5848_v50, %v2994_v52  ;;  %v6581_v55 = vpop.f32.mrb[57].mxu0 }
0x1728   : > { %v2997_v42 = vpop.f32.mrb[58].mxu0 }
0x1729   : > { %3019 = vrot.lane.b32.xlu1 %v2995_v30, %s7224_s15  ;;  %3016 = vrot.lane.b32.xlu0 %v2995_v30, %s7223_s14  ;;  %v6582_v58 = vpop.f32.mrb[59].mxu0  ;;  %v8003_v10 = vpack.c.bf16 %v2995_v30, %v2995_v30 }
0x172b   : > { %v3037_v13 = vsel %vm343_vm1, %v8003_v10, 0 }
0x172d   : > { %3022 = vrot.lane.b32.xlu0 %v2995_v30, %s7222_s11 }
0x1766   : > { %v2757_v60 = vpop.xlane.xlu0 %2756 }
0x1767   : > { %v2758_v40 = vmul.f32 0.03125, %v2757_v60 }
0x1768   : > { %v2761_v61 = vpop.xlane.xlu1 %2760 }
0x1769   : > { %v2763_v62 = vmul.f32 %v2758_v40, %v2758_v40  ;;  %v2762_v51 = vmul.f32 0.03125, %v2761_v61  ;;  %v2768_v4 = vsub.f32 %v2754_v41, %v2758_v40 }
0x176b   : > { %v2764_v63 = vsub.f32 %v2762_v51, %v2763_v62 }
0x176d   : > { %v2765_v1 = vmax.f32 %v2764_v63, 0.0 }
0x176f   : > { %v2766_v2 = vadd.f32 1e-12, %v2765_v1 }
0x1771   : > { %7144 = vrsqrt.f32 %v2766_v2 }
0x177b   : > { %v7145_v59 = vpop.eup %7144 }
0x177c   : > { %v2769_v5 = vmul.f32 %v7145_v59, %v2768_v4 }
0x177e   : > { %v2774_v8 = vmul.f32 %v2773_v45, %v2769_v5 }
0x1780   : > { %v8001_v9 = vadd.f32 %v2778_v7, %v2774_v8 }
0x1782   : > { %v2796_v11 = vpack.c.bf16 %v8001_v9, %v8001_v9 }
0x1784   : > { %6560 = vmatmul.mubr.bf16.vlgmr.msra.gmra.mrb[80].mxu1 %v2796_v11 }
0x1785   : > { %6584 = vmatpush3.bf16.xpose.msra.mxu1 %v3037_v13  ;;  %6585 = vmatprep.mubr.msk.bf16.mxu1 %vm7221_vm0, %v7220_v0 }
0x1786   : > { %6595 = vmatprep.subr.bf16.mxu1 %v7220_v0 }
0x179b   : > { %v3017_v15 = vpop.permute.xlu0 %3016  ;;  %v3020_v24 = vpop.permute.xlu1 %3019 }
0x179c   : > { %v8012_v16 = vpack.c.bf16 %v3017_v15, %v3017_v15  ;;  %v8020_v26 = vpack.c.bf16 %v3020_v24, %v3020_v24 }
0x179e   : > { %v3083_v22 = vsel %vm343_vm1, %v8012_v16, 0  ;;  %v3129_v31 = vsel %vm343_vm1, %v8020_v26, 0 }
0x179f   : > { %6590 = vmatpush3.bf16.xpose.msra.mxu0 %v3083_v22  ;;  %v3023_v6 = vpop.permute.xlu0 %3022 }
0x17a0   : > { %6601 = vmatprep.subr.bf16.mxu0 %v7220_v0  ;;  %v8031_v32 = vpack.c.bf16 %v3023_v6, %v3023_v6 }
0x17a2   : > { %v3175_v17 = vsel %vm343_vm1, %v8031_v32, 0 }
0x1857   : > { %v2884_v57 = vpop.f32.mrb[80].mxu1 }
0x1858   : > { %v2885_v54 = vadd.f32 %v5839_v53, %v2884_v57  ;;  %v6561_v27 = vpop.f32.mrb[81].mxu1 }
0x1859   : > { %v2887_v28 = vpop.f32.mrb[82].mxu1 }
0x185a   : > { %v3025_v18 = vpack.c.bf16 %v2885_v54, %v2885_v54  ;;  %v6562_v29 = vpop.f32.mrb[83].mxu1  ;;  %3006 = vrot.lane.b32.xlu1 %v2885_v54, %s7223_s14  ;;  %3012 = vrot.lane.b32.xlu0 %v2885_v54, %s7222_s11 }
0x185c   : > { %6586 = vmatmul.mubr.msk.bf16.vlgmr.msra.gmra.mrb[84].mxu1 %vm343_vm1, %v3025_v18 }
0x185d   : > { %6596 = vmatpush3.bf16.xpose.msra.mxu1 %v3129_v31  ;;  %6597 = vmatprep.mubr.msk.bf16.mxu1 %vm7221_vm0, %v7220_v0 }
0x185e   : > { %3009 = vrot.lane.b32.xlu1 %v2885_v54, %s7224_s15  ;;  %6607 = vmatprep.subr.bf16.mxu1 %v7220_v0 }
0x18cc   : > { %v3007_v33 = vpop.permute.xlu1 %3006  ;;  %v3013_v19 = vpop.permute.xlu0 %3012 }
0x18cd   : > { %v3026_v35 = vpack.c.bf16 %v3007_v33, %v3007_v33  ;;  %v3028_v37 = vpack.c.bf16 %v3013_v19, %v3013_v19 }
0x18cf   : > { %6592 = vmatmul.mubr.msk.bf16.vlgmr.msra.gmra.mrb[60].mxu0 %vm343_vm1, %v3026_v35 }
0x18d0   : > { %6602 = vmatpush3.bf16.xpose.msra.mxu0 %v3175_v17  ;;  %v3010_v25 = vpop.permute.xlu1 %3009  ;;  %6603 = vmatprep.mubr.msk.bf16.mxu0 %vm7221_vm0, %v7220_v0 }
0x18d1   : > { %v3027_v36 = vpack.c.bf16 %v3010_v25, %v3010_v25  ;;  %6613 = vmatprep.subr.bf16.mxu0 %v7220_v0 }
0x18d3   : > { %6598 = vmatmul.mubr.msk.bf16.vlgmr.msra.gmra.mrb[88].mxu1 %vm343_vm1, %v3027_v36 }
0x18d4   : > { %6609 = vmatprep.mubr.msk.bf16.mxu1 %vm7221_vm0, %v7220_v0 }
0x18d7   : > { %6604 = vmatmul.mubr.msk.bf16.vlgmr.msra.gmra.mrb[64].mxu0 %vm343_vm1, %v3028_v37 }
0x18d8   : > { %6615 = vmatprep.mubr.msk.bf16.mxu0 %vm7221_vm0, %v7220_v0 }
0x192f   : > { %v3073_v39 = vpop.f32.mrb[84].mxu1 }
0x1930   : > { %v3217_v41 = vmul.f32 0.35355338, %v3073_v39  ;;  %v6587_v43 = vpop.f32.mrb[85].mxu1 }
0x1931   : > { %v3076_v44 = vpop.f32.mrb[86].mxu1 }
0x1932   : > { %v6588_v46 = vpop.f32.mrb[87].mxu1  ;;  %v3221_v47 = vadd.f32 %v3217_v41, %v7374_v56 }
0x1934   : > { %v3225_v12 = vsel %vm343_vm1, %v3221_v47, -inf }
0x1935   : > { %3226 = vmax.xlane.f32.xlu1 %v3225_v12 }
0x19a2   : > { %v3119_v48 = vpop.f32.mrb[60].mxu0 }
0x19a3   : > { %v3218_v38 = vmul.f32 0.35355338, %v3119_v48  ;;  %v6593_v49 = vpop.f32.mrb[61].mxu0 }
0x19a4   : > { %v3122_v50 = vpop.f32.mrb[62].mxu0 }
0x19a5   : > { %v6594_v52 = vpop.f32.mrb[63].mxu0  ;;  %v3222_v30 = vadd.f32 %v3218_v38, %v7374_v56 }
0x19a6   : > { %v3165_v55 = vpop.f32.mrb[88].mxu1 }
0x19a7   : > { %v3219_v42 = vmul.f32 0.35355338, %v3165_v55  ;;  %v6599_v58 = vpop.f32.mrb[89].mxu1  ;;  %v3228_v60 = vsel %vm343_vm1, %v3222_v30, -inf }
0x19a8   : > { %v3168_v40 = vpop.f32.mrb[90].mxu1  ;;  %3229 = vmax.xlane.f32.xlu0 %v3228_v60 }
0x19a9   : > { %v6600_v61 = vpop.f32.mrb[91].mxu1  ;;  %v3223_v62 = vadd.f32 %v3219_v42, %v7374_v56 }
0x19aa   : > { %v3211_v51 = vpop.f32.mrb[64].mxu0 }
0x19ab   : > { %v3220_v63 = vmul.f32 0.35355338, %v3211_v51  ;;  %v6605_v1 = vpop.f32.mrb[65].mxu0  ;;  %v3231_v2 = vsel %vm343_vm1, %v3223_v62, -inf  ;;  %v7010_v51 = vld [vmem:[%s8639_s1 + $0x270] sm:$0xff]  }
0x19ac   : > { %3232 = vmax.xlane.f32.xlu0 %v3231_v2  ;;  %v3214_v3 = vpop.f32.mrb[66].mxu0 }
0x19ad   : > { %v6606_v4 = vpop.f32.mrb[67].mxu0  ;;  %v3224_v45 = vadd.f32 %v3220_v63, %v7374_v56  ;;  %v7011_v63 = vld [vmem:[%s8639_s1 + $0x278] sm:$0xff]  }
0x19af   : > { %v3234_v59 = vsel %vm343_vm1, %v3224_v45, -inf }
0x19b0   : > { %3235 = vmax.xlane.f32.xlu1 %v3234_v59 }
0x19c1   : > { %3323 = vrot.lane.b32.xlu1 %v8012_v16, %s7225_s16 }
0x19c2   : > { %3274 = vrot.lane.b32.xlu0 %v8003_v10, %s7225_s16  ;;  %v3227_v5 = vpop.xlane.xlu1 %3226 }
0x19c3   : > { %v3237_v7 = vsub.f32 %v3221_v47, %v3227_v5 }
0x19c5   : > { %v3241_v8 = vmul.f32 1.442695, %v3237_v7 }
0x19c7   : > { %7146 = vpow2.f32 %v3241_v8 }
0x19d1   : > { %v7147_v11 = vpop.eup %7146 }
0x19d2   : > { %v3249_v13 = vsel %vm343_vm1, %v7147_v11, 0.0 }
0x19e1   : > { %3250 = vadd.xlane.f32.xlu0 %v3249_v13 }
0x1a35   : > { %v3230_v15 = vpop.xlane.xlu0 %3229 }
0x1a36   : > { %v3238_v22 = vsub.f32 %v3222_v30, %v3230_v15 }
0x1a38   : > { %v3243_v24 = vmul.f32 1.442695, %v3238_v22 }
0x1a39   : > { %v3233_v53 = vpop.xlane.xlu0 %3232 }
0x1a3a   : > { %7148 = vpow2.f32 %v3243_v24  ;;  %v3239_v57 = vsub.f32 %v3223_v62, %v3233_v53 }
0x1a3c   : > { %v3245_v54 = vmul.f32 1.442695, %v3239_v57 }
0x1a3d   : > { %v3275_v27 = vpop.permute.xlu0 %3274  ;;  %v3236_v16 = vpop.xlane.xlu1 %3235 }
0x1a3e   : > { %7150 = vpow2.f32 %v3245_v54  ;;  %v3280_v10 = vsel %vm602_vm2, %v3275_v27, 0  ;;  %v3240_v28 = vsub.f32 %v3224_v45, %v3236_v16 }
0x1a3f   : > { %6608 = vmatpush3.bf16.msra.mxu1 %v3280_v10  ;;  %v7012_v10 = vld [vmem:[%s8639_s1 + $0x280] sm:$0xff]  }
0x1a40   : > { %v3247_v18 = vmul.f32 1.442695, %v3240_v28  ;;  %6619 = vmatprep.subr.bf16.mxu1 %v7220_v0  ;;  %v5865_v28 = vld [vmem:[%s8638_s0 + $0x1a] ss:$0 sm:$0xff] }
0x1a41   : > { %v3324_v29 = vpop.permute.xlu1 %3323 }
0x1a42   : > { %7152 = vpow2.f32 %v3247_v18  ;;  %v3329_v31 = vsel %vm602_vm2, %v3324_v29, 0 }
0x1a43   : > { %6614 = vmatpush3.bf16.msra.mxu0 %v3329_v31 }
0x1a44   : > { %v7149_v6 = vpop.eup %7148  ;;  %6625 = vmatprep.subr.bf16.mxu0 %v7220_v0 }
0x1a45   : > { %v3252_v33 = vsel %vm343_vm1, %v7149_v6, 0.0 }
0x1a46   : > { %3253 = vadd.xlane.f32.xlu1 %v3252_v33 }
0x1a48   : > { %v7151_v35 = vpop.eup %7150 }
0x1a49   : > { %v3255_v17 = vsel %vm343_vm1, %v7151_v35, 0.0 }
0x1a4a   : > { %3256 = vadd.xlane.f32.xlu0 %v3255_v17 }
0x1a4c   : > { %v7153_v25 = vpop.eup %7152 }
0x1a4d   : > { %v3258_v36 = vsel %vm343_vm1, %v7153_v25, 0.0 }
0x1a4e   : > { %3259 = vadd.xlane.f32.xlu1 %v3258_v36  ;;  %v7014_v36 = vld [vmem:[%s8639_s1 + $0x290] sm:$0xff]  }
0x1a5f   : > { %3372 = vrot.lane.b32.xlu1 %v8020_v26, %s7225_s16 }
0x1a60   : > { %3421 = vrot.lane.b32.xlu0 %v8031_v32, %s7225_s16 }
0x1a6e   : > { %v3251_v19 = vpop.xlane.xlu0 %3250 }
0x1a6f   : > { %7154 = vrcp.f32 %v3251_v19  ;;  %v7016_v19 = vld [vmem:[%s8639_s1 + $0x2a0] sm:$0xff]  }
0x1a79   : > { %v7155_v37 = vpop.eup %7154 }
0x1a7a   : > { %v3262_v39 = vmul.f32 %v7155_v37, %v7147_v11  ;;  %v7017_v37 = vld [vmem:[%s8639_s1 + $0x2a8] sm:$0xff]  }
0x1a7c   : > { %v3269_v41 = vpack.c.bf16 %v3262_v39, %v3262_v39  ;;  %v7018_v39 = vld [vmem:[%s8639_s1 + $0x2b0] sm:$0xff]  }
0x1a7e   : > { %6610 = vmatmul.mubr.msk.bf16.vlgmr.msra.gmra.mrb[92].mxu1 %vm343_vm1, %v3269_v41  ;;  %v7019_v41 = vld [vmem:[%s8639_s1 + $0x2b8] sm:$0xff]  }
0x1a7f   : > { %6621 = vmatprep.mubr.msk.bf16.mxu1 %vm7221_vm0, %v7220_v0 }
0x1ad3   : > { %v3254_v43 = vpop.xlane.xlu1 %3253 }
0x1ad4   : > { %7156 = vrcp.f32 %v3254_v43 }
0x1ad7   : > { %v3257_v44 = vpop.xlane.xlu0 %3256 }
0x1ad8   : > { %7158 = vrcp.f32 %v3257_v44 }
0x1adb   : > { %v3260_v46 = vpop.xlane.xlu1 %3259  ;;  %v3422_v32 = vpop.permute.xlu0 %3421 }
0x1adc   : > { %7160 = vrcp.f32 %v3260_v46  ;;  %v3427_v52 = vsel %vm602_vm2, %v3422_v32, 0 }
0x1ade   : > { %v7157_v26 = vpop.eup %7156 }
0x1adf   : > { %v3264_v47 = vmul.f32 %v7157_v26, %v7149_v6  ;;  %v3373_v12 = vpop.permute.xlu1 %3372 }
0x1ae0   : > { %v3378_v48 = vsel %vm602_vm2, %v3373_v12, 0 }
0x1ae1   : > { %6620 = vmatpush3.bf16.msra.mxu1 %v3378_v48  ;;  %v3270_v38 = vpack.c.bf16 %v3264_v47, %v3264_v47 }
0x1ae2   : > { %v7159_v49 = vpop.eup %7158  ;;  %6631 = vmatprep.subr.bf16.mxu1 %v7220_v0 }
0x1ae3   : > { %v3266_v50 = vmul.f32 %v7159_v49, %v7151_v35  ;;  %6616 = vmatmul.mubr.msk.bf16.vlgmr.msra.gmra.mrb[68].mxu0 %vm343_vm1, %v3270_v38  ;;  %v3545_v38 = vld [vmem:[%s8638_s0 + $0x1b] sm:$0x3] }
0x1ae4   : > { %6626 = vmatpush3.bf16.msra.mxu0 %v3427_v52  ;;  %6627 = vmatprep.mubr.msk.bf16.mxu0 %vm7221_vm0, %v7220_v0 }
0x1ae5   : > { %v3271_v30 = vpack.c.bf16 %v3266_v50, %v3266_v50  ;;  %6639 = vmatprep.subr.bf16.mxu0 %v7220_v0  ;;  %v3563_v50 = vrot.slane %v3545_v38, %v7310_v21 }
0x1ae6   : > { %v7161_v55 = vpop.eup %7160 }
0x1ae7   : > { %v3268_v42 = vmul.f32 %v7161_v55, %v7153_v25  ;;  %6622 = vmatmul.mubr.msk.bf16.vlgmr.msra.gmra.mrb[96].mxu1 %vm343_vm1, %v3271_v30  ;;  %v7013_v25 = vld [vmem:[%s8639_s1 + $0x288] sm:$0xff]   ;;  %v3568_v55 = vrot.slane %v3545_v38, %v7316_v23  ;;  %v3801_v38 = vld [vmem:[%s8638_s0 + $0x1f] sm:$0x3] }
0x1ae8   : > { %6635 = vmatprep.mubr.msk.bf16.mxu1 %vm7221_vm0, %v7220_v0  ;;  %6632 = vmatpush3.bf16.msra.mxu1 %v7010_v51  ;;  %v7023_v51 = vld [vmem:[%s8639_s1 + $0x2d8] sm:$0xff]  }
0x1ae9   : > { %v3272_v58 = vpack.c.bf16 %v3268_v42, %v3268_v42  ;;  %6633 = vmatprep.subr.bf16.mxu1 %v7220_v0 }
0x1aeb   : > { %6628 = vmatmul.mubr.msk.bf16.vlgmr.msra.gmra.mrb[72].mxu0 %vm343_vm1, %v3272_v58 }
0x1aec   : > { %6655 = vmatprep.mubr.msk.bf16.mxu0 %vm7221_vm0, %v7220_v0  ;;  %6634 = vmatpush3.bf16.msra.mxu1 %v7011_v63  ;;  %v7024_v63 = vld [vmem:[%s8639_s1 + $0x2e0] sm:$0xff]  }
0x1aed   : > { %6659 = vmatprep.subr.bf16.mxu1 %v7220_v0  ;;  %6640 = vmatpush3.bf16.msra.mxu0 %v7012_v10 }
0x1aee   : > { %6641 = vmatprep.subr.bf16.mxu0 %v7220_v0 }
0x1af1   : > { %6642 = vmatpush3.bf16.msra.mxu0 %v7013_v25  ;;  %v7029_v25 = vld [vmem:[%s8639_s1 + $0x308] sm:$0xff]  }
0x1af2   : > { %6643 = vmatprep.subr.bf16.mxu0 %v7220_v0 }
0x1af5   : > { %6644 = vmatpush3.bf16.msra.mxu0 %v7014_v36  ;;  %v7030_v36 = vld [vmem:[%s8639_s1 + $0x310] sm:$0xff]  }
0x1af6   : > { %6645 = vmatprep.subr.bf16.mxu0 %v7220_v0 }
0x1b51   : > { %v3316_v60 = vpop.f32.mrb[92].mxu1 }
0x1b52   : > { %v6611_v40 = vpop.f32.mrb[93].mxu1 }
0x1b53   : > { %v3319_v61 = vpop.f32.mrb[94].mxu1  ;;  %v7020_v40 = vld [vmem:[%s8639_s1 + $0x2c0] sm:$0xff]  }
0x1b54   : > { %v6612_v62 = vpop.f32.mrb[95].mxu1  ;;  %v7021_v61 = vld [vmem:[%s8639_s1 + $0x2c8] sm:$0xff]  }
0x1b55   : > { %v7022_v62 = vld [vmem:[%s8639_s1 + $0x2d0] sm:$0xff]  }
0x1bb6   : > { %v3365_v1 = vpop.f32.mrb[68].mxu0 }
0x1bb7   : > { %3470 = vrot.lane.b32.xlu1 %v3365_v1, %s7227_s21  ;;  %v6617_v2 = vpop.f32.mrb[69].mxu0  ;;  %v7025_v1 = vld [vmem:[%s8639_s1 + $0x2e8] sm:$0xff]  }
0x1bb8   : > { %v3368_v3 = vpop.f32.mrb[70].mxu0  ;;  %v7026_v2 = vld [vmem:[%s8639_s1 + $0x2f0] sm:$0xff]  }
0x1bb9   : > { %v6618_v4 = vpop.f32.mrb[71].mxu0  ;;  %v7027_v3 = vld [vmem:[%s8639_s1 + $0x2f8] sm:$0xff]  }
0x1bba   : > { %v3414_v45 = vpop.f32.mrb[96].mxu1  ;;  %v5869_v4 = vld [vmem:[%s8638_s0 + $0x1d] ss:$0 sm:$0xff] }
0x1bbb   : > { %3474 = vrot.lane.b32.xlu0 %v3414_v45, %s7228_s24  ;;  %v6623_v59 = vpop.f32.mrb[97].mxu1 }
0x1bbc   : > { %v3417_v5 = vpop.f32.mrb[98].mxu1 }
0x1bbd   : > { %v6624_v7 = vpop.f32.mrb[99].mxu1 }
0x1bbe   : > { %v3463_v8 = vpop.f32.mrb[72].mxu0 }
0x1bbf   : > { %3478 = vrot.lane.b32.xlu1 %v3463_v8, %s7229_s25  ;;  %v6629_v11 = vpop.f32.mrb[73].mxu0 }
0x1bc0   : > { %v3466_v13 = vpop.f32.mrb[74].mxu0 }
0x1bc1   : > { %v6630_v15 = vpop.f32.mrb[75].mxu0 }
0x1c29   : > { %v3471_v22 = vpop.permute.xlu1 %3470 }
0x1c2a   : > { %v3481_v53 = vsel %vm343_vm1, %v3316_v60, %v3471_v22 }
0x1c2d   : > { %v3475_v24 = vpop.permute.xlu0 %3474 }
0x1c2e   : > { %v3482_v57 = vsel %vm803_vm3, %v3481_v53, %v3475_v24 }
0x1c31   : > { %v3479_v54 = vpop.permute.xlu1 %3478 }
0x1c32   : > { %v3483_v27 = vsel %vm805_vm4, %v3482_v57, %v3479_v54 }
0x1c33   : > { %v3484_v16 = vpack.c.bf16 %v3483_v27, %v3483_v27 }
0x1c35   : > { %6636 = vmatmul.mubr.msk.bf16.vlgmr.msra.gmra.mrb[100].mxu1 %vm824_vm5, %v3484_v16 }
0x1c36   : > { %6675 = vmatprep.mubr.msk.bf16.mxu1 %vm7221_vm0, %v7220_v0  ;;  %6660 = vmatpush3.bf16.msra.mxu1 %v7020_v40  ;;  %v5887_v40 = vld [vmem:[%s8638_s0 + $0x21] ss:$0 sm:$0xff] }
0x1c37   : > { %6661 = vmatprep.subr.bf16.mxu1 %v7220_v0 }
0x1c3a   : > { %6662 = vmatpush3.bf16.msra.mxu1 %v7021_v61 }
0x1c3b   : > { %6663 = vmatprep.subr.bf16.mxu1 %v7220_v0 }
0x1c3e   : > { %6664 = vmatpush3.bf16.msra.mxu1 %v7022_v62 }
0x1c3f   : > { %6665 = vmatprep.subr.bf16.mxu1 %v7220_v0 }
0x1c42   : > { %6666 = vmatpush3.bf16.msra.mxu1 %v7023_v51 }
0x1c43   : > { %6667 = vmatprep.subr.bf16.mxu1 %v7220_v0 }
0x1c46   : > { %6668 = vmatpush3.bf16.msra.mxu1 %v7024_v63 }
0x1c47   : > { %6669 = vmatprep.subr.bf16.mxu1 %v7220_v0 }
0x1c4a   : > { %6670 = vmatpush3.bf16.msra.mxu1 %v7025_v1 }
0x1c4b   : > { %6671 = vmatprep.subr.bf16.mxu1 %v7220_v0 }
0x1c4e   : > { %6672 = vmatpush3.bf16.msra.mxu1 %v7026_v2 }
0x1c4f   : > { %6673 = vmatprep.subr.bf16.mxu1 %v7220_v0 }
0x1c52   : > { %6674 = vmatpush3.bf16.msra.mxu1 %v7027_v3 }
0x1c53   : > { %6699 = vmatprep.subr.bf16.mxu1 %v7220_v0 }
0x1d08   : > { %v3538_v18 = vpop.f32.mrb[100].mxu1 }
0x1d09   : > { %v3539_v29 = vadd.f32 %v5865_v28, %v3538_v18  ;;  %v6637_v31 = vpop.f32.mrb[101].mxu1  ;;  %v5886_v28 = vld [vmem:[%s8638_s0 + $0x1e] ss:$0 sm:$0xff] }
0x1d0a   : > { %v3541_v6 = vpop.f32.mrb[102].mxu1 }
0x1d0b   : > { %v3544_v33 = vadd.f32 %v3539_v29, %v8001_v9  ;;  %v6638_v35 = vpop.f32.mrb[103].mxu1  ;;  %v7015_v9 = vld [vmem:[%s8639_s1 + $0x298] sm:$0xff]  }
0x1d0c   : > { %6646 = vmatpush3.bf16.msra.mxu0 %v7015_v9  ;;  %v7031_v9 = vld [vmem:[%s8639_s1 + $0x318] sm:$0xff]  }
0x1d0d   : > { %3546 = vadd.xlane.f32.xlu0 %v3544_v33  ;;  %v3549_v17 = vmul.f32 %v3544_v33, %v3544_v33  ;;  %6647 = vmatprep.subr.bf16.mxu0 %v7220_v0 }
0x1d0f   : > { %3550 = vadd.xlane.f32.xlu1 %v3549_v17  ;;  %v7028_v17 = vld [vmem:[%s8639_s1 + $0x300] sm:$0xff]  }
0x1d10   : > { %6648 = vmatpush3.bf16.msra.mxu0 %v7016_v19  ;;  %v7032_v19 = vld [vmem:[%s8639_s1 + $0x320] sm:$0xff]  }
0x1d11   : > { %6649 = vmatprep.subr.bf16.mxu0 %v7220_v0 }
0x1d14   : > { %6650 = vmatpush3.bf16.msra.mxu0 %v7017_v37  ;;  %v7033_v37 = vld [vmem:[%s8639_s1 + $0x328] sm:$0xff]  }
0x1d15   : > { %6651 = vmatprep.subr.bf16.mxu0 %v7220_v0 }
0x1d18   : > { %6652 = vmatpush3.bf16.msra.mxu0 %v7018_v39  ;;  %v7034_v39 = vld [vmem:[%s8639_s1 + $0x330] sm:$0xff]  }
0x1d19   : > { %6653 = vmatprep.subr.bf16.mxu0 %v7220_v0 }
0x1d1c   : > { %6654 = vmatpush3.bf16.msra.mxu0 %v7019_v41  ;;  %v7035_v41 = vld [vmem:[%s8639_s1 + $0x338] sm:$0xff]  }
0x1d1d   : > { %6679 = vmatprep.subr.bf16.mxu0 %v7220_v0 }
0x1d9a   : > { %v3547_v43 = vpop.xlane.xlu0 %3546 }
0x1d9b   : > { %v3548_v44 = vmul.f32 0.03125, %v3547_v43 }
0x1d9c   : > { %v3551_v46 = vpop.xlane.xlu1 %3550 }
0x1d9d   : > { %v3553_v26 = vmul.f32 %v3548_v44, %v3548_v44  ;;  %v3552_v47 = vmul.f32 0.03125, %v3551_v46  ;;  %v3558_v49 = vsub.f32 %v3544_v33, %v3548_v44 }
0x1d9f   : > { %v3554_v12 = vsub.f32 %v3552_v47, %v3553_v26 }
0x1da1   : > { %v3555_v32 = vmax.f32 %v3554_v12, 0.0 }
0x1da3   : > { %v3556_v48 = vadd.f32 1e-12, %v3555_v32 }
0x1da5   : > { %7162 = vrsqrt.f32 %v3556_v48 }
0x1daf   : > { %v7163_v52 = vpop.eup %7162 }
0x1db0   : > { %v3559_v30 = vmul.f32 %v7163_v52, %v3558_v49 }
0x1db2   : > { %v3564_v42 = vmul.f32 %v3563_v50, %v3559_v30  ;;  %v3819_v50 = vrot.slane %v3801_v38, %v7310_v21 }
0x1db4   : > { %v3569_v58 = vadd.f32 %v3568_v55, %v3564_v42  ;;  %v3824_v55 = vrot.slane %v3801_v38, %v7316_v23 }
0x1db6   : > { %v3586_v60 = vpack.c.bf16 %v3569_v58, %v3569_v58 }
0x1db8   : > { %6656 = vmatmul.mubr.bf16.vlgmr.msra.gmra.mrb[76].mxu0 %v3586_v60 }
0x1db9   : > { %6695 = vmatprep.mubr.msk.bf16.mxu0 %vm7221_vm0, %v7220_v0  ;;  %6680 = vmatpush3.bf16.msra.mxu0 %v7028_v17 }
0x1dba   : > { %6681 = vmatprep.subr.bf16.mxu0 %v7220_v0 }
0x1dbd   : > { %6682 = vmatpush3.bf16.msra.mxu0 %v7029_v25 }
0x1dbe   : > { %6683 = vmatprep.subr.bf16.mxu0 %v7220_v0 }
0x1dc1   : > { %6684 = vmatpush3.bf16.msra.mxu0 %v7030_v36 }
0x1dc2   : > { %6685 = vmatprep.subr.bf16.mxu0 %v7220_v0 }
0x1dc5   : > { %6686 = vmatpush3.bf16.msra.mxu0 %v7031_v9 }
0x1dc6   : > { %6687 = vmatprep.subr.bf16.mxu0 %v7220_v0 }
0x1dc9   : > { %6688 = vmatpush3.bf16.msra.mxu0 %v7032_v19 }
0x1dca   : > { %6689 = vmatprep.subr.bf16.mxu0 %v7220_v0 }
0x1dcd   : > { %6690 = vmatpush3.bf16.msra.mxu0 %v7033_v37 }
0x1dce   : > { %6691 = vmatprep.subr.bf16.mxu0 %v7220_v0 }
0x1dd1   : > { %6692 = vmatpush3.bf16.msra.mxu0 %v7034_v39 }
0x1dd2   : > { %6693 = vmatprep.subr.bf16.mxu0 %v7220_v0 }
0x1dd5   : > { %6694 = vmatpush3.bf16.msra.mxu0 %v7035_v41 }
0x1dd6   : > { %6723 = vmatprep.subr.bf16.mxu0 %v7220_v0 }
0x1e8b   : > { %v3674_v45 = vpop.f32.mrb[76].mxu0 }
0x1e8c   : > { %v3675_v59 = vadd.f32 %v5869_v4, %v3674_v45  ;;  %v6657_v5 = vpop.f32.mrb[77].mxu0 }
0x1e8d   : > { %v3677_v7 = vpop.f32.mrb[78].mxu0 }
0x1e8e   : > { %v3680_v8 = vmul.f32 %v3675_v59, %v3675_v59  ;;  %v6658_v11 = vpop.f32.mrb[79].mxu0 }
0x1e90   : > { %v3681_v13 = vmul.f32 %v3680_v8, %v3675_v59 }
0x1e92   : > { %v3682_v15 = vmul.f32 0.044715, %v3681_v13 }
0x1e94   : > { %v3683_v22 = vadd.f32 %v3682_v15, %v3675_v59 }
0x1e96   : > { %v3684_v24 = vmul.f32 0.7978846, %v3683_v22 }
0x1e98   : > { %7164 = vtanh.f32 %v3684_v24 }
0x1ea2   : > { %v7165_v53 = vpop.eup %7164 }
0x1ea3   : > { %v3686_v57 = vadd.f32 1.0, %v7165_v53 }
0x1ea5   : > { %v3687_v54 = vmul.f32 0.5, %v3686_v57 }
0x1ea7   : > { %v3688_v27 = vmul.f32 %v3687_v54, %v3675_v59 }
0x1ea9   : > { %v3705_v16 = vpack.c.bf16 %v3688_v27, %v3688_v27 }
0x1eab   : > { %6676 = vmatmul.mubr.bf16.vlgmr.msra.gmra.mrb[104].mxu1 %v3705_v16 }
0x1eac   : > { %6701 = vmatprep.mubr.msk.bf16.mxu1 %vm7221_vm0, %v7220_v0 }
0x1f7e   : > { %v3788_v10 = vpop.f32.mrb[104].mxu1 }
0x1f7f   : > { %v3794_v18 = vadd.f32 %v3788_v10, %v3569_v58  ;;  %v6677_v29 = vpop.f32.mrb[105].mxu1 }
0x1f80   : > { %v3791_v31 = vpop.f32.mrb[106].mxu1 }
0x1f81   : > { %v3800_v6 = vadd.f32 %v5886_v28, %v3794_v18  ;;  %v6678_v33 = vpop.f32.mrb[107].mxu1 }
0x1f83   : > { %3802 = vadd.xlane.f32.xlu0 %v3800_v6  ;;  %v3805_v35 = vmul.f32 %v3800_v6, %v3800_v6 }
0x1f87   : > { %3806 = vadd.xlane.f32.xlu0 %v3805_v35 }
0x2010   : > { %v3803_v43 = vpop.xlane.xlu0 %3802 }
0x2011   : > { %v3804_v44 = vmul.f32 0.03125, %v3803_v43 }
0x2013   : > { %v3809_v26 = vmul.f32 %v3804_v44, %v3804_v44  ;;  %v3814_v49 = vsub.f32 %v3800_v6, %v3804_v44 }
0x2014   : > { %v3807_v46 = vpop.xlane.xlu0 %3806 }
0x2015   : > { %v3808_v47 = vmul.f32 0.03125, %v3807_v46 }
0x2017   : > { %v3810_v12 = vsub.f32 %v3808_v47, %v3809_v26 }
0x2019   : > { %v3811_v32 = vmax.f32 %v3810_v12, 0.0 }
0x201b   : > { %v3812_v48 = vadd.f32 1e-12, %v3811_v32 }
0x201d   : > { %7166 = vrsqrt.f32 %v3812_v48 }
0x2027   : > { %v7167_v52 = vpop.eup %7166 }
0x2028   : > { %v3815_v30 = vmul.f32 %v7167_v52, %v3814_v49 }
0x202a   : > { %v3820_v42 = vmul.f32 %v3819_v50, %v3815_v30 }
0x202c   : > { %v8222_v58 = vadd.f32 %v3824_v55, %v3820_v42 }
0x202e   : > { %v3842_v60 = vpack.c.bf16 %v8222_v58, %v8222_v58 }
0x2030   : > { %6696 = vmatmul.mubr.bf16.vlgmr.msra.gmra.mrb[80].mxu0 %v3842_v60 }
0x2031   : > { %6725 = vmatprep.mubr.msk.bf16.mxu0 %vm7221_vm0, %v7220_v0 }
0x2103   : > { %v3930_v61 = vpop.f32.mrb[80].mxu0 }
0x2104   : > { %v3931_v62 = vadd.f32 %v5887_v40, %v3930_v61  ;;  %v6697_v51 = vpop.f32.mrb[81].mxu0 }
0x2105   : > { %v3933_v63 = vpop.f32.mrb[82].mxu0 }
0x2106   : > { %3945 = vrot.lane.b32.xlu0 %v3931_v62, %s7224_s15  ;;  %3942 = vrot.lane.b32.xlu1 %v3931_v62, %s7223_s14  ;;  %v6698_v1 = vpop.f32.mrb[83].mxu0  ;;  %v8234_v2 = vpack.c.bf16 %v3931_v62, %v3931_v62 }
0x210a   : > { %3948 = vrot.lane.b32.xlu1 %v3931_v62, %s7222_s11 }
0x210e   : > { %3956 = vrot.lane.b32.xlu1 %v8234_v2, %s7225_s16 }
0x2178   : > { %v3946_v3 = vpop.permute.xlu0 %3945  ;;  %v3943_v4 = vpop.permute.xlu1 %3942 }
0x2179   : > { %v8238_v45 = vpack.c.bf16 %v3946_v3, %v3946_v3  ;;  %v3952_v59 = vpack.c.bf16 %v3943_v4, %v3943_v4 }
0x217b   : > { %4005 = vrot.lane.b32.xlu0 %v3952_v59, %s7225_s16  ;;  %4054 = vrot.lane.b32.xlu1 %v8238_v45, %s7225_s16 }
0x217c   : > { %v3949_v5 = vpop.permute.xlu1 %3948 }
0x217d   : > { %v8243_v7 = vpack.c.bf16 %v3949_v5, %v3949_v5 }
0x217f   : > { %4103 = vrot.lane.b32.xlu0 %v8243_v7, %s7225_s16 }
0x2180   : > { %v3957_v8 = vpop.permute.xlu1 %3956 }
0x2181   : > { %v3962_v11 = vsel %vm343_vm1, %v3957_v8, 0 }
0x2182   : > { %6700 = vmatpush3.bf16.xpose.msra.mxu1 %v3962_v11 }
0x2183   : > { %6705 = vmatprep.subr.bf16.mxu1 %v7220_v0 }
0x2189   : > { %6702 = vmatmul.mubr.msk.bf16.vlgmr.msra.gmra.mrb[108].mxu1 %vm343_vm1, %v8234_v2 }
0x218a   : > { %6707 = vmatprep.mubr.msk.bf16.mxu1 %vm7221_vm0, %v7220_v0 }
0x21ed   : > { %v4006_v13 = vpop.permute.xlu0 %4005  ;;  %v4055_v22 = vpop.permute.xlu1 %4054 }
0x21ee   : > { %v4011_v15 = vsel %vm343_vm1, %v4006_v13, 0  ;;  %v4060_v24 = vsel %vm343_vm1, %v4055_v22, 0 }
0x21ef   : > { %6706 = vmatpush3.bf16.xpose.msra.mxu1 %v4011_v15 }
0x21f0   : > { %6711 = vmatprep.subr.bf16.mxu1 %v7220_v0 }
0x21f1   : > { %v4104_v53 = vpop.permute.xlu0 %4103 }
0x21f2   : > { %v4109_v57 = vsel %vm343_vm1, %v4104_v53, 0 }
0x21f6   : > { %6708 = vmatmul.mubr.msk.bf16.vlgmr.msra.gmra.mrb[112].mxu1 %vm343_vm1, %v3952_v59 }
0x21f7   : > { %6712 = vmatpush3.bf16.xpose.msra.mxu1 %v4060_v24  ;;  %6713 = vmatprep.mubr.msk.bf16.mxu1 %vm7221_vm0, %v7220_v0 }
0x21f8   : > { %6717 = vmatprep.subr.bf16.mxu1 %v7220_v0 }
0x21fe   : > { %6714 = vmatmul.mubr.msk.bf16.vlgmr.msra.gmra.mrb[116].mxu1 %vm343_vm1, %v8238_v45 }
0x21ff   : > { %6718 = vmatpush3.bf16.xpose.msra.mxu1 %v4109_v57  ;;  %6719 = vmatprep.mubr.msk.bf16.mxu1 %vm7221_vm0, %v7220_v0 }
0x2200   : > { %6729 = vmatprep.subr.bf16.mxu1 %v7220_v0 }
0x2206   : > { %6720 = vmatmul.mubr.msk.bf16.vlgmr.msra.gmra.mrb[120].mxu1 %vm343_vm1, %v8243_v7 }
0x2207   : > { %6731 = vmatprep.mubr.msk.bf16.mxu1 %vm7221_vm0, %v7220_v0 }
0x225c   : > { %v3998_v54 = vpop.f32.mrb[108].mxu1 }
0x225d   : > { %v4151_v27 = vmul.f32 0.35355338, %v3998_v54  ;;  %v6703_v16 = vpop.f32.mrb[109].mxu1 }
0x225e   : > { %v4001_v10 = vpop.f32.mrb[110].mxu1 }
0x225f   : > { %v4155_v28 = vadd.f32 %v4151_v27, %v7848_v14  ;;  %v6704_v18 = vpop.f32.mrb[111].mxu1 }
0x2261   : > { %v4159_v29 = vsel %vm343_vm1, %v4155_v28, -inf }
0x2262   : > { %4160 = vmax.xlane.f32.xlu1 %v4159_v29 }
0x22c9   : > { %v4047_v31 = vpop.f32.mrb[112].mxu1 }
0x22ca   : > { %v4152_v6 = vmul.f32 0.35355338, %v4047_v31  ;;  %v6709_v33 = vpop.f32.mrb[113].mxu1 }
0x22cb   : > { %v4050_v35 = vpop.f32.mrb[114].mxu1 }
0x22cc   : > { %v4156_v17 = vadd.f32 %v4152_v6, %v7848_v14  ;;  %v6710_v25 = vpop.f32.mrb[115].mxu1 }
0x22ce   : > { %v4162_v36 = vsel %vm343_vm1, %v4156_v17, -inf }
0x22cf   : > { %4163 = vmax.xlane.f32.xlu0 %v4162_v36 }
0x22d1   : > { %v4096_v9 = vpop.f32.mrb[116].mxu1 }
0x22d2   : > { %v4153_v19 = vmul.f32 0.35355338, %v4096_v9  ;;  %v6715_v37 = vpop.f32.mrb[117].mxu1 }
0x22d3   : > { %v4099_v39 = vpop.f32.mrb[118].mxu1 }
0x22d4   : > { %v4157_v41 = vadd.f32 %v4153_v19, %v7848_v14  ;;  %v6716_v43 = vpop.f32.mrb[119].mxu1 }
0x22d5   : > { %v7036_v43 = vld [vmem:[%s8639_s1 + $0x340] sm:$0xff]  }
0x22d6   : > { %v4165_v44 = vsel %vm343_vm1, %v4157_v41, -inf }
0x22d7   : > { %4166 = vmax.xlane.f32.xlu0 %v4165_v44  ;;  %v7037_v44 = vld [vmem:[%s8639_s1 + $0x348] sm:$0xff]  }
0x22d9   : > { %v4145_v46 = vpop.f32.mrb[120].mxu1 }
0x22da   : > { %v4154_v26 = vmul.f32 0.35355338, %v4145_v46  ;;  %v6721_v47 = vpop.f32.mrb[121].mxu1 }
0x22db   : > { %v4148_v12 = vpop.f32.mrb[122].mxu1 }
0x22dc   : > { %v4158_v32 = vadd.f32 %v4154_v26, %v7848_v14  ;;  %v6722_v48 = vpop.f32.mrb[123].mxu1 }
0x22de   : > { %v4168_v38 = vsel %vm343_vm1, %v4158_v32, -inf }
0x22df   : > { %4169 = vmax.xlane.f32.xlu1 %v4168_v38 }
0x22ed   : > { %4207 = vrot.lane.b32.xlu0 %v8234_v2, %s7226_s18 }
0x22ef   : > { %v4161_v49 = vpop.xlane.xlu1 %4160 }
0x22f0   : > { %4255 = vrot.lane.b32.xlu1 %v3952_v59, %s7226_s18  ;;  %v4171_v50 = vsub.f32 %v4155_v28, %v4161_v49 }
0x22f2   : > { %v4175_v52 = vmul.f32 1.442695, %v4171_v50 }
0x22f4   : > { %7168 = vpow2.f32 %v4175_v52 }
0x22fe   : > { %v7169_v30 = vpop.eup %7168 }
0x22ff   : > { %v4183_v55 = vsel %vm343_vm1, %v7169_v30, 0.0 }
0x230c   : > { %4184 = vadd.xlane.f32.xlu0 %v4183_v55 }
0x235c   : > { %v4164_v42 = vpop.xlane.xlu0 %4163 }
0x235d   : > { %v4172_v60 = vsub.f32 %v4156_v17, %v4164_v42 }
0x235f   : > { %v4177_v14 = vmul.f32 1.442695, %v4172_v60 }
0x2361   : > { %7170 = vpow2.f32 %v4177_v14 }
0x2364   : > { %v4167_v40 = vpop.xlane.xlu0 %4166 }
0x2365   : > { %v4173_v61 = vsub.f32 %v4157_v41, %v4167_v40 }
0x2367   : > { %v4179_v62 = vmul.f32 1.442695, %v4173_v61 }
0x2368   : > { %v4208_v51 = vpop.permute.xlu0 %4207 }
0x2369   : > { %7172 = vpow2.f32 %v4179_v62  ;;  %v4213_v63 = vsel %vm602_vm2, %v4208_v51, 0  ;;  %v7038_v51 = vld [vmem:[%s8639_s1 + $0x390] sm:$0xff]  }
0x236a   : > { %6724 = vmatpush3.bf16.msra.mxu0 %v4213_v63 }
0x236b   : > { %v7171_v1 = vpop.eup %7170  ;;  %6735 = vmatprep.subr.bf16.mxu0 %v7220_v0 }
0x236c   : > { %v4170_v2 = vpop.xlane.xlu1 %4169  ;;  %v4186_v3 = vsel %vm343_vm1, %v7171_v1, 0.0 }
0x236d   : > { %v4174_v4 = vsub.f32 %v4158_v32, %v4170_v2  ;;  %4187 = vadd.xlane.f32.xlu1 %v4186_v3  ;;  %v7040_v2 = vld [vmem:[%s8639_s1 + $0x3a0] sm:$0xff]   ;;  %v7041_v3 = vld [vmem:[%s8639_s1 + $0x3a8] sm:$0xff]  }
0x236f   : > { %v4181_v59 = vmul.f32 1.442695, %v4174_v4  ;;  %v7042_v4 = vld [vmem:[%s8639_s1 + $0x3b0] sm:$0xff]  }
0x2370   : > { %v4256_v5 = vpop.permute.xlu1 %4255 }
0x2371   : > { %7174 = vpow2.f32 %v4181_v59  ;;  %v4261_v8 = vsel %vm602_vm2, %v4256_v5, 0  ;;  %v7043_v59 = vld [vmem:[%s8639_s1 + $0x3b8] sm:$0xff]   ;;  %v7044_v5 = vld [vmem:[%s8639_s1 + $0x3c0] sm:$0xff]  }
0x2372   : > { %6730 = vmatpush3.bf16.msra.mxu1 %v4261_v8  ;;  %v7045_v8 = vld [vmem:[%s8639_s1 + $0x3c8] sm:$0xff]  }
0x2373   : > { %v7173_v11 = vpop.eup %7172  ;;  %6741 = vmatprep.subr.bf16.mxu1 %v7220_v0 }
0x2374   : > { %v4189_v13 = vsel %vm343_vm1, %v7173_v11, 0.0 }
0x2375   : > { %4190 = vadd.xlane.f32.xlu0 %v4189_v13  ;;  %v7047_v13 = vld [vmem:[%s8639_s1 + $0x358] sm:$0xff]  }
0x237b   : > { %v7175_v15 = vpop.eup %7174 }
0x237c   : > { %v4192_v22 = vsel %vm343_vm1, %v7175_v15, 0.0 }
0x237d   : > { %4193 = vadd.xlane.f32.xlu1 %v4192_v22 }
0x238b   : > { %4351 = vrot.lane.b32.xlu0 %v8243_v7, %s7226_s18 }
0x238e   : > { %4303 = vrot.lane.b32.xlu1 %v8238_v45, %s7226_s18 }
0x2399   : > { %v4185_v24 = vpop.xlane.xlu0 %4184 }
0x239a   : > { %7176 = vrcp.f32 %v4185_v24 }
0x23a4   : > { %v7177_v53 = vpop.eup %7176 }
0x23a5   : > { %v4196_v57 = vmul.f32 %v7177_v53, %v7169_v30 }
0x23a7   : > { %v4203_v54 = vpack.c.bf16 %v4196_v57, %v4196_v57 }
0x23a9   : > { %6726 = vmatmul.mubr.msk.bf16.vlgmr.msra.gmra.mrb[84].mxu0 %vm343_vm1, %v4203_v54 }
0x23aa   : > { %6737 = vmatprep.mubr.msk.bf16.mxu0 %vm7221_vm0, %v7220_v0 }
0x23fa   : > { %v4188_v27 = vpop.xlane.xlu1 %4187 }
0x23fb   : > { %7178 = vrcp.f32 %v4188_v27 }
0x2402   : > { %v4191_v16 = vpop.xlane.xlu0 %4190 }
0x2403   : > { %7180 = vrcp.f32 %v4191_v16  ;;  %v7048_v16 = vld [vmem:[%s8639_s1 + $0x360] sm:$0xff]  }
0x2405   : > { %v7179_v10 = vpop.eup %7178 }
0x2406   : > { %v4198_v28 = vmul.f32 %v7179_v10, %v7171_v1  ;;  %v4352_v7 = vpop.permute.xlu0 %4351  ;;  %v7039_v1 = vld [vmem:[%s8639_s1 + $0x398] sm:$0xff]   ;;  %v7049_v10 = vld [vmem:[%s8639_s1 + $0x368] sm:$0xff]  }
0x2407   : > { %v4357_v45 = vsel %vm602_vm2, %v4352_v7, 0  ;;  %v7051_v7 = vld [vmem:[%s8639_s1 + $0x378] sm:$0xff]  }
0x2408   : > { %v4204_v18 = vpack.c.bf16 %v4198_v28, %v4198_v28  ;;  %v5917_v28 = vld [vmem:[%s8638_s0 + $0x26] ss:$0 sm:$0xff] }
0x240a   : > { %6732 = vmatmul.mubr.msk.bf16.vlgmr.msra.gmra.mrb[124].mxu1 %vm343_vm1, %v4204_v18  ;;  %v4194_v29 = vpop.xlane.xlu1 %4193 }
0x240b   : > { %6742 = vmatpush3.bf16.msra.mxu1 %v4357_v45  ;;  %7182 = vrcp.f32 %v4194_v29  ;;  %6743 = vmatprep.mubr.msk.bf16.mxu1 %vm7221_vm0, %v7220_v0  ;;  %v7052_v45 = vld [vmem:[%s8639_s1 + $0x380] sm:$0xff]  }
0x240c   : > { %6755 = vmatprep.subr.bf16.mxu1 %v7220_v0 }
0x240d   : > { %v7181_v31 = vpop.eup %7180 }
0x240e   : > { %v4200_v6 = vmul.f32 %v7181_v31, %v7173_v11  ;;  %v4304_v33 = vpop.permute.xlu1 %4303  ;;  %v7046_v11 = vld [vmem:[%s8639_s1 + $0x350] sm:$0xff]  }
0x240f   : > { %v4309_v35 = vsel %vm602_vm2, %v4304_v33, 0 }
0x2410   : > { %6736 = vmatpush3.bf16.msra.mxu0 %v4309_v35  ;;  %v4205_v17 = vpack.c.bf16 %v4200_v6, %v4200_v6  ;;  %v7053_v35 = vld [vmem:[%s8639_s1 + $0x388] sm:$0xff]  }
0x2411   : > { %6747 = vmatprep.subr.bf16.mxu0 %v7220_v0 }
0x2413   : > { %6738 = vmatmul.mubr.msk.bf16.vlgmr.msra.gmra.mrb[88].mxu0 %vm343_vm1, %v4205_v17 }
0x2414   : > { %6751 = vmatprep.mubr.msk.bf16.mxu0 %vm7221_vm0, %v7220_v0  ;;  %6748 = vmatpush3.bf16.msra.mxu0 %v7036_v43 }
0x2415   : > { %v7183_v25 = vpop.eup %7182  ;;  %6749 = vmatprep.subr.bf16.mxu0 %v7220_v0 }
0x2416   : > { %v4202_v36 = vmul.f32 %v7183_v25, %v7175_v15 }
0x2418   : > { %v4206_v9 = vpack.c.bf16 %v4202_v36, %v4202_v36  ;;  %6750 = vmatpush3.bf16.msra.mxu0 %v7037_v44 }
0x2419   : > { %6775 = vmatprep.subr.bf16.mxu0 %v7220_v0 }
0x241a   : > { %6744 = vmatmul.mubr.msk.bf16.vlgmr.msra.gmra.mrb[128].mxu1 %vm343_vm1, %v4206_v9 }
0x241b   : > { %6771 = vmatprep.mubr.msk.bf16.mxu1 %vm7221_vm0, %v7220_v0  ;;  %6756 = vmatpush3.bf16.msra.mxu1 %v7046_v11 }
0x241c   : > { %6757 = vmatprep.subr.bf16.mxu1 %v7220_v0 }
0x241f   : > { %6758 = vmatpush3.bf16.msra.mxu1 %v7047_v13 }
0x2420   : > { %6759 = vmatprep.subr.bf16.mxu1 %v7220_v0 }
0x2423   : > { %6760 = vmatpush3.bf16.msra.mxu1 %v7048_v16 }
0x2424   : > { %6761 = vmatprep.subr.bf16.mxu1 %v7220_v0 }
0x2427   : > { %6762 = vmatpush3.bf16.msra.mxu1 %v7049_v10 }
0x2428   : > { %6763 = vmatprep.subr.bf16.mxu1 %v7220_v0 }
0x247c   : > { %v4249_v19 = vpop.f32.mrb[84].mxu0 }
0x247d   : > { %v6727_v37 = vpop.f32.mrb[85].mxu0 }
0x247e   : > { %v4252_v39 = vpop.f32.mrb[86].mxu0 }
0x247f   : > { %v6728_v41 = vpop.f32.mrb[87].mxu0 }
0x24dd   : > { %v4297_v46 = vpop.f32.mrb[124].mxu1 }
0x24de   : > { %4400 = vrot.lane.b32.xlu1 %v4297_v46, %s7227_s21  ;;  %v6733_v26 = vpop.f32.mrb[125].mxu1 }
0x24df   : > { %v4300_v47 = vpop.f32.mrb[126].mxu1  ;;  %v4475_v26 = vld [vmem:[%s8638_s0 + $0x23] sm:$0x3] }
0x24e0   : > { %v6734_v12 = vpop.f32.mrb[127].mxu1 }
0x24e1   : > { %v4493_v12 = vrot.slane %v4475_v26, %v7310_v21 }
0x24e6   : > { %v4345_v32 = vpop.f32.mrb[88].mxu0 }
0x24e7   : > { %4404 = vrot.lane.b32.xlu0 %v4345_v32, %s7228_s24  ;;  %v6739_v48 = vpop.f32.mrb[89].mxu0 }
0x24e8   : > { %v4348_v38 = vpop.f32.mrb[90].mxu0 }
0x24e9   : > { %v6740_v49 = vpop.f32.mrb[91].mxu0  ;;  %v4498_v38 = vrot.slane %v4475_v26, %v7316_v23 }
0x24ed   : > { %v4393_v50 = vpop.f32.mrb[128].mxu1 }
0x24ee   : > { %4408 = vrot.lane.b32.xlu1 %v4393_v50, %s7229_s25  ;;  %v6745_v52 = vpop.f32.mrb[129].mxu1 }
0x24ef   : > { %v4396_v30 = vpop.f32.mrb[130].mxu1 }
0x24f0   : > { %v6746_v55 = vpop.f32.mrb[131].mxu1 }
0x2550   : > { %v4401_v42 = vpop.permute.xlu1 %4400 }
0x2551   : > { %v4411_v14 = vsel %vm343_vm1, %v4249_v19, %v4401_v42 }
0x2559   : > { %v4405_v60 = vpop.permute.xlu0 %4404 }
0x255a   : > { %v4412_v40 = vsel %vm803_vm3, %v4411_v14, %v4405_v60  ;;  %v5908_v60 = vld [vmem:[%s8638_s0 + $0x25] ss:$0 sm:$0xff] }
0x2560   : > { %v4409_v61 = vpop.permute.xlu1 %4408 }
0x2561   : > { %v4413_v62 = vsel %vm805_vm4, %v4412_v40, %v4409_v61 }
0x2562   : > { %v4414_v63 = vpack.c.bf16 %v4413_v62, %v4413_v62 }
0x2564   : > { %6752 = vmatmul.mubr.msk.bf16.vlgmr.msra.gmra.mrb[92].mxu0 %vm824_vm5, %v4414_v63 }
0x2565   : > { %6776 = vmatpush3.bf16.msra.mxu0 %v7038_v51  ;;  %6791 = vmatprep.mubr.msk.bf16.mxu0 %vm7221_vm0, %v7220_v0 }
0x2566   : > { %6777 = vmatprep.subr.bf16.mxu0 %v7220_v0 }
0x2569   : > { %6778 = vmatpush3.bf16.msra.mxu0 %v7039_v1 }
0x256a   : > { %6779 = vmatprep.subr.bf16.mxu0 %v7220_v0 }
0x256d   : > { %6780 = vmatpush3.bf16.msra.mxu0 %v7040_v2 }
0x256e   : > { %6781 = vmatprep.subr.bf16.mxu0 %v7220_v0 }
0x2571   : > { %6782 = vmatpush3.bf16.msra.mxu0 %v7041_v3 }
0x2572   : > { %6783 = vmatprep.subr.bf16.mxu0 %v7220_v0 }
0x2575   : > { %6784 = vmatpush3.bf16.msra.mxu0 %v7042_v4 }
0x2576   : > { %6785 = vmatprep.subr.bf16.mxu0 %v7220_v0 }
0x2579   : > { %6786 = vmatpush3.bf16.msra.mxu0 %v7043_v59 }
0x257a   : > { %6787 = vmatprep.subr.bf16.mxu0 %v7220_v0 }
0x257d   : > { %6788 = vmatpush3.bf16.msra.mxu0 %v7044_v5 }
0x257e   : > { %6789 = vmatprep.subr.bf16.mxu0 %v7220_v0 }
0x2581   : > { %6790 = vmatpush3.bf16.msra.mxu0 %v7045_v8 }
0x2582   : > { %6801 = vmatprep.subr.bf16.mxu0 %v7220_v0 }
0x2584   : > { %6792 = vmatmul.mubr.bf16.vlgmr.msra.gmra.mrb[96].mxu0 %v7949_v34  ;;  %v5904_v34 = vld [vmem:[%s8638_s0 + $0x22] ss:$0 sm:$0xff] }
0x2585   : > { %6803 = vmatprep.mubr.msk.bf16.mxu0 %vm7221_vm0, %v7220_v0 }
0x2637   : > { %v4468_v15 = vpop.f32.mrb[92].mxu0 }
0x2638   : > { %v4469_v22 = vadd.f32 %v5904_v34, %v4468_v15  ;;  %v6753_v24 = vpop.f32.mrb[93].mxu0 }
0x2639   : > { %v4471_v53 = vpop.f32.mrb[94].mxu0 }
0x263a   : > { %v4474_v57 = vadd.f32 %v4469_v22, %v8222_v58  ;;  %v6754_v54 = vpop.f32.mrb[95].mxu0  ;;  %v7050_v58 = vld [vmem:[%s8639_s1 + $0x370] sm:$0xff]  }
0x263b   : > { %6764 = vmatpush3.bf16.msra.mxu1 %v7050_v58 }
0x263c   : > { %4476 = vadd.xlane.f32.xlu0 %v4474_v57  ;;  %v4479_v27 = vmul.f32 %v4474_v57, %v4474_v57  ;;  %6765 = vmatprep.subr.bf16.mxu1 %v7220_v0 }
0x263e   : > { %4480 = vadd.xlane.f32.xlu1 %v4479_v27 }
0x263f   : > { %6766 = vmatpush3.bf16.msra.mxu1 %v7051_v7 }
0x2640   : > { %6767 = vmatprep.subr.bf16.mxu1 %v7220_v0 }
0x2643   : > { %6768 = vmatpush3.bf16.msra.mxu1 %v7052_v45 }
0x2644   : > { %6769 = vmatprep.subr.bf16.mxu1 %v7220_v0 }
0x2647   : > { %6770 = vmatpush3.bf16.msra.mxu1 %v7053_v35 }
0x2648   : > { %6795 = vmatprep.subr.bf16.mxu1 %v7220_v0 }
0x2657   : > { %v4713_v18 = vpop.f32.mrb[96].mxu0 }
0x2658   : > { %v4714_v29 = vadd.f32 %v5917_v28, %v4713_v18  ;;  %v6793_v31 = vpop.f32.mrb[97].mxu0 }
0x2659   : > { %v4716_v6 = vpop.f32.mrb[98].mxu0 }
0x265a   : > { %4738 = vrot.lane.b32.xlu1 %v4714_v29, %s7224_s15  ;;  %4735 = vrot.lane.b32.xlu0 %v4714_v29, %s7223_s14  ;;  %v6794_v33 = vpop.f32.mrb[99].mxu0  ;;  %v8415_v52 = vpack.c.bf16 %v4714_v29, %v4714_v29 }
0x265c   : > { %v4756_v55 = vsel %vm343_vm1, %v8415_v52, 0 }
0x265e   : > { %4741 = vrot.lane.b32.xlu1 %v4714_v29, %s7222_s11 }
0x26c9   : > { %v4477_v17 = vpop.xlane.xlu0 %4476 }
0x26ca   : > { %v4478_v25 = vmul.f32 0.03125, %v4477_v17 }
0x26cb   : > { %v4481_v36 = vpop.xlane.xlu1 %4480 }
0x26cc   : > { %v4483_v9 = vmul.f32 %v4478_v25, %v4478_v25  ;;  %v4482_v19 = vmul.f32 0.03125, %v4481_v36  ;;  %v4488_v47 = vsub.f32 %v4474_v57, %v4478_v25 }
0x26cd   : > { %v4736_v37 = vpop.permute.xlu0 %4735 }
0x26ce   : > { %v4484_v39 = vsub.f32 %v4482_v19, %v4483_v9  ;;  %v8403_v41 = vpack.c.bf16 %v4736_v37, %v4736_v37 }
0x26cf   : > { %v4739_v42 = vpop.permute.xlu1 %4738 }
0x26d0   : > { %v4485_v43 = vmax.f32 %v4484_v39, 0.0  ;;  %v4802_v44 = vsel %vm343_vm1, %v8403_v41, 0  ;;  %v8427_v40 = vpack.c.bf16 %v4739_v42, %v4739_v42 }
0x26d1   : > { %6802 = vmatpush3.bf16.xpose.msra.mxu0 %v4802_v44 }
0x26d2   : > { %v4486_v46 = vadd.f32 1e-12, %v4485_v43  ;;  %6813 = vmatprep.subr.bf16.mxu0 %v7220_v0  ;;  %v4848_v2 = vsel %vm343_vm1, %v8427_v40, 0 }
0x26d3   : > { %v4742_v3 = vpop.permute.xlu1 %4741 }
0x26d4   : > { %7184 = vrsqrt.f32 %v4486_v46  ;;  %v8438_v4 = vpack.c.bf16 %v4742_v3, %v4742_v3 }
0x26d6   : > { %v4894_v8 = vsel %vm343_vm1, %v8438_v4, 0 }
0x26de   : > { %v7185_v32 = vpop.eup %7184 }
0x26df   : > { %v4489_v48 = vmul.f32 %v7185_v32, %v4488_v47 }
0x26e1   : > { %v4494_v49 = vmul.f32 %v4493_v12, %v4489_v48 }
0x26e3   : > { %v8413_v50 = vadd.f32 %v4498_v38, %v4494_v49 }
0x26e5   : > { %v4516_v30 = vpack.c.bf16 %v8413_v50, %v8413_v50 }
0x26e7   : > { %6772 = vmatmul.mubr.bf16.vlgmr.msra.gmra.mrb[132].mxu1 %v4516_v30 }
0x26e8   : > { %6796 = vmatpush3.bf16.xpose.msra.mxu1 %v4756_v55  ;;  %6797 = vmatprep.mubr.msk.bf16.mxu1 %vm7221_vm0, %v7220_v0 }
0x26e9   : > { %6807 = vmatprep.subr.bf16.mxu1 %v7220_v0 }
0x27ba   : > { %v4604_v14 = vpop.f32.mrb[132].mxu1 }
0x27bb   : > { %v4605_v61 = vadd.f32 %v5908_v60, %v4604_v14  ;;  %v6773_v62 = vpop.f32.mrb[133].mxu1 }
0x27bc   : > { %v4607_v51 = vpop.f32.mrb[134].mxu1 }
0x27bd   : > { %v4744_v63 = vpack.c.bf16 %v4605_v61, %v4605_v61  ;;  %v6774_v1 = vpop.f32.mrb[135].mxu1  ;;  %4731 = vrot.lane.b32.xlu1 %v4605_v61, %s7222_s11  ;;  %4725 = vrot.lane.b32.xlu0 %v4605_v61, %s7223_s14 }
0x27bf   : > { %6798 = vmatmul.mubr.msk.bf16.vlgmr.msra.gmra.mrb[136].mxu1 %vm343_vm1, %v4744_v63 }
0x27c0   : > { %6808 = vmatpush3.bf16.xpose.msra.mxu1 %v4848_v2  ;;  %6809 = vmatprep.mubr.msk.bf16.mxu1 %vm7221_vm0, %v7220_v0 }
0x27c1   : > { %4728 = vrot.lane.b32.xlu0 %v4605_v61, %s7224_s15  ;;  %6819 = vmatprep.subr.bf16.mxu1 %v7220_v0 }
0x282f   : > { %v4726_v59 = vpop.permute.xlu0 %4725  ;;  %v4732_v34 = vpop.permute.xlu1 %4731 }
0x2830   : > { %v4745_v5 = vpack.c.bf16 %v4726_v59, %v4726_v59  ;;  %v4747_v15 = vpack.c.bf16 %v4732_v34, %v4732_v34 }
0x2832   : > { %6804 = vmatmul.mubr.msk.bf16.vlgmr.msra.gmra.mrb[100].mxu0 %vm343_vm1, %v4745_v5 }
0x2833   : > { %6814 = vmatpush3.bf16.xpose.msra.mxu0 %v4894_v8  ;;  %v4729_v11 = vpop.permute.xlu0 %4728  ;;  %6815 = vmatprep.mubr.msk.bf16.mxu0 %vm7221_vm0, %v7220_v0 }
0x2834   : > { %v4746_v13 = vpack.c.bf16 %v4729_v11, %v4729_v11  ;;  %6825 = vmatprep.subr.bf16.mxu0 %v7220_v0 }
0x2836   : > { %6810 = vmatmul.mubr.msk.bf16.vlgmr.msra.gmra.mrb[140].mxu1 %vm343_vm1, %v4746_v13 }
0x2837   : > { %6821 = vmatprep.mubr.msk.bf16.mxu1 %vm7221_vm0, %v7220_v0 }
0x283a   : > { %6816 = vmatmul.mubr.msk.bf16.vlgmr.msra.gmra.mrb[104].mxu0 %vm343_vm1, %v4747_v15 }
0x283b   : > { %6827 = vmatprep.mubr.msk.bf16.mxu0 %vm7221_vm0, %v7220_v0 }
0x2892   : > { %v4792_v22 = vpop.f32.mrb[136].mxu1 }
0x2893   : > { %v4936_v24 = vmul.f32 0.35355338, %v4792_v22  ;;  %v6799_v53 = vpop.f32.mrb[137].mxu1 }
0x2894   : > { %v4795_v57 = vpop.f32.mrb[138].mxu1 }
0x2895   : > { %v4940_v54 = vadd.f32 %v4936_v24, %v7374_v56  ;;  %v6800_v27 = vpop.f32.mrb[139].mxu1 }
0x2897   : > { %v4944_v16 = vsel %vm343_vm1, %v4940_v54, -inf }
0x2898   : > { %4945 = vmax.xlane.f32.xlu0 %v4944_v16 }
0x2905   : > { %v4838_v10 = vpop.f32.mrb[100].mxu0 }
0x2906   : > { %v4937_v58 = vmul.f32 0.35355338, %v4838_v10  ;;  %v6805_v28 = vpop.f32.mrb[101].mxu0 }
0x2907   : > { %v4841_v7 = vpop.f32.mrb[102].mxu0 }
0x2908   : > { %v4941_v18 = vadd.f32 %v4937_v58, %v7374_v56  ;;  %v6806_v45 = vpop.f32.mrb[103].mxu0 }
0x2909   : > { %v4884_v29 = vpop.f32.mrb[140].mxu1 }
0x290a   : > { %v4938_v31 = vmul.f32 0.35355338, %v4884_v29  ;;  %v6811_v6 = vpop.f32.mrb[141].mxu1  ;;  %v4947_v33 = vsel %vm343_vm1, %v4941_v18, -inf }
0x290b   : > { %v4887_v35 = vpop.f32.mrb[142].mxu1  ;;  %4948 = vmax.xlane.f32.xlu1 %v4947_v33 }
0x290c   : > { %v4942_v17 = vadd.f32 %v4938_v31, %v7374_v56  ;;  %v6812_v25 = vpop.f32.mrb[143].mxu1  ;;  %v7054_v35 = vld [vmem:[%s8639_s1 + $0x3d0] sm:$0xff]  }
0x290d   : > { %v4930_v36 = vpop.f32.mrb[104].mxu0 }
0x290e   : > { %v4939_v9 = vmul.f32 0.35355338, %v4930_v36  ;;  %v6817_v19 = vpop.f32.mrb[105].mxu0  ;;  %v4950_v37 = vsel %vm343_vm1, %v4942_v17, -inf }
0x290f   : > { %4951 = vmax.xlane.f32.xlu0 %v4950_v37  ;;  %v4933_v39 = vpop.f32.mrb[106].mxu0 }
0x2910   : > { %v4943_v43 = vadd.f32 %v4939_v9, %v7374_v56  ;;  %v6818_v44 = vpop.f32.mrb[107].mxu0 }
0x2912   : > { %v4953_v46 = vsel %vm343_vm1, %v4943_v43, -inf }
0x2913   : > { %4954 = vmax.xlane.f32.xlu0 %v4953_v46 }
0x291c   : > { %4993 = vrot.lane.b32.xlu1 %v8415_v52, %s7225_s16 }
0x2925   : > { %v4946_v26 = vpop.xlane.xlu0 %4945 }
0x2926   : > { %v4956_v47 = vsub.f32 %v4940_v54, %v4946_v26 }
0x2928   : > { %v4960_v12 = vmul.f32 1.442695, %v4956_v47 }
0x292a   : > { %7186 = vpow2.f32 %v4960_v12 }
0x2934   : > { %v7187_v32 = vpop.eup %7186 }
0x2935   : > { %v4968_v48 = vsel %vm343_vm1, %v7187_v32, 0.0 }
0x2940   : > { %4969 = vadd.xlane.f32.xlu1 %v4968_v48 }
0x2998   : > { %v4949_v38 = vpop.xlane.xlu1 %4948 }
0x2999   : > { %v4957_v49 = vsub.f32 %v4941_v18, %v4949_v38 }
0x299b   : > { %v4962_v30 = vmul.f32 1.442695, %v4957_v49 }
0x299c   : > { %v4952_v55 = vpop.xlane.xlu0 %4951  ;;  %v4994_v56 = vpop.permute.xlu1 %4993 }
0x299d   : > { %7188 = vpow2.f32 %v4962_v30  ;;  %v4958_v42 = vsub.f32 %v4942_v17, %v4952_v55  ;;  %v4999_v60 = vsel %vm602_vm2, %v4994_v56, 0  ;;  %v7055_v17 = vld [vmem:[%s8639_s1 + $0x3d8] sm:$0xff]  }
0x299e   : > { %6820 = vmatpush3.bf16.msra.mxu1 %v4999_v60  ;;  %v5934_v60 = vld [vmem:[%s8638_s0 + $0x27] ss:$0 sm:$0xff] }
0x299f   : > { %v4964_v14 = vmul.f32 1.442695, %v4958_v42  ;;  %6831 = vmatprep.subr.bf16.mxu1 %v7220_v0  ;;  %v7056_v42 = vld [vmem:[%s8639_s1 + $0x3e0] sm:$0xff]  }
0x29a0   : > { %v4955_v52 = vpop.xlane.xlu0 %4954 }
0x29a1   : > { %7190 = vpow2.f32 %v4964_v14  ;;  %v4959_v61 = vsub.f32 %v4943_v43, %v4955_v52 }
0x29a3   : > { %v4966_v62 = vmul.f32 1.442695, %v4959_v61 }
0x29a5   : > { %7192 = vpow2.f32 %v4966_v62 }
0x29a7   : > { %v7189_v51 = vpop.eup %7188 }
0x29a8   : > { %v4971_v63 = vsel %vm343_vm1, %v7189_v51, 0.0 }
0x29a9   : > { %4972 = vadd.xlane.f32.xlu0 %v4971_v63 }
0x29ab   : > { %v7191_v1 = vpop.eup %7190 }
0x29ac   : > { %v4974_v2 = vsel %vm343_vm1, %v7191_v1, 0.0 }
0x29ad   : > { %4975 = vadd.xlane.f32.xlu1 %v4974_v2  ;;  %v7057_v2 = vld [vmem:[%s8639_s1 + $0x3e8] sm:$0xff]  }
0x29af   : > { %v7193_v3 = vpop.eup %7192 }
0x29b0   : > { %v4977_v59 = vsel %vm343_vm1, %v7193_v3, 0.0 }
0x29b1   : > { %4978 = vadd.xlane.f32.xlu0 %v4977_v59  ;;  %v7060_v59 = vld [vmem:[%s8639_s1 + $0x400] sm:$0xff]  }
0x29be   : > { %5091 = vrot.lane.b32.xlu1 %v8427_v40, %s7225_s16 }
0x29c2   : > { %5140 = vrot.lane.b32.xlu1 %v8438_v4, %s7225_s16 }
0x29c7   : > { %5042 = vrot.lane.b32.xlu0 %v8403_v41, %s7225_s16 }
0x29cd   : > { %v4970_v5 = vpop.xlane.xlu1 %4969 }
0x29ce   : > { %7194 = vrcp.f32 %v4970_v5  ;;  %v7061_v5 = vld [vmem:[%s8639_s1 + $0x408] sm:$0xff]  }
0x29d8   : > { %v7195_v8 = vpop.eup %7194 }
0x29d9   : > { %v4981_v11 = vmul.f32 %v7195_v8, %v7187_v32  ;;  %v7062_v8 = vld [vmem:[%s8639_s1 + $0x410] sm:$0xff]  }
0x29db   : > { %v4988_v13 = vpack.c.bf16 %v4981_v11, %v4981_v11  ;;  %v7063_v11 = vld [vmem:[%s8639_s1 + $0x418] sm:$0xff]  }
0x29dd   : > { %6822 = vmatmul.mubr.msk.bf16.vlgmr.msra.gmra.mrb[144].mxu1 %vm343_vm1, %v4988_v13 }
0x29de   : > { %6833 = vmatprep.mubr.msk.bf16.mxu1 %vm7221_vm0, %v7220_v0 }
0x2a36   : > { %v4973_v34 = vpop.xlane.xlu0 %4972 }
0x2a37   : > { %7196 = vrcp.f32 %v4973_v34 }
0x2a3a   : > { %v4976_v15 = vpop.xlane.xlu1 %4975 }
0x2a3b   : > { %7198 = vrcp.f32 %v4976_v15 }
0x2a3e   : > { %v5092_v40 = vpop.permute.xlu1 %5091  ;;  %v4979_v22 = vpop.xlane.xlu0 %4978 }
0x2a3f   : > { %v5097_v4 = vsel %vm602_vm2, %v5092_v40, 0  ;;  %7200 = vrcp.f32 %v4979_v22 }
0x2a40   : > { %6832 = vmatpush3.bf16.msra.mxu1 %v5097_v4 }
0x2a41   : > { %v7197_v41 = vpop.eup %7196  ;;  %6843 = vmatprep.subr.bf16.mxu1 %v7220_v0 }
0x2a42   : > { %v4983_v24 = vmul.f32 %v7197_v41, %v7189_v51  ;;  %v5043_v53 = vpop.permute.xlu0 %5042  ;;  %v5141_v54 = vpop.permute.xlu1 %5140 }
0x2a43   : > { %v5048_v57 = vsel %vm602_vm2, %v5043_v53, 0  ;;  %v5146_v58 = vsel %vm602_vm2, %v5141_v54, 0  ;;  %v5264_v53 = vld [vmem:[%s8638_s0 + $0x28] sm:$0x3] }
0x2a44   : > { %6826 = vmatpush3.bf16.msra.mxu0 %v5048_v57  ;;  %v4989_v27 = vpack.c.bf16 %v4983_v24, %v4983_v24  ;;  %v5282_v54 = vrot.slane %v5264_v53, %v7310_v21 }
0x2a45   : > { %v7199_v16 = vpop.eup %7198  ;;  %6837 = vmatprep.subr.bf16.mxu0 %v7220_v0 }
0x2a46   : > { %v4985_v10 = vmul.f32 %v7199_v16, %v7191_v1 }
0x2a47   : > { %6828 = vmatmul.mubr.msk.bf16.vlgmr.msra.gmra.mrb[108].mxu0 %vm343_vm1, %v4989_v27 }
0x2a48   : > { %6838 = vmatpush3.bf16.msra.mxu0 %v5146_v58  ;;  %v4990_v28 = vpack.c.bf16 %v4985_v10, %v4985_v10  ;;  %6839 = vmatprep.mubr.msk.bf16.mxu0 %vm7221_vm0, %v7220_v0  ;;  %v5287_v10 = vrot.slane %v5264_v53, %v7316_v23 }
0x2a49   : > { %v7201_v7 = vpop.eup %7200  ;;  %6851 = vmatprep.subr.bf16.mxu0 %v7220_v0 }
0x2a4a   : > { %v4987_v18 = vmul.f32 %v7201_v7, %v7193_v3  ;;  %6834 = vmatmul.mubr.msk.bf16.vlgmr.msra.gmra.mrb[148].mxu1 %vm343_vm1, %v4990_v28  ;;  %v7058_v3 = vld [vmem:[%s8639_s1 + $0x3f0] sm:$0xff]  }
0x2a4b   : > { %6847 = vmatprep.mubr.msk.bf16.mxu1 %vm7221_vm0, %v7220_v0  ;;  %6844 = vmatpush3.bf16.msra.mxu1 %v7054_v35  ;;  %v7070_v35 = vld [vmem:[%s8639_s1 + $0x450] sm:$0xff]  }
0x2a4c   : > { %v4991_v45 = vpack.c.bf16 %v4987_v18, %v4987_v18  ;;  %6845 = vmatprep.subr.bf16.mxu1 %v7220_v0  ;;  %v7064_v18 = vld [vmem:[%s8639_s1 + $0x420] sm:$0xff]  }
0x2a4f   : > { %6840 = vmatmul.mubr.msk.bf16.vlgmr.msra.gmra.mrb[112].mxu0 %vm343_vm1, %v4991_v45  ;;  %6846 = vmatpush3.bf16.msra.mxu1 %v7055_v17  ;;  %v7065_v45 = vld [vmem:[%s8639_s1 + $0x428] sm:$0xff]   ;;  %v7071_v17 = vld [vmem:[%s8639_s1 + $0x458] sm:$0xff]  }
0x2a50   : > { %6867 = vmatprep.mubr.msk.bf16.mxu0 %vm7221_vm0, %v7220_v0  ;;  %6871 = vmatprep.subr.bf16.mxu1 %v7220_v0 }
0x2a51   : > { %6852 = vmatpush3.bf16.msra.mxu0 %v7056_v42 }
0x2a52   : > { %6853 = vmatprep.subr.bf16.mxu0 %v7220_v0 }
0x2a55   : > { %6854 = vmatpush3.bf16.msra.mxu0 %v7057_v2  ;;  %v7076_v2 = vld [vmem:[%s8639_s1 + $0x480] sm:$0xff]  }
0x2a56   : > { %6855 = vmatprep.subr.bf16.mxu0 %v7220_v0 }
0x2a59   : > { %6856 = vmatpush3.bf16.msra.mxu0 %v7058_v3  ;;  %v7077_v3 = vld [vmem:[%s8639_s1 + $0x488] sm:$0xff]  }
0x2a5a   : > { %6857 = vmatprep.subr.bf16.mxu0 %v7220_v0 }
0x2ab0   : > { %v5035_v29 = vpop.f32.mrb[144].mxu1 }
0x2ab1   : > { %v6823_v31 = vpop.f32.mrb[145].mxu1 }
0x2ab2   : > { %v5038_v6 = vpop.f32.mrb[146].mxu1  ;;  %v7067_v31 = vld [vmem:[%s8639_s1 + $0x438] sm:$0xff]  }
0x2ab3   : > { %v6824_v33 = vpop.f32.mrb[147].mxu1  ;;  %v7068_v6 = vld [vmem:[%s8639_s1 + $0x440] sm:$0xff]  }
0x2ab4   : > { %v7069_v33 = vld [vmem:[%s8639_s1 + $0x448] sm:$0xff]  }
0x2b1a   : > { %v5084_v25 = vpop.f32.mrb[108].mxu0 }
0x2b1b   : > { %5189 = vrot.lane.b32.xlu0 %v5084_v25, %s7227_s21  ;;  %v6829_v36 = vpop.f32.mrb[109].mxu0  ;;  %v5938_v25 = vld [vmem:[%s8638_s0 + $0x2a] ss:$0 sm:$0xff] }
0x2b1c   : > { %v5087_v9 = vpop.f32.mrb[110].mxu0 }
0x2b1d   : > { %v6830_v19 = vpop.f32.mrb[111].mxu0  ;;  %v5133_v37 = vpop.f32.mrb[148].mxu1 }
0x2b1e   : > { %5193 = vrot.lane.b32.xlu1 %v5133_v37, %s7228_s24  ;;  %v6835_v39 = vpop.f32.mrb[149].mxu1 }
0x2b1f   : > { %v5136_v43 = vpop.f32.mrb[150].mxu1 }
0x2b20   : > { %v6836_v44 = vpop.f32.mrb[151].mxu1 }
0x2b22   : > { %v5182_v46 = vpop.f32.mrb[112].mxu0 }
0x2b23   : > { %5197 = vrot.lane.b32.xlu0 %v5182_v46, %s7229_s25  ;;  %v6841_v26 = vpop.f32.mrb[113].mxu0 }
0x2b24   : > { %v5185_v47 = vpop.f32.mrb[114].mxu0 }
0x2b25   : > { %v6842_v12 = vpop.f32.mrb[115].mxu0 }
0x2b8d   : > { %v5190_v32 = vpop.permute.xlu0 %5189 }
0x2b8e   : > { %v5200_v38 = vsel %vm343_vm1, %v5035_v29, %v5190_v32  ;;  %v7066_v29 = vld [vmem:[%s8639_s1 + $0x430] sm:$0xff]  }
0x2b90   : > { %v5194_v48 = vpop.permute.xlu1 %5193 }
0x2b91   : > { %v5201_v49 = vsel %vm803_vm3, %v5200_v38, %v5194_v48 }
0x2b95   : > { %v5198_v30 = vpop.permute.xlu0 %5197 }
0x2b96   : > { %v5202_v55 = vsel %vm805_vm4, %v5201_v49, %v5198_v30  ;;  %v7072_v30 = vld [vmem:[%s8639_s1 + $0x460] sm:$0xff]  }
0x2b97   : > { %v5203_v56 = vpack.c.bf16 %v5202_v55, %v5202_v55 }
0x2b99   : > { %6848 = vmatmul.mubr.msk.bf16.vlgmr.msra.gmra.mrb[152].mxu1 %vm824_vm5, %v5203_v56  ;;  %v5955_v56 = vld [vmem:[%s8638_s0 + $0x2b] ss:$0 sm:$0xff] }
0x2b9a   : > { %6887 = vmatprep.mubr.msk.bf16.mxu1 %vm7221_vm0, %v7220_v0  ;;  %6872 = vmatpush3.bf16.msra.mxu1 %v7064_v18 }
0x2b9b   : > { %6873 = vmatprep.subr.bf16.mxu1 %v7220_v0 }
0x2b9e   : > { %6874 = vmatpush3.bf16.msra.mxu1 %v7065_v45 }
0x2b9f   : > { %6875 = vmatprep.subr.bf16.mxu1 %v7220_v0 }
0x2ba2   : > { %6876 = vmatpush3.bf16.msra.mxu1 %v7066_v29  ;;  %v5665_v29 = vld [vmem:[%s7267_s17 + $0x12] sm:$0xff] }
0x2ba3   : > { %6877 = vmatprep.subr.bf16.mxu1 %v7220_v0 }
0x2ba6   : > { %6878 = vmatpush3.bf16.msra.mxu1 %v7067_v31 }
0x2ba7   : > { %6879 = vmatprep.subr.bf16.mxu1 %v7220_v0 }
0x2baa   : > { %6880 = vmatpush3.bf16.msra.mxu1 %v7068_v6 }
0x2bab   : > { %6881 = vmatprep.subr.bf16.mxu1 %v7220_v0 }
0x2bae   : > { %6882 = vmatpush3.bf16.msra.mxu1 %v7069_v33 }
0x2baf   : > { %6883 = vmatprep.subr.bf16.mxu1 %v7220_v0 }
0x2bb2   : > { %6884 = vmatpush3.bf16.msra.mxu1 %v7070_v35 }
0x2bb3   : > { %6885 = vmatprep.subr.bf16.mxu1 %v7220_v0 }
0x2bb6   : > { %6886 = vmatpush3.bf16.msra.mxu1 %v7071_v17 }
0x2c6c   : > { %v5257_v14 = vpop.f32.mrb[152].mxu1 }
0x2c6d   : > { %v5258_v52 = vadd.f32 %v5934_v60, %v5257_v14  ;;  %v6849_v61 = vpop.f32.mrb[153].mxu1 }
0x2c6e   : > { %v5260_v62 = vpop.f32.mrb[154].mxu1 }
0x2c6f   : > { %v5263_v51 = vadd.f32 %v5258_v52, %v8413_v50  ;;  %v6850_v63 = vpop.f32.mrb[155].mxu1  ;;  %v7059_v50 = vld [vmem:[%s8639_s1 + $0x3f8] sm:$0xff]  }
0x2c70   : > { %6858 = vmatpush3.bf16.msra.mxu0 %v7059_v50  ;;  %v7074_v63 = vld [vmem:[%s8639_s1 + $0x470] sm:$0xff]  }
0x2c71   : > { %5265 = vadd.xlane.f32.xlu1 %v5263_v51  ;;  %v5268_v1 = vmul.f32 %v5263_v51, %v5263_v51  ;;  %6859 = vmatprep.subr.bf16.mxu0 %v7220_v0  ;;  %v7078_v50 = vld [vmem:[%s8639_s1 + $0x490] sm:$0xff]  }
0x2c73   : > { %5269 = vadd.xlane.f32.xlu0 %v5268_v1  ;;  %v7075_v1 = vld [vmem:[%s8639_s1 + $0x478] sm:$0xff]  }
0x2c74   : > { %6860 = vmatpush3.bf16.msra.mxu0 %v7060_v59  ;;  %v7079_v59 = vld [vmem:[%s8639_s1 + $0x498] sm:$0xff]  }
0x2c75   : > { %6861 = vmatprep.subr.bf16.mxu0 %v7220_v0 }
0x2c78   : > { %6862 = vmatpush3.bf16.msra.mxu0 %v7061_v5 }
0x2c79   : > { %6863 = vmatprep.subr.bf16.mxu0 %v7220_v0 }
0x2c7c   : > { %6864 = vmatpush3.bf16.msra.mxu0 %v7062_v8 }
0x2c7d   : > { %6865 = vmatprep.subr.bf16.mxu0 %v7220_v0 }
0x2c80   : > { %6866 = vmatpush3.bf16.msra.mxu0 %v7063_v11 }
0x2c81   : > { %6891 = vmatprep.subr.bf16.mxu0 %v7220_v0 }
0x2cfe   : > { %v5266_v13 = vpop.xlane.xlu1 %5265 }
0x2cff   : > { %v5267_v34 = vmul.f32 0.03125, %v5266_v13 }
0x2d00   : > { %v5270_v15 = vpop.xlane.xlu0 %5269 }
0x2d01   : > { %v5272_v40 = vmul.f32 %v5267_v34, %v5267_v34  ;;  %v5271_v22 = vmul.f32 0.03125, %v5270_v15  ;;  %v5277_v57 = vsub.f32 %v5263_v51, %v5267_v34  ;;  %v7073_v51 = vld [vmem:[%s8639_s1 + $0x468] sm:$0xff]  }
0x2d03   : > { %v5273_v4 = vsub.f32 %v5271_v22, %v5272_v40 }
0x2d05   : > { %v5274_v41 = vmax.f32 %v5273_v4, 0.0  ;;  %v5520_v4 = vld [vmem:[%s8638_s0 + $0x2c] sm:$0x3] }
0x2d07   : > { %v5275_v24 = vadd.f32 1e-12, %v5274_v41 }
0x2d09   : > { %7202 = vrsqrt.f32 %v5275_v24  ;;  %v5538_v24 = vrot.slane %v5520_v4, %v7310_v21 }
0x2d13   : > { %v7203_v27 = vpop.eup %7202 }
0x2d14   : > { %v5278_v16 = vmul.f32 %v7203_v27, %v5277_v57 }
0x2d16   : > { %v5283_v58 = vmul.f32 %v5282_v54, %v5278_v16  ;;  %v5543_v54 = vrot.slane %v5520_v4, %v7316_v23 }
0x2d18   : > { %v5288_v28 = vadd.f32 %v5287_v10, %v5283_v58  ;;  %v5956_v58 = vld [vmem:[%s8638_s0 + $0x2e] ss:$0 sm:$0xff] }
0x2d1a   : > { %v5305_v7 = vpack.c.bf16 %v5288_v28, %v5288_v28 }
0x2d1c   : > { %6868 = vmatmul.mubr.bf16.vlgmr.msra.gmra.mrb[116].mxu0 %v5305_v7 }
0x2d1d   : > { %6907 = vmatprep.mubr.msk.bf16.mxu0 %vm7221_vm0, %v7220_v0  ;;  %6892 = vmatpush3.bf16.msra.mxu0 %v7072_v30 }
0x2d1e   : > { %6893 = vmatprep.subr.bf16.mxu0 %v7220_v0 }
0x2d21   : > { %6894 = vmatpush3.bf16.msra.mxu0 %v7073_v51 }
0x2d22   : > { %6895 = vmatprep.subr.bf16.mxu0 %v7220_v0 }
0x2d25   : > { %6896 = vmatpush3.bf16.msra.mxu0 %v7074_v63 }
0x2d26   : > { %6897 = vmatprep.subr.bf16.mxu0 %v7220_v0 }
0x2d29   : > { %6898 = vmatpush3.bf16.msra.mxu0 %v7075_v1 }
0x2d2a   : > { %6899 = vmatprep.subr.bf16.mxu0 %v7220_v0 }
0x2d2d   : > { %6900 = vmatpush3.bf16.msra.mxu0 %v7076_v2 }
0x2d2e   : > { %6901 = vmatprep.subr.bf16.mxu0 %v7220_v0 }
0x2d31   : > { %6902 = vmatpush3.bf16.msra.mxu0 %v7077_v3 }
0x2d32   : > { %6903 = vmatprep.subr.bf16.mxu0 %v7220_v0 }
0x2d35   : > { %6904 = vmatpush3.bf16.msra.mxu0 %v7078_v50 }
0x2d36   : > { %6905 = vmatprep.subr.bf16.mxu0 %v7220_v0 }
0x2d39   : > { %6906 = vmatpush3.bf16.msra.mxu0 %v7079_v59 }
0x2def   : > { %v5393_v36 = vpop.f32.mrb[116].mxu0 }
0x2df0   : > { %v5394_v9 = vadd.f32 %v5938_v25, %v5393_v36  ;;  %v6869_v19 = vpop.f32.mrb[117].mxu0 }
0x2df1   : > { %v5396_v37 = vpop.f32.mrb[118].mxu0 }
0x2df2   : > { %v5399_v39 = vmul.f32 %v5394_v9, %v5394_v9  ;;  %v6870_v43 = vpop.f32.mrb[119].mxu0  ;;  %v5670_v37 = vsel %vm5669_vm7, 1.0, %v7220_v0 }
0x2df4   : > { %v5400_v44 = vmul.f32 %v5399_v39, %v5394_v9 }
0x2df6   : > { %v5401_v46 = vmul.f32 0.044715, %v5400_v44 }
0x2df8   : > { %v5402_v26 = vadd.f32 %v5401_v46, %v5394_v9 }
0x2dfa   : > { %v5403_v47 = vmul.f32 0.7978846, %v5402_v26 }
0x2dfc   : > { %7204 = vtanh.f32 %v5403_v47 }
0x2e06   : > { %v7205_v12 = vpop.eup %7204 }
0x2e07   : > { %v5405_v32 = vadd.f32 1.0, %v7205_v12 }
0x2e09   : > { %v5406_v48 = vmul.f32 0.5, %v5405_v32 }
0x2e0b   : > { %v5407_v38 = vmul.f32 %v5406_v48, %v5394_v9 }
0x2e0d   : > { %v5424_v49 = vpack.c.bf16 %v5407_v38, %v5407_v38 }
0x2e0f   : > { %6888 = vmatmul.mubr.bf16.vlgmr.msra.gmra.mrb[156].mxu1 %v5424_v49 }
0x2ee2   : > { %v5507_v55 = vpop.f32.mrb[156].mxu1 }
0x2ee3   : > { %v5513_v42 = vadd.f32 %v5507_v55, %v5288_v28  ;;  %v6889_v60 = vpop.f32.mrb[157].mxu1 }
0x2ee4   : > { %v5510_v14 = vpop.f32.mrb[158].mxu1 }
0x2ee5   : > { %v5519_v52 = vadd.f32 %v5955_v56, %v5513_v42  ;;  %v6890_v61 = vpop.f32.mrb[159].mxu1 }
0x2ee7   : > { %5521 = vadd.xlane.f32.xlu0 %v5519_v52  ;;  %v5524_v62 = vmul.f32 %v5519_v52, %v5519_v52 }
0x2ee9   : > { %5525 = vadd.xlane.f32.xlu1 %v5524_v62 }
0x2f74   : > { %v5522_v5 = vpop.xlane.xlu0 %5521 }
0x2f75   : > { %v5523_v8 = vmul.f32 0.03125, %v5522_v5 }
0x2f76   : > { %v5526_v11 = vpop.xlane.xlu1 %5525 }
0x2f77   : > { %v5528_v13 = vmul.f32 %v5523_v8, %v5523_v8  ;;  %v5527_v34 = vmul.f32 0.03125, %v5526_v11  ;;  %v5533_v41 = vsub.f32 %v5519_v52, %v5523_v8 }
0x2f79   : > { %v5529_v15 = vsub.f32 %v5527_v34, %v5528_v13 }
0x2f7b   : > { %v5530_v40 = vmax.f32 %v5529_v15, 0.0 }
0x2f7d   : > { %v5531_v22 = vadd.f32 1e-12, %v5530_v40 }
0x2f7f   : > { %7206 = vrsqrt.f32 %v5531_v22 }
0x2f89   : > { %v7207_v53 = vpop.eup %7206 }
0x2f8a   : > { %v5534_v57 = vmul.f32 %v7207_v53, %v5533_v41 }
0x2f8c   : > { %v5539_v27 = vmul.f32 %v5538_v24, %v5534_v57 }
0x2f8e   : > { %v5544_v16 = vadd.f32 %v5543_v54, %v5539_v27 }
0x2f90   : > { %v5561_v10 = vpack.c.bf16 %v5544_v16, %v5544_v16 }
0x2f92   : > { %6908 = vmatmul.mubr.bf16.vlgmr.msra.gmra.mrb[120].mxu0 %v5561_v10 }
0x3065   : > { %v5649_v28 = vpop.f32.mrb[120].mxu0 }
0x3066   : > { %v5650_v7 = vadd.f32 %v5956_v58, %v5649_v28  ;;  %v6909_v18 = vpop.f32.mrb[121].mxu0 }
0x3067   : > { %v5652_v45 = vpop.f32.mrb[122].mxu0 }
0x3068   : > { %5655 = vmax.xlane.f32.xlu0 %v5650_v7  ;;  %v6910_v31 = vpop.f32.mrb[123].mxu0  ;;  %v5666_v21 = vmul.f32 %v5665_v29, %v5650_v7 }
0x306c   : > { %5667 = vadd.xlane.f32.xlu0 %v5666_v21 }
0x30f5   : > { %v5656_v6 = vpop.xlane.xlu0 %5655 }
0x30f6   : > { %v5657_v33 = vsub.f32 %v5650_v7, %v5656_v6 }
0x30f8   : > { %v5658_v23 = vmul.f32 1.442695, %v5657_v33 }
0x30f9   : > { %v5668_v19 = vpop.xlane.xlu0 %5667 }
0x30fa   : > { %7208 = vpow2.f32 %v5658_v23 }
0x3104   : > { %v7209_v35 = vpop.eup %7208 }
0x3105   : > { %5660 = vadd.xlane.f32.xlu1 %v7209_v35 }
0x3192   : > { %v5661_v17 = vpop.xlane.xlu1 %5660 }
0x3193   : > { %7210 = vlog2.f32 %v5661_v17 }
0x319d   : > { %v7211_v25 = vpop.eup %7210 }
0x319e   : > { %v5663_v36 = vmul.f32 0.6931472, %v7211_v25 }
0x31a0   : > { %v5664_v9 = vadd.f32 %v5663_v36, %v5656_v6 }
0x31a2   : > { %v5671_v39 = vsub.f32 %v5664_v9, %v5668_v19 }
0x31a4   : > { %v5672_v43 = vmul.f32 %v5671_v39, %v5670_v37 }
0x31a6   : > { %v5674_v44 = vsel %vm5673_vm8, %v5672_v43, 0.0 }
0x31a7   : > { %5675 = vadd.xlane.f32.xlu1 %v5674_v44 }
0x3234   : > { %v5676_v46 = vpop.xlane.xlu1 %5675 }
0x3235   : > { %v5677_v26 = vrot.slane %v5676_v46, 4 }
0x3237   : > { %v5678_v47 = vadd.f32 %v5677_v26, %v5676_v46 }
0x3239   : > { %v5679_v12 = vrot.slane %v5678_v47, 2 }
0x323b   : > { %v5680_v32 = vadd.f32 %v5679_v12, %v5678_v47 }
0x323d   : > { %v5681_v48 = vrot.slane %v5680_v32, 1 }
0x323f   : > { %v5682_v38 = vadd.f32 %v5681_v48, %v5680_v32 }
0x3241   : > { %6911 = vpush %v5682_v38 }
0x3272   : > { %s6912_s20 = spop %6911 }
0x3273   : > { %v5684_v20 = vstv %s6912_s20 }
0x3274   : > { %5685 = vst [vmem:[%s166_s19] sm:$0x1] %v5684_v20 }
0x3275 PF: > { %s13_s12 = sadd.s32 1, %s7218_s12  }
0x3276   : > { %p10_p4 = scmp.ge.s32.totalorder %s13_s12, 4  }
0x3278   :  { %12 = sbr.rel (!%p10_p4) target bundleno = 1 (0x1), region = 62 }

</bundles_post_ra>
